<compile_context>
chip_gen: v7x
topology: tpu7x:2x2x1
jax: 0.10.0
libtpu: 0.0.40
codegen_flags: <defaults>
</compile_context>

<pallas_src>
import math
from functools import partial

import jax
import jax.numpy as jnp
import numpy as np
from jax.experimental import pallas as pl
from jax.experimental.pallas import tpu as pltpu


# ----------------------------------------------------------------------------
# Kernel (feature-major: activations are (features, tile_m))
# ----------------------------------------------------------------------------
def finn_kernel(*refs, num_layers, hidden, in_features):
    """refs = (coords_t, proj_t, w0_sin, w0_cos, b0,
               [w_fc_i, b_fc_i for i in 1..num_layers-1],
               w_final, b_final, out)."""
    coords_ref, projT_ref, w0s_ref, w0c_ref, b0_ref = refs[:5]
    idx = 5
    mid_refs = []
    for _ in range(num_layers - 1):
        mid_refs.append((refs[idx], refs[idx + 1]))
        idx += 2
    w_fin_ref = refs[idx]
    b_fin_ref = refs[idx + 1]
    out_ref = refs[idx + 2]

    f32 = jnp.float32
    eps2 = 1e-24  # (1e-12)^2 — matches F.normalize eps applied on the norm

    coords = coords_ref[...].astype(f32)          # (C, tm)
    projT = projT_ref[...].astype(f32)            # (F, C), sigma pre-folded

    # --- RandFourierFeature: K=3 projection as 3 VPU broadcast FMAs ---------
    # lin[f, m] = sum_c projT[f, c] * coords[c, m]
    lin = projT[:, 0:1] * coords[0:1, :]          # (F,1)*(1,tm) -> (F, tm)
    for c in range(1, in_features):
        lin = lin + projT[:, c:c + 1] * coords[c:c + 1, :]

    s = jnp.sin(lin)                              # (F, tm)  EUP, lane-dense
    c_ = jnp.cos(lin)                             # (F, tm)

    # --- fused [FC_0 ; scaling] matmul, sin/cos column blocks ---------------
    z = (jnp.dot(w0s_ref[...], s, preferred_element_type=f32)
         + jnp.dot(w0c_ref[...], c_, preferred_element_type=f32)
         + b0_ref[...])                           # (2H, tm)
    h = jnp.maximum(z[:hidden, :], 0.0)           # FC_0 + ReLU (sublane split)
    fx = z[hidden:, :]                            # scaling(pe)

    def l2_normalize(v):                          # normalize along features
        ss = jnp.sum(v * v, axis=0, keepdims=True)          # (1, tm)
        return v * jax.lax.rsqrt(jnp.maximum(ss, eps2))

    out_act = l2_normalize(h) * fx                # (H, tm)

    # --- remaining FC layers -------------------------------------------------
    for (w_ref, b_ref) in mid_refs:
        h = jnp.dot(w_ref[...], out_act, preferred_element_type=f32) + b_ref[...]
        h = jnp.maximum(h, 0.0)
        out_act = l2_normalize(h) * fx

    # --- final head: already (out, tm), lane-dense store, no transpose ------
    final = (jnp.dot(w_fin_ref[...], out_act, preferred_element_type=f32)
             + b_fin_ref[...])                    # (out, tm)
    out_ref[...] = final.astype(out_ref.dtype)


# ----------------------------------------------------------------------------
# Host-side weight packing / constant folding (do once, not per call)
# ----------------------------------------------------------------------------
def pack_finn_params(params, *, sigma, scale, num_frequencies):
    F_ = num_frequencies
    pe_scale = 1.0 if scale == -1 else scale / np.sqrt(F_)

    proj_t = (params["proj"] * sigma).T                        # (F, in)

    w_fc0, b_fc0 = params["fc"][0]                             # (H, 2F), (H,)
    w_sc, b_sc = params["scaling"]                             # (H, 2F), (H,)

    # pack [FC_0 ; scaling] along output rows -> (2H, 2F); fold pe scale in
    w0 = jnp.concatenate([w_fc0, w_sc], axis=0) * pe_scale     # (2H, 2F)
    w0_sin = w0[:, :F_]                                        # (2H, F)
    w0_cos = w0[:, F_:]                                        # (2H, F)
    b0 = jnp.concatenate([b_fc0, b_sc])[:, None]               # (2H, 1)

    mid = [(w, b[:, None]) for (w, b) in params["fc"][1:]]     # (H,H), (H,1)

    w_final = params["w_final"]                                # (out, H)
    b_final = params["b_final"][:, None]                       # (out, 1)

    return {"proj_t": proj_t, "w0_sin": w0_sin, "w0_cos": w0_cos, "b0": b0,
            "mid": mid, "w_final": w_final, "b_final": b_final}


# ----------------------------------------------------------------------------
# Wrapper
# ----------------------------------------------------------------------------
def finn_forward(coords, packed, *, num_layers, hidden_features, out_features,
                 tile_m=1024):
    B, N, C = coords.shape
    M = B * N
    M_pad = pl.cdiv(M, tile_m) * tile_m

    # feature-major coords: (C, M_pad); padded columns are finite & sliced off
    x_t = coords.reshape(M, C).T.astype(jnp.float32)
    if M_pad != M:
        x_t = jnp.pad(x_t, ((0, 0), (0, M_pad - M)))
    n_tiles = M_pad // tile_m

    def full_spec(arr):
        # constant index map: block stays resident, no re-DMA across the grid
        return pl.BlockSpec(arr.shape, lambda i: (0,) * arr.ndim)

    inputs = [x_t, packed["proj_t"], packed["w0_sin"], packed["w0_cos"],
              packed["b0"]]
    in_specs = [pl.BlockSpec((C, tile_m), lambda i: (0, i))]
    in_specs += [full_spec(a) for a in inputs[1:]]
    for (w, b) in packed["mid"]:
        inputs += [w, b]
        in_specs += [full_spec(w), full_spec(b)]
    inputs += [packed["w_final"], packed["b_final"]]
    in_specs += [full_spec(packed["w_final"]), full_spec(packed["b_final"])]

    kernel = partial(finn_kernel, num_layers=num_layers, hidden=hidden_features,
                     in_features=C)

    out_t = pl.pallas_call(
        kernel,
        out_shape=jax.ShapeDtypeStruct((out_features, M_pad), jnp.float32),
        grid=(n_tiles,),
        in_specs=in_specs,
        out_specs=pl.BlockSpec((out_features, tile_m), lambda i: (0, i)),
        compiler_params=pltpu.CompilerParams(
            dimension_semantics=("parallel",)),
    )(*inputs)

    # (out, M_pad) -> (B, N, out)
    return out_t[:, :M].T.reshape(B, N, out_features)


# ----------------------------------------------------------------------------
# Pure-JAX reference (mirrors the PyTorch FINN module exactly)
# ----------------------------------------------------------------------------
def finn_reference(coords, params, *, sigma, scale, num_frequencies):
    B, N, C = coords.shape
    x = coords.reshape(B * N, C)

    lin = x @ (params["proj"] * sigma)
    pe = jnp.concatenate([jnp.sin(lin), jnp.cos(lin)], axis=-1)
    if scale != -1:
        pe = pe * (scale / np.sqrt(num_frequencies))

    w_sc, b_sc = params["scaling"]
    fx = pe @ w_sc.T + b_sc

    eps = 1e-12
    out = pe
    for (w, b) in params["fc"]:
        h = jnp.maximum(out @ w.T + b, 0.0)
        nrm = jnp.sqrt(jnp.sum(h * h, axis=-1, keepdims=True))
        out = (h / jnp.maximum(nrm, eps)) * fx

    final = out @ params["w_final"].T + params["b_final"]
    return final.reshape(B, N, -1)


# ----------------------------------------------------------------------------
# Deterministic parameter construction (PyTorch layouts: W is (out, in))
# ----------------------------------------------------------------------------
def make_params(key, *, in_features, hidden_features, out_features, num_layers,
                num_frequencies, ff_range=2.0):
    keys = jax.random.split(key, num_layers + 3)
    pe_out = 2 * num_frequencies

    # RandFourierFeature projection buffer: randn * (2*pi / range)
    # TODO(synk): PyTorch uses torch.manual_seed(0) randn; we use jax PRNG here.
    proj = jax.random.normal(keys[0], (in_features, num_frequencies),
                             jnp.float32) * (2.0 * np.pi / ff_range)

    def linear(k, fan_in, fan_out):
        bound = 1.0 / math.sqrt(fan_in)
        kw, kb = jax.random.split(k)
        w = jax.random.uniform(kw, (fan_out, fan_in), jnp.float32, -bound, bound)
        b = jax.random.uniform(kb, (fan_out,), jnp.float32, -bound, bound)
        return w, b

    scaling = linear(keys[1], pe_out, hidden_features)
    fc = []
    for i in range(num_layers):
        fan_in = pe_out if i == 0 else hidden_features
        fc.append(linear(keys[2 + i], fan_in, hidden_features))
    w_final, b_final = linear(keys[2 + num_layers], hidden_features, out_features)

    return {"proj": proj, "scaling": scaling, "fc": fc,
            "w_final": w_final, "b_final": b_final}


# ----------------------------------------------------------------------------
if __name__ == "__main__":
    # coords: (batch, num_points, in_features).  M = 2048 with tile_m = 1024
    # gives a grid of 2 even steps (both v7x TensorCores busy, still >= 2
    # steps so per-step overhead is amortized on v5e/v6e too).
    B, N = 2, 1024
    in_features = 3
    hidden_features = 32
    num_layers = 3
    num_frequencies = 16
    out_features = 1
    sigma = 1
    scale = 80

    key = jax.random.PRNGKey(0)
    k_coords, k_params = jax.random.split(key)
    coords = jax.random.uniform(k_coords, (B, N, in_features), jnp.float32,
                                -1.0, 1.0)
    params = make_params(k_params,
                         in_features=in_features,
                         hidden_features=hidden_features,
                         out_features=out_features,
                         num_layers=num_layers,
                         num_frequencies=num_frequencies)
    packed = pack_finn_params(params, sigma=sigma, scale=scale,
                              num_frequencies=num_frequencies)

    out = finn_forward(coords, packed,
                       num_layers=num_layers,
                       hidden_features=hidden_features,
                       out_features=out_features,
                       tile_m=1024)
    out = jax.block_until_ready(out)

    ref = finn_reference(coords, params, sigma=sigma, scale=scale,
                         num_frequencies=num_frequencies)
    ref = jax.block_until_ready(ref)

    assert out.shape == (B, N, out_features)
    np.testing.assert_allclose(np.asarray(out), np.asarray(ref),
                               rtol=2e-3, atol=2e-3)
    print("KERNEL_OK")
</pallas_src>

<mosaic_0001>
module attributes {stable_mosaic.version = 11 : i64} {
  func.func @finn_kernel(%arg0: i32, %arg1: memref<3x1024xf32, #tpu.memory_space<vmem>>, %arg2: memref<16x3xf32, #tpu.memory_space<vmem>>, %arg3: memref<64x16xf32, #tpu.memory_space<vmem>>, %arg4: memref<64x16xf32, #tpu.memory_space<vmem>>, %arg5: memref<64x1xf32, #tpu.memory_space<vmem>>, %arg6: memref<32x32xf32, #tpu.memory_space<vmem>>, %arg7: memref<32x1xf32, #tpu.memory_space<vmem>>, %arg8: memref<32x32xf32, #tpu.memory_space<vmem>>, %arg9: memref<32x1xf32, #tpu.memory_space<vmem>>, %arg10: memref<1x32xf32, #tpu.memory_space<vmem>>, %arg11: memref<1x1xf32, #tpu.memory_space<vmem>>, %arg12: memref<1x1024xf32, #tpu.memory_space<vmem>>) attributes {dimension_semantics = [#tpu.dimension_semantics<parallel>], iteration_bounds = array<i64: 2>, scalar_prefetch = 0 : i64, scratch_operands = 0 : i64, tpu.core_type = #tpu.core_type<tc>, window_params = [{transform_indices = @transform_0, window_bounds = array<i64: 3, 1024>}, {pipeline_mode = #tpu.pipeline_mode<synchronous>, transform_indices = @transform_1, window_bounds = array<i64: 16, 3>}, {pipeline_mode = #tpu.pipeline_mode<synchronous>, transform_indices = @transform_2, window_bounds = array<i64: 64, 16>}, {pipeline_mode = #tpu.pipeline_mode<synchronous>, transform_indices = @transform_3, window_bounds = array<i64: 64, 16>}, {pipeline_mode = #tpu.pipeline_mode<synchronous>, transform_indices = @transform_4, window_bounds = array<i64: 64, 1>}, {pipeline_mode = #tpu.pipeline_mode<synchronous>, transform_indices = @transform_5, window_bounds = array<i64: 32, 32>}, {pipeline_mode = #tpu.pipeline_mode<synchronous>, transform_indices = @transform_6, window_bounds = array<i64: 32, 1>}, {pipeline_mode = #tpu.pipeline_mode<synchronous>, transform_indices = @transform_7, window_bounds = array<i64: 32, 32>}, {pipeline_mode = #tpu.pipeline_mode<synchronous>, transform_indices = @transform_8, window_bounds = array<i64: 32, 1>}, {pipeline_mode = #tpu.pipeline_mode<synchronous>, transform_indices = @transform_9, window_bounds = array<i64: 1, 32>}, {pipeline_mode = #tpu.pipeline_mode<synchronous>, transform_indices = @transform_10, window_bounds = array<i64: 1, 1>}, {transform_indices = @transform_11, window_bounds = array<i64: 1, 1024>}]} {
    %c0 = arith.constant 0 : index
    %c0_0 = arith.constant 0 : index
    %0 = vector.load %arg1[%c0, %c0_0] : memref<3x1024xf32, #tpu.memory_space<vmem>>, vector<3x1024xf32>
    %c0_1 = arith.constant 0 : index
    %c0_2 = arith.constant 0 : index
    %1 = vector.load %arg2[%c0_1, %c0_2] : memref<16x3xf32, #tpu.memory_space<vmem>>, vector<16x3xf32>
    %2 = vector.extract_strided_slice %1 {offsets = [0, 0], sizes = [16, 1], strides = [1, 1]} : vector<16x3xf32> to vector<16x1xf32>
    %3 = vector.extract_strided_slice %0 {offsets = [0, 0], sizes = [1, 1024], strides = [1, 1]} : vector<3x1024xf32> to vector<1x1024xf32>
    %4 = vector.broadcast %2 : vector<16x1xf32> to vector<16x1024xf32>
    %5 = vector.broadcast %3 : vector<1x1024xf32> to vector<16x1024xf32>
    %6 = arith.mulf %4, %5 : vector<16x1024xf32>
    %7 = vector.extract_strided_slice %1 {offsets = [0, 1], sizes = [16, 1], strides = [1, 1]} : vector<16x3xf32> to vector<16x1xf32>
    %8 = vector.extract_strided_slice %0 {offsets = [1, 0], sizes = [1, 1024], strides = [1, 1]} : vector<3x1024xf32> to vector<1x1024xf32>
    %9 = vector.broadcast %7 : vector<16x1xf32> to vector<16x1024xf32>
    %10 = vector.broadcast %8 : vector<1x1024xf32> to vector<16x1024xf32>
    %11 = arith.mulf %9, %10 : vector<16x1024xf32>
    %12 = arith.addf %6, %11 : vector<16x1024xf32>
    %13 = vector.extract_strided_slice %1 {offsets = [0, 2], sizes = [16, 1], strides = [1, 1]} : vector<16x3xf32> to vector<16x1xf32>
    %14 = vector.extract_strided_slice %0 {offsets = [2, 0], sizes = [1, 1024], strides = [1, 1]} : vector<3x1024xf32> to vector<1x1024xf32>
    %15 = vector.broadcast %13 : vector<16x1xf32> to vector<16x1024xf32>
    %16 = vector.broadcast %14 : vector<1x1024xf32> to vector<16x1024xf32>
    %17 = arith.mulf %15, %16 : vector<16x1024xf32>
    %18 = arith.addf %12, %17 : vector<16x1024xf32>
    %19 = math.sin %18 : vector<16x1024xf32>
    %20 = math.cos %18 : vector<16x1024xf32>
    %c0_3 = arith.constant 0 : index
    %c0_4 = arith.constant 0 : index
    %21 = vector.load %arg3[%c0_3, %c0_4] : memref<64x16xf32, #tpu.memory_space<vmem>>, vector<64x16xf32>
    %cst = arith.constant dense<0.000000e+00> : vector<64x1024xf32>
    %22 = tpu.matmul %21, %19, %cst {dimension_numbers = #tpu.dot_dimension_numbers<[1], [0], [0], [1], [0, 0, 1, 1], [], []>} : vector<64x16xf32>, vector<16x1024xf32>, vector<64x1024xf32> -> vector<64x1024xf32>
    %c0_5 = arith.constant 0 : index
    %c0_6 = arith.constant 0 : index
    %23 = vector.load %arg4[%c0_5, %c0_6] : memref<64x16xf32, #tpu.memory_space<vmem>>, vector<64x16xf32>
    %cst_7 = arith.constant dense<0.000000e+00> : vector<64x1024xf32>
    %24 = tpu.matmul %23, %20, %cst_7 {dimension_numbers = #tpu.dot_dimension_numbers<[1], [0], [0], [1], [0, 0, 1, 1], [], []>} : vector<64x16xf32>, vector<16x1024xf32>, vector<64x1024xf32> -> vector<64x1024xf32>
    %25 = arith.addf %22, %24 : vector<64x1024xf32>
    %c0_8 = arith.constant 0 : index
    %c0_9 = arith.constant 0 : index
    %26 = vector.load %arg5[%c0_8, %c0_9] : memref<64x1xf32, #tpu.memory_space<vmem>>, vector<64x1xf32>
    %27 = vector.broadcast %26 : vector<64x1xf32> to vector<64x1024xf32>
    %28 = arith.addf %25, %27 : vector<64x1024xf32>
    %29 = vector.extract_strided_slice %28 {offsets = [0, 0], sizes = [32, 1024], strides = [1, 1]} : vector<64x1024xf32> to vector<32x1024xf32>
    %cst_10 = arith.constant 0.000000e+00 : f32
    %30 = vector.broadcast %cst_10 : f32 to vector<32x1024xf32>
    %31 = arith.maximumf %29, %30 : vector<32x1024xf32>
    %32 = vector.extract_strided_slice %28 {offsets = [32, 0], sizes = [32, 1024], strides = [1, 1]} : vector<64x1024xf32> to vector<32x1024xf32>
    %33 = arith.mulf %31, %31 : vector<32x1024xf32>
    %cst_11 = arith.constant dense<0.000000e+00> : vector<1024xf32>
    %34 = vector.multi_reduction <add>, %33, %cst_11 [0] : vector<32x1024xf32> to vector<1024xf32>
    %35 = vector.shape_cast %34 : vector<1024xf32> to vector<1x1024xf32>
    %cst_12 = arith.constant 1.000000e-24 : f32
    %36 = vector.broadcast %cst_12 : f32 to vector<1x1024xf32>
    %37 = arith.maximumf %35, %36 : vector<1x1024xf32>
    %38 = math.rsqrt %37 : vector<1x1024xf32>
    %39 = vector.broadcast %38 : vector<1x1024xf32> to vector<32x1024xf32>
    %40 = arith.mulf %31, %39 : vector<32x1024xf32>
    %41 = arith.mulf %40, %32 : vector<32x1024xf32>
    %c0_13 = arith.constant 0 : index
    %c0_14 = arith.constant 0 : index
    %42 = vector.load %arg6[%c0_13, %c0_14] : memref<32x32xf32, #tpu.memory_space<vmem>>, vector<32x32xf32>
    %cst_15 = arith.constant dense<0.000000e+00> : vector<32x1024xf32>
    %43 = tpu.matmul %42, %41, %cst_15 {dimension_numbers = #tpu.dot_dimension_numbers<[1], [0], [0], [1], [0, 0, 1, 1], [], []>} : vector<32x32xf32>, vector<32x1024xf32>, vector<32x1024xf32> -> vector<32x1024xf32>
    %c0_16 = arith.constant 0 : index
    %c0_17 = arith.constant 0 : index
    %44 = vector.load %arg7[%c0_16, %c0_17] : memref<32x1xf32, #tpu.memory_space<vmem>>, vector<32x1xf32>
    %45 = vector.broadcast %44 : vector<32x1xf32> to vector<32x1024xf32>
    %46 = arith.addf %43, %45 : vector<32x1024xf32>
    %cst_18 = arith.constant 0.000000e+00 : f32
    %47 = vector.broadcast %cst_18 : f32 to vector<32x1024xf32>
    %48 = arith.maximumf %46, %47 : vector<32x1024xf32>
    %49 = arith.mulf %48, %48 : vector<32x1024xf32>
    %cst_19 = arith.constant dense<0.000000e+00> : vector<1024xf32>
    %50 = vector.multi_reduction <add>, %49, %cst_19 [0] : vector<32x1024xf32> to vector<1024xf32>
    %51 = vector.shape_cast %50 : vector<1024xf32> to vector<1x1024xf32>
    %cst_20 = arith.constant 1.000000e-24 : f32
    %52 = vector.broadcast %cst_20 : f32 to vector<1x1024xf32>
    %53 = arith.maximumf %51, %52 : vector<1x1024xf32>
    %54 = math.rsqrt %53 : vector<1x1024xf32>
    %55 = vector.broadcast %54 : vector<1x1024xf32> to vector<32x1024xf32>
    %56 = arith.mulf %48, %55 : vector<32x1024xf32>
    %57 = arith.mulf %56, %32 : vector<32x1024xf32>
    %c0_21 = arith.constant 0 : index
    %c0_22 = arith.constant 0 : index
    %58 = vector.load %arg8[%c0_21, %c0_22] : memref<32x32xf32, #tpu.memory_space<vmem>>, vector<32x32xf32>
    %cst_23 = arith.constant dense<0.000000e+00> : vector<32x1024xf32>
    %59 = tpu.matmul %58, %57, %cst_23 {dimension_numbers = #tpu.dot_dimension_numbers<[1], [0], [0], [1], [0, 0, 1, 1], [], []>} : vector<32x32xf32>, vector<32x1024xf32>, vector<32x1024xf32> -> vector<32x1024xf32>
    %c0_24 = arith.constant 0 : index
    %c0_25 = arith.constant 0 : index
    %60 = vector.load %arg9[%c0_24, %c0_25] : memref<32x1xf32, #tpu.memory_space<vmem>>, vector<32x1xf32>
    %61 = vector.broadcast %60 : vector<32x1xf32> to vector<32x1024xf32>
    %62 = arith.addf %59, %61 : vector<32x1024xf32>
    %cst_26 = arith.constant 0.000000e+00 : f32
    %63 = vector.broadcast %cst_26 : f32 to vector<32x1024xf32>
    %64 = arith.maximumf %62, %63 : vector<32x1024xf32>
    %65 = arith.mulf %64, %64 : vector<32x1024xf32>
    %cst_27 = arith.constant dense<0.000000e+00> : vector<1024xf32>
    %66 = vector.multi_reduction <add>, %65, %cst_27 [0] : vector<32x1024xf32> to vector<1024xf32>
    %67 = vector.shape_cast %66 : vector<1024xf32> to vector<1x1024xf32>
    %cst_28 = arith.constant 1.000000e-24 : f32
    %68 = vector.broadcast %cst_28 : f32 to vector<1x1024xf32>
    %69 = arith.maximumf %67, %68 : vector<1x1024xf32>
    %70 = math.rsqrt %69 : vector<1x1024xf32>
    %71 = vector.broadcast %70 : vector<1x1024xf32> to vector<32x1024xf32>
    %72 = arith.mulf %64, %71 : vector<32x1024xf32>
    %73 = arith.mulf %72, %32 : vector<32x1024xf32>
    %c0_29 = arith.constant 0 : index
    %c0_30 = arith.constant 0 : index
    %74 = vector.load %arg10[%c0_29, %c0_30] : memref<1x32xf32, #tpu.memory_space<vmem>>, vector<1x32xf32>
    %cst_31 = arith.constant dense<0.000000e+00> : vector<1x1024xf32>
    %75 = tpu.matmul %74, %73, %cst_31 {dimension_numbers = #tpu.dot_dimension_numbers<[1], [0], [0], [1], [0, 0, 1, 1], [], []>} : vector<1x32xf32>, vector<32x1024xf32>, vector<1x1024xf32> -> vector<1x1024xf32>
    %c0_32 = arith.constant 0 : index
    %c0_33 = arith.constant 0 : index
    %76 = vector.load %arg11[%c0_32, %c0_33] : memref<1x1xf32, #tpu.memory_space<vmem>>, vector<1x1xf32>
    %77 = vector.broadcast %76 : vector<1x1xf32> to vector<1x1024xf32>
    %78 = arith.addf %75, %77 : vector<1x1024xf32>
    %c0_34 = arith.constant 0 : index
    %c0_35 = arith.constant 0 : index
    %79 = vector.load %arg12[%c0_34, %c0_35] : memref<1x1024xf32, #tpu.memory_space<vmem>>, vector<1x1024xf32>
    tpu.vector_store %arg12[%c0_34, %c0_35], %78 {strides = array<i32>} : memref<1x1024xf32, #tpu.memory_space<vmem>>, vector<1x1024xf32>,
    return
  }
  func.func @transform_0(%arg0: i32) -> (i32, i32) {
    %c0_i32 = arith.constant 0 : i32
    %c0_i32_0 = arith.constant 0 : i32
    return %c0_i32, %arg0 : i32, i32
  }
  func.func @transform_1(%arg0: i32) -> (i32, i32) {
    %c0_i32 = arith.constant 0 : i32
    %c0_i32_0 = arith.constant 0 : i32
    %c0_i32_1 = arith.constant 0 : i32
    return %c0_i32, %c0_i32_0 : i32, i32
  }
  func.func @transform_2(%arg0: i32) -> (i32, i32) {
    %c0_i32 = arith.constant 0 : i32
    %c0_i32_0 = arith.constant 0 : i32
    %c0_i32_1 = arith.constant 0 : i32
    return %c0_i32, %c0_i32_0 : i32, i32
  }
  func.func @transform_3(%arg0: i32) -> (i32, i32) {
    %c0_i32 = arith.constant 0 : i32
    %c0_i32_0 = arith.constant 0 : i32
    %c0_i32_1 = arith.constant 0 : i32
    return %c0_i32, %c0_i32_0 : i32, i32
  }
  func.func @transform_4(%arg0: i32) -> (i32, i32) {
    %c0_i32 = arith.constant 0 : i32
    %c0_i32_0 = arith.constant 0 : i32
    %c0_i32_1 = arith.constant 0 : i32
    return %c0_i32, %c0_i32_0 : i32, i32
  }
  func.func @transform_5(%arg0: i32) -> (i32, i32) {
    %c0_i32 = arith.constant 0 : i32
    %c0_i32_0 = arith.constant 0 : i32
    %c0_i32_1 = arith.constant 0 : i32
    return %c0_i32, %c0_i32_0 : i32, i32
  }
  func.func @transform_6(%arg0: i32) -> (i32, i32) {
    %c0_i32 = arith.constant 0 : i32
    %c0_i32_0 = arith.constant 0 : i32
    %c0_i32_1 = arith.constant 0 : i32
    return %c0_i32, %c0_i32_0 : i32, i32
  }
  func.func @transform_7(%arg0: i32) -> (i32, i32) {
    %c0_i32 = arith.constant 0 : i32
    %c0_i32_0 = arith.constant 0 : i32
    %c0_i32_1 = arith.constant 0 : i32
    return %c0_i32, %c0_i32_0 : i32, i32
  }
  func.func @transform_8(%arg0: i32) -> (i32, i32) {
    %c0_i32 = arith.constant 0 : i32
    %c0_i32_0 = arith.constant 0 : i32
    %c0_i32_1 = arith.constant 0 : i32
    return %c0_i32, %c0_i32_0 : i32, i32
  }
  func.func @transform_9(%arg0: i32) -> (i32, i32) {
    %c0_i32 = arith.constant 0 : i32
    %c0_i32_0 = arith.constant 0 : i32
    %c0_i32_1 = arith.constant 0 : i32
    return %c0_i32, %c0_i32_0 : i32, i32
  }
  func.func @transform_10(%arg0: i32) -> (i32, i32) {
    %c0_i32 = arith.constant 0 : i32
    %c0_i32_0 = arith.constant 0 : i32
    %c0_i32_1 = arith.constant 0 : i32
    return %c0_i32, %c0_i32_0 : i32, i32
  }
  func.func @transform_11(%arg0: i32) -> (i32, i32) {
    %c0_i32 = arith.constant 0 : i32
    %c0_i32_0 = arith.constant 0 : i32
    return %c0_i32, %arg0 : i32, i32
  }
}

</mosaic_0001>

<bundles_post_ra>
// kernel: tpu_custom_call.1
= control target key start
LH: loop header
LB: loop body
LE: loop exit
PB: predicated region body
PF: predicated region fallthrough
CT: control target
= control target key end

     0   :  { %s11345_s0 = inlined_call_operand.vmem [shape: f32[3,2048], index: 0, kind: input, shape index: {}]   ;;  %s11346_s1 = inlined_call_operand.vmem [shape: f32[16,3], index: 1, kind: input, shape index: {}]   ;;  %s11347_s2 = inlined_call_operand.vmem [shape: f32[64,16], index: 2, kind: input, shape index: {}]   ;;  %s11348_s3 = inlined_call_operand.vmem [shape: f32[64,16], index: 3, kind: input, shape index: {}]   ;;  %s11349_s4 = inlined_call_operand.vmem [shape: f32[64,1], index: 4, kind: input, shape index: {}]   ;;  %s11350_s5 = inlined_call_operand.vmem [shape: f32[32,32], index: 5, kind: input, shape index: {}]   ;;  %s11351_s6 = inlined_call_operand.vmem [shape: f32[32,1], index: 6, kind: input, shape index: {}]   ;;  %s11352_s7 = inlined_call_operand.vmem [shape: f32[32,32], index: 7, kind: input, shape index: {}]   ;;  %s11353_s8 = inlined_call_operand.vmem [shape: f32[32,1], index: 8, kind: input, shape index: {}]   ;;  %s11354_s9 = inlined_call_operand.vmem [shape: f32[1,32], index: 9, kind: input, shape index: {}]   ;;  %s11355_s10 = inlined_call_operand.<no memory space> [shape: f32[1,1], index: 10, kind: input, shape index: {}]   ;;  %s11356_s11 = inlined_call_operand.hbm [shape: f32[1,2048], index: 11, kind: output, shape index: {}]  }
   0x1   :  { %v16_v0 = vstv %s11355_s10 }
   0x2   :  { %17 = vst [vmem:[#allocation2] sm:$0x1] %v16_v0 }
   0x3   :  { %18 = vsyncpa [#allocation4], 0 }
   0x4   :  { %20 = vsyncpa [#allocation4 + $0x1], 0  ;;  %s7795_s19 = smov 0   ;;  %s7797_s20 = smov 0  }
   0x5   :  { %s7799_s21 = smov 0   ;;  %s7801_s22 = smov 0  }
   0x6 LB: > { %s7816_s10 = sadd.s32 4294967295, %s7718_s22   ;;  %s6987_s23 = sadd.s32 4294967294, %s7718_s22   ;;  %s7718_s22 = sphi %s7801_s22, %s11631_s22   ;;  %s7714_s21 = sphi %s7799_s21, %s11630_s21   ;;  %s7710_s20 = sphi %s7797_s20, %s11629_s20   ;;  %s7706_s19 = sphi %s7795_s19, %s11628_s19  }
   0x7   : > { %s7820_s24 = sadd.s32 1, %s7718_s22   ;;  %s269_s25 = sadd.s32 1, %s7714_s21 }
   0x8   : > { %s266_s26 = ssub.s32 %s7718_s22, %s7820_s24  ;;  %p279_p0 = scmp.ne.s32.totalorder %s7714_s21, %s7710_s20 }
   0x9   : > { %p267_p1 = scmp.eq.s32.totalorder %s266_s26, 0  ;;  %p280_p2 = scmp.eq.s32.totalorder %s7816_s10, 1 }
   0xa   : > { %p285_p3 = scmp.ne.s32.totalorder %s7710_s20, %s7706_s19  ;;  %p286_p4 = scmp.eq.s32.totalorder %s6987_s23, 1 }
   0xb   : > { %s7831_s27 = scalar_select %p267_p1, %s7714_s21, %s269_s25  }
   0xc   : > { %p7833_p5 = por %p280_p2, %p279_p0  ;;  %p7837_p6 = por %p286_p4, %p285_p3 }
   0xd   : > { %p6990_p7 = scmp.ge.s32.totalorder %s7718_s22, 1  ;;  %p343_p8 = scmp.lt.s32.totalorder %s7718_s22, 3 }
   0xf   : > { %p344_p9 = pnand %p6990_p7, %p343_p8 }
  0x11   : > { %347 = sbr.rel (%p344_p9) target bundleno = 1764 (0x6e4), region = 64 }
  0x18   : > { %v394_v1 = vld [vmem:[%s11346_s1] sm:$0xff]  ;;  %v410_v2 = vlaneseq  ;;  %s6992_s13 = sshll.u32 %s7816_s10, 3  ;;  %v7720_v3 = vmov 1   ;;  %v7721_v4 = vmov 0   ;;  %v395_v6 = vld [vmem:[%s11346_s1 + $0x8] sm:$0xff]  ;;  %v7722_v16 = vmov 2  }
  0x19   : > { %7535 = vset.pattern.permute.xlu1 %v7720_v3  ;;  %7534 = vset.pattern.permute.xlu0 %v7721_v4  ;;  %p384_p10 = scmp.lt.s32.totalorder %s6992_s13, 15  ;;  %s380_s30 = sand.u32 1, %s7710_s20  }
  0x1a   : > { %499 = vperm.xlu1 %7535, %v394_v1   ;;  %398 = vperm.xlu0 %7534, %v394_v1   ;;  %v7847_v5 = vshrl.u32 %v410_v2, 7  ;;  %s6991_s12 = sshll.u32 %s380_s30, 3 }
  0x1b   : > { %s11633_s13 = smov (!%p384_p10, %s6992_s13), 15  ;;  %s382_s14 = scalar_lea.vmem [#allocation3], %s6991_s12 }
  0x1c   : > { %11452 = vst [vmem:[#allocation6_spill] sm:$0xff] %v7847_v5  ;;  %v7853_v7 = vsub.s32 1, %v7847_v5  ;;  %v7856_v8 = vsub.s32 5, %v7847_v5  ;;  %s6993_s16 = sshll.u32 %s11633_s13, 2  ;;  %v7870_v13 = vsub.s32 4, %v7847_v5  ;;  %v7878_v18 = vsub.s32 6, %v7847_v5 }
  0x1d   : > { %s387_s23 = scalar_lea.vmem %s11345_s0, %s6993_s16  ;;  %v7896_v28 = vsub.s32 0, %v7847_v5  ;;  %v7903_v31 = vsub.s32 2, %v7847_v5  ;;  %s7227_s13 = sshll.u32 %s7816_s10, 7 }
  0x1e   : > { %503 = vperm.xlu1 %7535, %v395_v6   ;;  %403 = vperm.xlu0 %7534, %v395_v6   ;;  %v7861_v9 = vld [vmem:[%s387_s23 + $0x10] sm:$0x77]  ;;  %v7863_v10 = vld [vmem:[%s387_s23 + $0x18] sm:$0x77]  ;;  %v7891_v26 = vld [vmem:[%s387_s23] sm:$0x77]  ;;  %s11303_s18 = scalar_lea.hbm %s11356_s11, %s7227_s13 }
  0x1f   : > { %11453 = vst [vmem:[#allocation7_spill] sm:$0xff] %v7863_v10  ;;  %v525_v11 = vrot.slane %v7861_v9, %v7853_v7  ;;  %v529_v12 = vrot.slane %v7861_v9, %v7856_v8  ;;  %v533_v14 = vrot.slane %v7863_v10, %v7853_v7  ;;  %v537_v15 = vrot.slane %v7863_v10, %v7856_v8  ;;  %v7893_v27 = vld [vmem:[%s387_s23 + $0x8] sm:$0x77]  ;;  %s6928_s15 = sshll.u32 %s382_s14, 4  ;;  %s6914_s23 = scalar_lea.sflag [#allocation4], %s380_s30  ;;  %s11305_s15 = int_to_ptr.vmem [resolvable:$true] %s6928_s15 }
  0x20   : > { %v433_v22 = vrot.slane %v7861_v9, %v7870_v13  ;;  %v441_v23 = vrot.slane %v7863_v10, %v7870_v13  ;;  %11454 = vst [vmem:[#allocation8_spill] sm:$0xff] %v7896_v28  ;;  %v509_v29 = vrot.slane %v7891_v26, %v7853_v7  ;;  %v517_v30 = vrot.slane %v7893_v27, %v7853_v7  ;;  %s7656_s25 = scalar_lea.vmem %s11305_s15, 128  ;;  %s7731_s10 = smov [#allocation3]  }
  0x21   : > { %v565_v17 = vrot.slane %v525_v11, %v7853_v7  ;;  %v569_v19 = vrot.slane %v529_v12, %v7853_v7  ;;  %v573_v20 = vrot.slane %v533_v14, %v7853_v7  ;;  %v577_v21 = vrot.slane %v537_v15, %v7853_v7  ;;  %p7657_p11 = scmp.ne.s32.totalorder %s11305_s15, %s7656_s25  ;;  %s7660_s26 = sshll.u32 %s7731_s10, 4  ;;  %s7661_s26 = int_to_ptr.vmem [resolvable:$false] %s7660_s26 }
  0x22   : > { %7537 = vset.pattern.permute.xlu1 %v7722_v16  ;;  %7536 = vset.pattern.permute.xlu0 %v7722_v16  ;;  %v429_v32 = vrot.slane %v7861_v9, %v7896_v28  ;;  %v437_v33 = vrot.slane %v7863_v10, %v7896_v28  ;;  %v549_v34 = vrot.slane %v509_v29, %v7853_v7  ;;  %s7662_s12 = scalar_lea.vmem %s7661_s26, 256  ;;  %p7663_p0 = scmp.lt.s32.totalorder %s11305_s15, %s7661_s26 }
  0x23   : > { %615 = vperm.xlu1 %7537, %v395_v6   ;;  %611 = vperm.xlu0 %7536, %v394_v1   ;;  %v557_v35 = vrot.slane %v517_v30, %v7853_v7  ;;  %v637_v36 = vrot.slane %v7861_v9, %v7903_v31  ;;  %v473_v38 = vrot.slane %v433_v22, %v7896_v28  ;;  %p7658_p12 = pnand %p7657_p11, %p7833_p5  ;;  %p7664_p1 = scmp.lt.s32.totalorder %s7662_s12, %s7656_s25 }
  0x24   : > { %v469_v37 = vrot.slane %v429_v32, %v7896_v28  ;;  %v477_v39 = vrot.slane %v437_v33, %v7896_v28  ;;  %v481_v40 = vrot.slane %v441_v23, %v7896_v28  ;;  %v645_v43 = vrot.slane %v7863_v10, %v7903_v31 }
  0x25   : > { %v417_v44 = vrot.slane %v7891_v26, %v7870_v13  ;;  %v513_v45 = vrot.slane %v7891_v26, %v7856_v8  ;;  %v677_v52 = vrot.slane %v637_v36, %v7903_v31  ;;  %v625_v62 = vrot.slane %v7891_v26, %v7878_v18  ;;  %p7659_p13 = pneg %p7658_p12  ;;  %p7665_p2 = por %p7664_p1, %p7663_p0 }
  0x26   : > { %v685_v59 = vrot.slane %v645_v43, %v7903_v31  ;;  %v521_v36 = vrot.slane %v7893_v27, %v7856_v8  ;;  %v413_v8 = vrot.slane %v7891_v26, %v7896_v28 }
  0x27   : > { %7538 = vset.pattern.permute.xlu1 %v7721_v4  ;;  %7539 = vset.pattern.permute.xlu0 %v7721_v4  ;;  %v457_v60 = vrot.slane %v417_v44, %v7896_v28  ;;  %v553_v61 = vrot.slane %v513_v45, %v7853_v7  ;;  %v665_v23 = vrot.slane %v625_v62, %v7903_v31  ;;  %p7666_p3 = pnand %p7665_p2, %p7659_p13 }
  0x99   : > { %v7917_v41 = vpop.permute.xlu1 %499  ;;  %v7919_v42 = vpop.permute.xlu0 %398 }
  0x9a   : > { %v7928_v46 = vmul.f32 %v549_v34, %v7917_v41  ;;  %v7931_v47 = vmul.f32 %v557_v35, %v7917_v41  ;;  %v582_v48 = vmul.f32 %v565_v17, %v7917_v41  ;;  %v7935_v49 = vmul.f32 %v569_v19, %v7917_v41 }
  0x9b   : > { %v584_v50 = vmul.f32 %v573_v20, %v7917_v41  ;;  %v7939_v51 = vmul.f32 %v577_v21, %v7917_v41  ;;  %v486_v53 = vmul.f32 %v469_v37, %v7919_v42  ;;  %v7944_v54 = vmul.f32 %v473_v38, %v7919_v42 }
  0x9c   : > { %v488_v55 = vmul.f32 %v477_v39, %v7919_v42  ;;  %v7948_v56 = vmul.f32 %v481_v40, %v7919_v42 }
  0x9d   : > { %11455 = vst [vmem:[#allocation9_spill] sm:$0xff] %v7939_v51  ;;  %v7950_v57 = vpop.permute.xlu1 %503  ;;  %v7952_v58 = vpop.permute.xlu0 %403  ;;  %v598_v63 = vadd.f32 %v582_v48, %v486_v53 }
  0x9e   : > { %11456 = vst [vmem:[#allocation10_spill] sm:$0xff] %v7948_v56  ;;  %v600_v0 = vadd.f32 %v584_v50, %v488_v55  ;;  %v586_v1 = vmul.f32 %v549_v34, %v7950_v57  ;;  %v7961_v2 = vmul.f32 %v557_v35, %v7950_v57  ;;  %v590_v3 = vmul.f32 %v565_v17, %v7950_v57 }
  0x9f   : > { %v7965_v4 = vmul.f32 %v569_v19, %v7950_v57  ;;  %v592_v6 = vmul.f32 %v573_v20, %v7950_v57  ;;  %v7969_v11 = vmul.f32 %v577_v21, %v7950_v57  ;;  %v494_v12 = vmul.f32 %v469_v37, %v7952_v58 }
  0xa0   : > { %v7973_v14 = vmul.f32 %v473_v38, %v7952_v58  ;;  %v496_v15 = vmul.f32 %v477_v39, %v7952_v58  ;;  %v7977_v16 = vmul.f32 %v481_v40, %v7952_v58  ;;  %v483_v20 = vmul.f32 %v457_v60, %v7919_v42 }
  0xa1   : > { %11457 = vst [vmem:[#allocation11_spill] sm:$0xff] %v7969_v11  ;;  %v606_v22 = vadd.f32 %v590_v3, %v494_v12  ;;  %v579_v21 = vmul.f32 %v553_v61, %v7917_v41  ;;  %v425_v35 = vrot.slane %v7893_v27, %v7870_v13  ;;  %v491_v39 = vmul.f32 %v457_v60, %v7952_v58 }
  0xa2   : > { %11458 = vst [vmem:[#allocation12_spill] sm:$0xff] %v7977_v16  ;;  %v7979_v17 = vpop.permute.xlu1 %615  ;;  %v7981_v19 = vpop.permute.xlu0 %611  ;;  %v608_v29 = vadd.f32 %v592_v6, %v496_v15  ;;  %v587_v40 = vmul.f32 %v553_v61, %v7950_v57 }
  0xa3   : > { %11459 = vst [vmem:[#allocation13_spill] sm:$0xff] %v7979_v17  ;;  %v702_v30 = vmul.f32 %v677_v52, %v7979_v17  ;;  %v704_v32 = vmul.f32 %v685_v59, %v7979_v17  ;;  %v694_v33 = vmul.f32 %v677_v52, %v7981_v19  ;;  %v696_v34 = vmul.f32 %v685_v59, %v7981_v19 }
  0xa4   : > { %v595_v45 = vadd.f32 %v579_v21, %v483_v20  ;;  %v691_v48 = vmul.f32 %v665_v23, %v7981_v19  ;;  %v699_v13 = vmul.f32 %v665_v23, %v7979_v17  ;;  %v633_v52 = vrot.slane %v7893_v27, %v7878_v18 }
  0xa5   : > { %v7994_v37 = vadd.f32 %v702_v30, %v606_v22  ;;  %v7996_v38 = vadd.f32 %v704_v32, %v608_v29  ;;  %v8000_v43 = vadd.f32 %v694_v33, %v598_v63  ;;  %v8002_v44 = vadd.f32 %v696_v34, %v600_v0 }
  0xa6   : > { %v8008_v50 = vadd.f32 %v691_v48, %v595_v45  ;;  %v603_v53 = vadd.f32 %v587_v40, %v491_v39  ;;  %v8013_v55 = vrot.slane %v425_v35, %v7896_v28  ;;  %v8016_v59 = vrot.slane %v521_v36, %v7853_v7 }
  0xa7   : > { %11460 = vst [vmem:[#allocation14_spill] sm:$0xff] %v7994_v37  ;;  %11461 = vst [vmem:[#allocation15_spill] sm:$0xff] %v7996_v38  ;;  %v453_v63 = vrot.slane %v413_v8, %v7896_v28  ;;  %v8024_v0 = vrot.slane %v633_v52, %v7903_v31 }
  0xa8   : > { %11462 = vst [vmem:[#allocation16_spill] sm:$0xff] %v8000_v43  ;;  %11463 = vst [vmem:[#allocation17_spill] sm:$0xff] %v8002_v44  ;;  %v8018_v60 = vadd.f32 %v699_v13, %v603_v53  ;;  %v11358_v61 = vand.u32 2147483647, %v8008_v50  ;;  %v829_v62 = vand.u32 2139095040, %v8008_v50  ;;  %v485_v6 = vmul.f32 %v8013_v55, %v7919_v42 }
  0xa9   : > { %v581_v12 = vmul.f32 %v8016_v59, %v7917_v41  ;;  %v482_v20 = vmul.f32 %v453_v63, %v7919_v42  ;;  %v490_v21 = vmul.f32 %v453_v63, %v7952_v58  ;;  %v693_v23 = vmul.f32 %v8024_v0, %v7981_v19 }
  0xaa   : > { %v830_v3 = vshrl.u32 %v829_v62, 23  ;;  %v833_v15 = vand.u32 8388607, %v11358_v61  ;;  %v11357_v22 = vand.u32 2147483647, %v8018_v60  ;;  %v1661_v33 = vand.u32 2139095040, %v8018_v60 }
  0xab   : > { %v597_v30 = vadd.f32 %v581_v12, %v485_v6  ;;  %v8045_v35 = vadd.f32 %v7928_v46, %v482_v20  ;;  %v8047_v36 = vadd.f32 %v586_v1, %v490_v21  ;;  %v11365_v53 = vmov 683565275  }
  0xac   : > { %v6998_v7 = vadd.s32 4294967169, %v830_v3  ;;  %v834_v32 = vor.u32 8388608, %v833_v15  ;;  %v8040_v41 = vand.u32 8388607, %v11357_v22  ;;  %v1662_v40 = vshrl.u32 %v1661_v33, 23 }
  0xad   : > { %v8042_v34 = vadd.f32 %v693_v23, %v597_v30  ;;  %v11363_v6 = vmov 2475754826   ;;  %v11359_v1 = vmov 2131351028   ;;  %v11367_v20 = vmov 920167782  }
  0xae   : > { %v836_v29 = vadd.s32 1, %v6998_v7  ;;  %v8049_v13 = vshll.u32 %v834_v32, 8  ;;  %v1666_v8 = vor.u32 8388608, %v8040_v41  ;;  %v7030_v63 = vadd.s32 4294967169, %v1662_v40 }
  0xaf   : > { %v1037_v3 = vand.u32 2139095040, %v8042_v34  ;;  %v11361_v7 = vmov 2102212464   ;;  %v11378_v41 = vmov 1326507024   ;;  %vm828_vm13 = vcmp.lt.s32.totalorder %v8008_v50, 0 }
  0xb0   : > { %vm837_vm0 = vcmp.gt.s32.totalorder %v836_v29, 0  ;;  %v1668_v22 = vadd.s32 1, %v7030_v63 }
  0xb1   : > { %v838_v39 = vsel %vm837_vm0, %v836_v29, 0  ;;  %vm1660_vm0 = vcmp.lt.s32.totalorder %v8018_v60, 0 }
  0xb2   : > { %v839_v45 = vshrl.u32 %v838_v39, 5  ;;  %v840_v48 = vand.u32 31, %v838_v39  ;;  %vm1669_vm5 = vcmp.gt.s32.totalorder %v1668_v22, 0 }
  0xb4   : > { %v841_v52 = vsub.s32 32, %v840_v48  ;;  %v843_v62 = vshll.u32 %v11365_v53, %v840_v48  ;;  %v846_v46 = vshll.u32 %v11363_v6, %v840_v48  ;;  %v849_v12 = vshll.u32 %v11359_v1, %v840_v48 }
  0xb5   : > { %v852_v15 = vshll.u32 %v11361_v7, %v840_v48  ;;  %v855_v21 = vshll.u32 %v11367_v20, %v840_v48  ;;  %vm858_vm1 = vcmp.lt.s32.totalorder %v839_v45, 1  ;;  %vm859_vm2 = vcmp.lt.s32.totalorder %v839_v45, 2 }
  0xb6   : > { %v844_v23 = vshrl.u32 %v11363_v6, %v841_v52  ;;  %v847_v29 = vshrl.u32 %v11359_v1, %v841_v52  ;;  %v850_v30 = vshrl.u32 %v11361_v7, %v841_v52  ;;  %v842_v32 = vshrl.u32 %v11365_v53, %v841_v52 }
  0xb7   : > { %v853_v33 = vshrl.u32 %v11367_v20, %v841_v52  ;;  %v856_v39 = vshrl.u32 %v11378_v41, %v841_v52  ;;  %vm860_vm3 = vcmp.lt.s32.totalorder %v839_v45, 3  ;;  %vm861_vm4 = vcmp.lt.s32.totalorder %v839_v45, 4 }
  0xb8   : > { %v845_v40 = vor.u32 %v844_v23, %v843_v62  ;;  %v848_v25 = vor.u32 %v847_v29, %v846_v46  ;;  %v851_v24 = vor.u32 %v850_v30, %v849_v12  ;;  %v1670_v46 = vsel %vm1669_vm5, %v1668_v22, 0 }
  0xb9   : > { %v854_v48 = vor.u32 %v853_v33, %v852_v15  ;;  %v857_v61 = vor.u32 %v856_v39, %v855_v21  ;;  %v1038_v12 = vshrl.u32 %v1037_v3, 23  ;;  %v8070_v23 = vshrl.u32 %v1670_v46, 5 }
  0xba   : > { %v862_v1 = vsel %vm858_vm1, %v842_v32, %v845_v40  ;;  %v863_v7 = vsel %vm861_vm4, %v851_v24, 2102212464  ;;  %v866_v6 = vsel %vm858_vm1, %v845_v40, %v848_v25  ;;  %v870_v53 = vsel %vm858_vm1, %v848_v25, %v851_v24 }
  0xbb   : > { %v864_v20 = vsel %vm860_vm3, %v848_v25, %v863_v7  ;;  %v867_v5 = vsel %vm861_vm4, %v854_v48, 920167782  ;;  %v871_v44 = vsel %vm861_vm4, %v857_v61, 1326507024  ;;  %v8086_v45 = vshll.u32 %v1666_v8, 8 }
  0xbc   : > { %v868_v52 = vsel %vm860_vm3, %v851_v24, %v867_v5  ;;  %v872_v62 = vsel %vm860_vm3, %v854_v48, %v871_v44  ;;  %v865_v63 = vsel %vm859_vm2, %v862_v1, %v864_v20  ;;  %v421_v5 = vrot.slane %v7893_v27, %v7896_v28 }
  0xbd   : > { %v869_v15 = vsel %vm859_vm2, %v866_v6, %v868_v52  ;;  %v873_v21 = vsel %vm859_vm2, %v870_v53, %v872_v62  ;;  %v1672_v24 = vand.u32 31, %v1670_v46  ;;  %v493_v44 = vmul.f32 %v8013_v55, %v7952_v58 }
  0xbe   : > { %v8073_v29 = vmul.u32.u64.low %v8049_v13, %v873_v21  ;;  %v8074_v30 = vmul.u32.u64.high %v8049_v13, %v873_v21, %v8073_v29  ;;  %v8077_v25 = vmul.u32.u64.low %v8049_v13, %v869_v15  ;;  %v8078_v61 = vmul.u32.u64.high %v8049_v13, %v869_v15, %v8077_v25 }
  0xbf   : > { %v881_v22 = vmul.u32 %v8049_v13, %v865_v63  ;;  %v589_v53 = vmul.f32 %v8016_v59, %v7950_v57  ;;  %v1673_v6 = vsub.s32 32, %v1672_v24  ;;  %v11464_v1 = vmov 683565275  }
  0xc0   : > { %v1675_v7 = vshll.u32 %v11464_v1, %v1672_v24  ;;  %vm1690_vm6 = vcmp.lt.s32.totalorder %v8070_v23, 1  ;;  %v7006_v20 = vadd.s32 4294967169, %v1038_v12  ;;  %vm883_vm7 = vc.u32 %v8074_v30, %v8077_v25 }
  0xc1   : > { %v884_v55 = vadd.s32 1, %v8078_v61  ;;  %v11465_v32 = vmov 2475754826   ;;  %v11466_v8 = vmov 2131351028   ;;  %v1688_v63 = vshrl.u32 %v11378_v41, %v1673_v6 }
  0xc2   : > { %v1678_v13 = vshll.u32 %v11465_v32, %v1672_v24  ;;  %v1681_v33 = vshll.u32 %v11466_v8, %v1672_v24  ;;  %v1676_v39 = vshrl.u32 %v11465_v32, %v1673_v6  ;;  %v1679_v57 = vshrl.u32 %v11466_v8, %v1673_v6 }
  0xc3   : > { %v11467_v59 = vmov 2102212464   ;;  %v885_v52 = vsel %vm883_vm7, %v884_v55, %v8078_v61  ;;  %v11468_v62 = vmov 920167782   ;;  %vm1691_vm8 = vcmp.lt.s32.totalorder %v8070_v23, 2 }
  0xc4   : > { %v1682_v40 = vshrl.u32 %v11467_v59, %v1673_v6  ;;  %v1684_v48 = vshll.u32 %v11467_v59, %v1672_v24  ;;  %v1685_v46 = vshrl.u32 %v11468_v62, %v1673_v6  ;;  %v1687_v12 = vshll.u32 %v11468_v62, %v1672_v24 }
  0xc5   : > { %v886_v15 = vadd.s32 %v885_v52, %v881_v22  ;;  %v1677_v21 = vor.u32 %v1676_v39, %v1675_v7  ;;  %v1680_v29 = vor.u32 %v1679_v57, %v1678_v13  ;;  %v1044_v16 = vadd.s32 1, %v7006_v20 }
  0xc6   : > { %v1683_v3 = vor.u32 %v1682_v40, %v1681_v33  ;;  %v1686_v38 = vor.u32 %v1685_v46, %v1684_v48  ;;  %v1689_v11 = vor.u32 %v1688_v63, %v1687_v12  ;;  %vm1692_vm9 = vcmp.lt.s32.totalorder %v8070_v23, 3 }
  0xc7   : > { %v887_v51 = vadd.s32 536870912, %v886_v15  ;;  %vm1693_vm10 = vcmp.lt.s32.totalorder %v8070_v23, 4  ;;  %v1698_v61 = vsel %vm1690_vm6, %v1677_v21, %v1680_v29  ;;  %v1674_v24 = vshrl.u32 %v11464_v1, %v1673_v6 }
  0xc8   : > { %v1699_v55 = vsel %vm1693_vm10, %v1686_v38, 920167782  ;;  %v1702_v22 = vsel %vm1690_vm6, %v1680_v29, %v1683_v3  ;;  %v1703_v7 = vsel %vm1693_vm10, %v1689_v11, 1326507024  ;;  %v1695_v33 = vsel %vm1693_vm10, %v1683_v3, 2102212464 }
  0xc9   : > { %v888_v13 = vshrl.u32 %v887_v51, 30  ;;  %v1700_v20 = vsel %vm1692_vm9, %v1683_v3, %v1699_v55  ;;  %v1704_v39 = vsel %vm1692_vm9, %v1686_v38, %v1703_v7  ;;  %v11469_v6 = vand.u32 2147483647, %v8042_v34 }
  0xca   : > { %v1701_v57 = vsel %vm1691_vm8, %v1698_v61, %v1700_v20  ;;  %v1705_v40 = vsel %vm1691_vm8, %v1702_v22, %v1704_v39  ;;  %vm1045_vm11 = vcmp.gt.s32.totalorder %v1044_v16, 0  ;;  %v1694_v51 = vsel %vm1690_vm6, %v1674_v24, %v1677_v21 }
  0xcb   : > { %v1041_v48 = vand.u32 8388607, %v11469_v6  ;;  %v889_v52 = vshll.u32 %v888_v13, 30  ;;  %v8127_v11 = vmul.u32.u64.low %v8086_v45, %v1705_v40  ;;  %v8128_v3 = vmul.u32.u64.high %v8086_v45, %v1705_v40, %v8127_v11 }
  0xcc   : > { %v1696_v38 = vsel %vm1692_vm9, %v1680_v29, %v1695_v33  ;;  %v8133_v46 = vmul.u32.u64.low %v8086_v45, %v1701_v57  ;;  %v8134_v12 = vmul.u32.u64.high %v8086_v45, %v1701_v57, %v8133_v46  ;;  %v1046_v63 = vsel %vm1045_vm11, %v1044_v16, 0 }
  0xcd   : > { %v890_v61 = vsub.s32 %v886_v15, %v889_v52  ;;  %v701_v55 = vmul.f32 %v8024_v0, %v7979_v17  ;;  %v1048_v22 = vand.u32 31, %v1046_v63  ;;  %v8140_v21 = vrot.slane %v421_v5, %v7896_v28 }
  0xce   : > { %v1697_v7 = vsel %vm1691_vm8, %v1694_v51, %v1696_v38  ;;  %vm1715_vm12 = vc.u32 %v8128_v3, %v8133_v46  ;;  %v605_v29 = vadd.f32 %v589_v53, %v493_v44  ;;  %v1716_v33 = vadd.s32 1, %v8134_v12 }
  0xcf   : > { %v892_v24 = vsub.s32 0, %v890_v61  ;;  %v1042_v20 = vor.u32 8388608, %v1041_v48  ;;  %v912_v15 = vsub.s32 4, %v888_v13  ;;  %v1049_v0 = vsub.s32 32, %v1048_v22 }
  0xd0   : > { %v8147_v39 = vadd.f32 %v701_v55, %v605_v29  ;;  %v1713_v57 = vmul.u32 %v8086_v45, %v1697_v7  ;;  %v1717_v5 = vsel %vm1715_vm12, %v1716_v33, %v8134_v12  ;;  %v8153_v23 = vmul.f32 %v8140_v21, %v7919_v42 }
  0xd1   : > { %v6999_v16 = vmin.u32 %v892_v24, %v890_v61  ;;  %v11470_v53 = vand.u32 2147483647, %v8008_v50  ;;  %v882_v45 = vadd.s32 %v8077_v25, %v8074_v30  ;;  %v8166_v52 = vshll.u32 %v1042_v20, 8 }
  0xd2   : > { %v1718_v48 = vadd.s32 %v1717_v5, %v1713_v57  ;;  %v913_v51 = vsel %vm828_vm13, %v912_v15, %v888_v13  ;;  %v1052_v11 = vshrl.u32 %v11465_v32, %v1049_v0  ;;  %v8172_v55 = vshrl.u32 %v1046_v63, 5 }
  0xd3   : > { %v894_v40 = vclz %v6999_v16  ;;  %vm8160_vm14 = vcmp.le.f32.partialorder %v11470_v53, 0.7853982  ;;  %v1055_v24 = vshrl.u32 %v11466_v8, %v1049_v0  ;;  %v1061_v7 = vshrl.u32 %v11468_v62, %v1049_v0 }
  0xd4   : > { %v1719_v12 = vadd.s32 536870912, %v1718_v48  ;;  %v1051_v30 = vshll.u32 %v11464_v1, %v1048_v22  ;;  %v1054_v25 = vshll.u32 %v11465_v32, %v1048_v22  ;;  %v1058_v29 = vshrl.u32 %v11467_v59, %v1049_v0 }
  0xd5   : > { %v7000_v42 = vadd.s32 4294967294, %v894_v40  ;;  %v1057_v20 = vshll.u32 %v11466_v8, %v1048_v22  ;;  %v1060_v16 = vshll.u32 %v11467_v59, %v1048_v22  ;;  %v1064_v5 = vshrl.u32 %v11378_v41, %v1049_v0 }
  0xd6   : > { %v1720_v13 = vshrl.u32 %v1719_v12, 30  ;;  %v1053_v57 = vor.u32 %v1052_v11, %v1051_v30  ;;  %v1056_v53 = vor.u32 %v1055_v24, %v1054_v25  ;;  %v1063_v38 = vshll.u32 %v11468_v62, %v1048_v22 }
  0xd7   : > { %vm7001_vm15 = vcmp.lt.s32.totalorder %v7000_v42, 0  ;;  %v1062_v44 = vor.u32 %v1061_v7, %v1060_v16  ;;  %v8186_v12 = vsel %vm8160_vm14, 0, %v913_v51  ;;  %vm1066_vm1 = vcmp.lt.s32.totalorder %v8172_v55, 1 }
  0xd8   : > { %v897_v33 = vsel %vm7001_vm15, 0, %v7000_v42  ;;  %v1721_v40 = vshll.u32 %v1720_v13, 30  ;;  %v1059_v42 = vor.u32 %v1058_v29, %v1057_v20  ;;  %v1869_v11 = vand.u32 2139095040, %v8147_v39 }
  0xd9   : > { %v898_v15 = vsub.s32 32, %v897_v33  ;;  %v902_v63 = vsub.s32 4294967266, %v897_v33  ;;  %v899_v28 = vshll.u32 %v890_v61, %v897_v33  ;;  %v1065_v30 = vor.u32 %v1064_v5, %v1063_v38 }
  0xda   : > { %v8188_v37 = vsub.s32 %v1718_v48, %v1721_v40  ;;  %vm1069_vm2 = vcmp.lt.s32.totalorder %v8172_v55, 4  ;;  %v11473_v61 = vand.u32 2147483647, %v8018_v60  ;;  %vm1068_vm4 = vcmp.lt.s32.totalorder %v8172_v55, 3 }
  0xdb   : > { %v900_v56 = vshrl.u32 %v882_v45, %v898_v15  ;;  %v903_v43 = vadd.s32 127, %v902_v63  ;;  %v1074_v48 = vsel %vm1066_vm1, %v1053_v57, %v1056_v53  ;;  %v1071_v51 = vsel %vm1069_vm2, %v1059_v42, 2102212464 }
  0xdc   : > { %vm8195_vm3 = vcmp.le.f32.partialorder %v11473_v61, 0.7853982  ;;  %v1724_v45 = vsub.s32 0, %v8188_v37  ;;  %v1744_v33 = vsub.s32 4, %v1720_v13  ;;  %vm1067_vm5 = vcmp.lt.s32.totalorder %v8172_v55, 2 }
  0xdd   : > { %v901_v24 = vor.u32 %v900_v56, %v899_v28  ;;  %v904_v7 = vshll.u32 %v903_v43, 23  ;;  %v1075_v28 = vsel %vm1069_vm2, %v1062_v44, 920167782  ;;  %v1050_v43 = vshrl.u32 %v11464_v1, %v1049_v0 }
  0xde   : > { %v1076_v38 = vsel %vm1068_vm4, %v1059_v42, %v1075_v28  ;;  %v7031_v29 = vmin.u32 %v1724_v45, %v8188_v37  ;;  %v1078_v15 = vsel %vm1066_vm1, %v1056_v53, %v1059_v42  ;;  %v1079_v0 = vsel %vm1069_vm2, %v1065_v30, 1326507024 }
  0xdf   : > { %v905_v56 = vor.u32 4788187, %v904_v7  ;;  %v908_v25 = vcvt.s32.f32 %v901_v24  ;;  %v1077_v16 = vsel %vm1067_vm5, %v1074_v48, %v1076_v38  ;;  %v1070_v5 = vsel %vm1066_vm1, %v1050_v43, %v1053_v57 }
  0xe0   : > { %v1726_v63 = vclz %v7031_v29  ;;  %v1072_v40 = vsel %vm1068_vm4, %v1056_v53, %v1071_v51  ;;  %v11476_v24 = vand.u32 2147483647, %v8147_v39  ;;  %v1080_v45 = vsel %vm1068_vm4, %v1062_v44, %v1079_v0 }
  0xe1   : > { %v906_v20 = vand.u32 2147483647, %v905_v56  ;;  %v8227_v48 = vmul.u32.u64.low %v8166_v52, %v1077_v16  ;;  %v8228_v42 = vmul.u32.u64.high %v8166_v52, %v1077_v16, %v8227_v48  ;;  %v1745_v28 = vsel %vm1660_vm0, %v1744_v33, %v1720_v13 }
  0xe2   : > { %v1873_v7 = vand.u32 8388607, %v11476_v24  ;;  %v7032_v30 = vadd.s32 4294967294, %v1726_v63  ;;  %v1081_v57 = vsel %vm1067_vm5, %v1078_v15, %v1080_v45  ;;  %v1870_v53 = vshrl.u32 %v1869_v11, 23 }
  0xe3   : > { %v909_v61 = vmul.f32 %v908_v25, %v906_v20  ;;  %v1073_v43 = vsel %vm1067_vm5, %v1070_v5, %v1072_v40  ;;  %v8238_v51 = vmul.u32.u64.low %v8166_v52, %v1081_v57  ;;  %v8239_v44 = vmul.u32.u64.high %v8166_v52, %v1081_v57, %v8238_v51 }
  0xe4   : > { %v919_v38 = vadd.s32 3, %v8186_v12  ;;  %v1714_v25 = vadd.s32 %v8133_v46, %v8128_v3  ;;  %vm7033_vm6 = vcmp.lt.s32.totalorder %v7032_v30, 0  ;;  %v7038_v29 = vadd.s32 4294967169, %v1870_v53 }
  0xe5   : > { %v910_v56 = vxor.u32 2147483648, %v909_v61  ;;  %v1729_v33 = vsel %vm7033_vm6, 0, %v7032_v30  ;;  %v1747_v11 = vsel %vm8195_vm3, 0, %v1745_v28  ;;  %v1092_v55 = vadd.s32 1, %v8228_v42 }
  0xe6   : > { %v1730_v16 = vsub.s32 32, %v1729_v33  ;;  %v1734_v15 = vsub.s32 4294967266, %v1729_v33  ;;  %v1089_v0 = vmul.u32 %v8166_v52, %v1073_v43  ;;  %v1731_v3 = vshll.u32 %v8188_v37, %v1729_v33 }
  0xe7   : > { %v911_v13 = vsel %vm828_vm13, %v910_v56, %v909_v61  ;;  %vm1091_vm7 = vc.u32 %v8239_v44, %v8227_v48  ;;  %v1876_v46 = vadd.s32 1, %v7038_v29  ;;  %v920_v24 = vand.u32 3, %v919_v38 }
  0xe8   : > { %v914_v20 = vsel %vm8160_vm14, %v8008_v50, %v911_v13  ;;  %v1732_v63 = vshrl.u32 %v1714_v25, %v1730_v16  ;;  %v1735_v5 = vadd.s32 127, %v1734_v15  ;;  %v1093_v40 = vsel %vm1091_vm7, %v1092_v55, %v8228_v42 }
  0xe9   : > { %7540 = vcosq.f32 %v914_v20  ;;  %v1094_v61 = vadd.s32 %v1093_v40, %v1089_v0  ;;  %vm1877_vm8 = vcmp.gt.s32.totalorder %v1876_v46, 0  ;;  %v11477_v6 = vrot.slane %v7891_v26, %v7903_v31 }
  0xea   : > { %7542 = vsinq.f32 %v914_v20  ;;  %v1733_v45 = vor.u32 %v1732_v63, %v1731_v3  ;;  %v1736_v30 = vshll.u32 %v1735_v5, 23  ;;  %v1878_v37 = vsel %vm1877_vm8, %v1876_v46, 0 }
  0xeb   : > { %v661_v52 = vrot.slane %v11477_v6, %v7903_v31  ;;  %v8263_v28 = vadd.f32 %v7931_v47, %v8153_v23  ;;  %v1751_v57 = vadd.s32 3, %v1747_v11  ;;  %v1095_v53 = vadd.s32 536870912, %v1094_v61 }
  0xec   : > { %v1874_v56 = vor.u32 8388608, %v1873_v7  ;;  %v1880_v43 = vand.u32 31, %v1878_v37  ;;  %v8267_v42 = vmul.f32 %v8140_v21, %v7952_v58  ;;  %v1737_v51 = vor.u32 4788187, %v1736_v30 }
  0xed   : > { %11478 = vst [vmem:[#allocation18_spill] sm:$0xff] %v8263_v28  ;;  %v8270_v38 = vand.u32 3, %v8186_v12  ;;  %vm921_vm9 = vcmp.lt.s32.totalorder %v920_v24, 2  ;;  %vm922_vm10 = vcmp.eq.s32.totalorder %v920_v24, 0  ;;  %v8272_v26 = vshrl.u32 %v1095_v53, 30 }
  0xee   : > { %v1881_v25 = vsub.s32 32, %v1880_v43  ;;  %vm918_vm11 = vweird.f32 %v8008_v50  ;;  %vm925_vm12 = vcmp.eq.s32.totalorder %v920_v24, 2  ;;  %v1738_v47 = vand.u32 2147483647, %v1737_v51 }
  0xef   : > { %v1740_v23 = vcvt.s32.f32 %v1733_v45  ;;  %v8275_v7 = vand.u32 3, %v1747_v11  ;;  %v8277_v29 = vand.u32 3, %v1751_v57  ;;  %v1097_v58 = vshll.u32 %v8272_v26, 30 }
  0xf0   : > { %v8280_v21 = vshll.u32 %v1874_v56, 8  ;;  %v690_v12 = vmul.f32 %v661_v52, %v7981_v19  ;;  %vm2587_vm13 = vcmp.eq.s32.totalorder %v8270_v38, 2  ;;  %v8284_v33 = vshrl.u32 %v1878_v37, 5 }
  0xf1   : > { %v1741_v13 = vmul.f32 %v1740_v23, %v1738_v47  ;;  %v1883_v55 = vshll.u32 %v11464_v1, %v1880_v43  ;;  %v698_v20 = vmul.f32 %v661_v52, %v7979_v17  ;;  %vm2584_vm14 = vcmp.eq.s32.totalorder %v8270_v38, 0 }
  0xf2   : > { %v8289_v11 = vsub.s32 %v1094_v61, %v1097_v58  ;;  %v1884_v15 = vshrl.u32 %v11465_v32, %v1881_v25  ;;  %v1886_v0 = vshll.u32 %v11465_v32, %v1880_v43  ;;  %v1889_v3 = vshll.u32 %v11466_v8, %v1880_v43 }
  0xf3   : > { %v7541_v16 = vpop.eup %7540  ;;  %v1742_v5 = vxor.u32 2147483648, %v1741_v13  ;;  %v1887_v40 = vshrl.u32 %v11466_v8, %v1881_v25  ;;  %v1890_v6 = vshrl.u32 %v11467_v59, %v1881_v25  ;;  %v1892_v30 = vshll.u32 %v11467_v59, %v1880_v43 }
  0xf4   : > { %v7543_v46 = vpop.eup %7542  ;;  %v926_v63 = vxor.u32 2147483648, %v7541_v16  ;;  %v1100_v52 = vsub.s32 0, %v8289_v11  ;;  %v1893_v61 = vshrl.u32 %v11468_v62, %v1881_v25  ;;  %vm2583_vm15 = vcmp.lt.s32.totalorder %v8270_v38, 2 }
  0xf5   : > { %v923_v45 = vxor.u32 2147483648, %v7543_v46  ;;  %v1743_v57 = vsel %vm1660_vm0, %v1742_v5, %v1741_v13  ;;  %v1895_v53 = vshll.u32 %v11468_v62, %v1880_v43  ;;  %v1896_v56 = vshrl.u32 %v11378_v41, %v1881_v25 }
  0xf6   : > { %v927_v37 = vsel %vm925_vm12, %v926_v63, %v7543_v46  ;;  %v1746_v47 = vsel %vm8195_vm3, %v8018_v60, %v1743_v57  ;;  %v7007_v23 = vmin.u32 %v1100_v52, %v8289_v11  ;;  %v1885_v58 = vor.u32 %v1884_v15, %v1883_v55 }
  0xf7   : > { %v924_v51 = vsel %vm922_vm10, %v7541_v16, %v923_v45  ;;  %7544 = vcosq.f32 %v1746_v47  ;;  %v1888_v17 = vor.u32 %v1887_v40, %v1886_v0  ;;  %v1891_v13 = vor.u32 %v1890_v6, %v1889_v3 }
  0xf8   : > { %v928_v10 = vsel %vm921_vm9, %v924_v51, %v927_v37  ;;  %7546 = vsinq.f32 %v1746_v47  ;;  %v1102_v43 = vclz %v7007_v23  ;;  %v1894_v41 = vor.u32 %v1893_v61, %v1892_v30 }
  0xf9   : > { %v8313_v5 = vsel %vm918_vm11, nan, %v928_v10  ;;  %v1090_v28 = vadd.s32 %v8227_v48, %v8239_v44  ;;  %v1897_v22 = vor.u32 %v1896_v56, %v1895_v53  ;;  %v8318_v57 = vadd.f32 %v690_v12, %v8045_v35 }
  0xfa   : > { %v8321_v24 = vadd.f32 %v698_v20, %v8047_v36  ;;  %v2589_v55 = vsel %vm2587_vm13, %v926_v63, %v7543_v46  ;;  %vm1036_vm0 = vcmp.lt.s32.totalorder %v8042_v34, 0  ;;  %v7008_v10 = vadd.s32 4294967294, %v1102_v43 }
  0xfb   : > { %v1120_v15 = vsub.s32 4, %v8272_v26  ;;  %v1882_v0 = vshrl.u32 %v11464_v1, %v1881_v25  ;;  %vm1757_vm1 = vcmp.eq.s32.totalorder %v8277_v29, 2  ;;  %v2586_v48 = vsel %vm2584_vm14, %v7541_v16, %v923_v45 }
  0xfc   : > { %vm3411_vm2 = vcmp.eq.s32.totalorder %v8275_v7, 2  ;;  %vm1898_vm3 = vcmp.lt.s32.totalorder %v8284_v33, 1  ;;  %vm1900_vm4 = vcmp.lt.s32.totalorder %v8284_v33, 3  ;;  %vm1901_vm5 = vcmp.lt.s32.totalorder %v8284_v33, 4 }
  0xfd   : > { %vm1754_vm6 = vcmp.eq.s32.totalorder %v8277_v29, 0  ;;  %vm3408_vm7 = vcmp.eq.s32.totalorder %v8275_v7, 0  ;;  %vm7009_vm8 = vcmp.lt.s32.totalorder %v7008_v10, 0  ;;  %v1903_v35 = vsel %vm1901_vm5, %v1891_v13, 2102212464 }
  0xfe   : > { %v1906_v36 = vsel %vm1898_vm3, %v1885_v58, %v1888_v17  ;;  %v1907_v44 = vsel %vm1901_vm5, %v1894_v41, 920167782  ;;  %vm1753_vm9 = vcmp.lt.s32.totalorder %v8277_v29, 2  ;;  %vm3407_vm10 = vcmp.lt.s32.totalorder %v8275_v7, 2 }
  0xff   : > { %v1105_v25 = vsel %vm7009_vm8, 0, %v7008_v10  ;;  %v1908_v12 = vsel %vm1900_vm4, %v1891_v13, %v1907_v44  ;;  %v1910_v20 = vsel %vm1898_vm3, %v1888_v17, %v1891_v13  ;;  %v1911_v16 = vsel %vm1901_vm5, %v1897_v22, 1326507024 }
 0x100   : > { %vm1750_vm12 = vweird.f32 %v8018_v60  ;;  %v2590_v3 = vsel %vm2583_vm15, %v2586_v48, %v2589_v55  ;;  %v1106_v46 = vsub.s32 32, %v1105_v25  ;;  %v1110_v63 = vsub.s32 4294967266, %v1105_v25 }
 0x101   : > { %vm1899_vm13 = vcmp.lt.s32.totalorder %v8284_v33, 2  ;;  %v11479_v40 = vand.u32 2147483647, %v8042_v34  ;;  %v1902_v45 = vsel %vm1898_vm3, %v1882_v0, %v1885_v58  ;;  %v1904_v52 = vsel %vm1900_vm4, %v1888_v17, %v1903_v35  ;;  %v7545_v51 = vpop.eup %7544 }
 0x102   : > { %v1909_v38 = vsel %vm1899_vm13, %v1906_v36, %v1908_v12  ;;  %v1912_v30 = vsel %vm1900_vm4, %v1894_v41, %v1911_v16  ;;  %v1107_v61 = vshll.u32 %v8289_v11, %v1105_v25  ;;  %v1108_v37 = vshrl.u32 %v1090_v28, %v1106_v46  ;;  %v7547_v13 = vpop.eup %7546 }
 0x103   : > { %vm8351_vm14 = vcmp.le.f32.partialorder %v11479_v40, 0.7853982  ;;  %v1111_v53 = vadd.s32 127, %v1110_v63  ;;  %v1913_v56 = vsel %vm1899_vm13, %v1910_v20, %v1912_v30  ;;  %v1758_v43 = vxor.u32 2147483648, %v7545_v51 }
 0x104   : > { %v8367_v47 = vmul.u32.u64.low %v8280_v21, %v1913_v56  ;;  %v8368_v23 = vmul.u32.u64.high %v8280_v21, %v1913_v56, %v8367_v47  ;;  %v8371_v17 = vmul.u32.u64.low %v8280_v21, %v1909_v38  ;;  %v8372_v58 = vmul.u32.u64.high %v8280_v21, %v1909_v38, %v8371_v17 }
 0x105   : > { %v1109_v41 = vor.u32 %v1108_v37, %v1107_v61  ;;  %v1112_v22 = vshll.u32 %v1111_v53, 23  ;;  %v722_v28 = vand.u32 2147483647, %v8318_v57  ;;  %v1755_v11 = vxor.u32 2147483648, %v7547_v13 }
 0x106   : > { %v2591_v55 = vsel %vm918_vm11, nan, %v2590_v3  ;;  %v1121_v10 = vsel %vm1036_vm0, %v1120_v15, %v8272_v26  ;;  %v725_v0 = vand.u32 2139095040, %v8318_v57  ;;  %v1759_v48 = vsel %vm1757_vm1, %v1758_v43, %v7547_v13 }
 0x107   : > { %v3413_v35 = vsel %vm3411_vm2, %v1758_v43, %v7547_v13  ;;  %v1113_v36 = vor.u32 4788187, %v1112_v22  ;;  %v1905_v44 = vsel %vm1899_vm13, %v1902_v45, %v1904_v52  ;;  %v1756_v50 = vsel %vm1754_vm6, %v7545_v51, %v1755_v11 }
 0x108   : > { %v3410_v25 = vsel %vm3408_vm7, %v7545_v51, %v1755_v11  ;;  %v1116_v12 = vcvt.s32.f32 %v1109_v41  ;;  %vm1923_vm11 = vc.u32 %v8368_v23, %v8371_v17  ;;  %v1760_v26 = vsel %vm1753_vm9, %v1756_v50, %v1759_v48 }
 0x109   : > { %v3414_v15 = vsel %vm3407_vm10, %v3410_v25, %v3413_v35  ;;  %v1114_v20 = vand.u32 2147483647, %v1113_v36  ;;  %v1924_v33 = vadd.s32 1, %v8372_v58  ;;  %v8401_v16 = vsel %vm1750_vm12, nan, %v1760_v26 }
 0x10a   : > { %v3415_v3 = vsel %vm1750_vm12, nan, %v3414_v15  ;;  %v1921_v46 = vmul.u32 %v8280_v21, %v1905_v44  ;;  %v726_v63 = vshrl.u32 %v725_v0, 23  ;;  %v1123_v29 = vsel %vm8351_vm14, 0, %v1121_v10 }
 0x10b   : > { %v7228_v40 = vpack.c.bf16 %v3415_v3, %v2591_v55  ;;  %v1117_v45 = vmul.f32 %v1116_v12, %v1114_v20  ;;  %v1925_v7 = vsel %vm1923_vm11, %v1924_v33, %v8372_v58  ;;  %v1557_v61 = vand.u32 2139095040, %v8321_v24 }
 0x10c   : > { %v1926_v52 = vadd.s32 %v1925_v7, %v1921_v46  ;;  %v6994_v38 = vadd.s32 4294967169, %v726_v63  ;;  %v1127_v37 = vadd.s32 3, %v1123_v29  ;;  %v729_v56 = vand.u32 8388607, %v722_v28 }
 0x10d   : > { %7229 = vmatprep.subr.bf16.mxu0 %v7228_v40  ;;  %v1118_v30 = vxor.u32 2147483648, %v1117_v45  ;;  %v8416_v51 = vadd.f32 %v7961_v2, %v8267_v42  ;;  %v1554_v13 = vand.u32 2147483647, %v8321_v24  ;;  %v1558_v41 = vshrl.u32 %v1557_v61, 23 }
 0x10e   : > { %v1927_v53 = vadd.s32 536870912, %v1926_v52  ;;  %v732_v60 = vadd.s32 1, %v6994_v38  ;;  %v1128_v22 = vand.u32 3, %v1127_v37  ;;  %v730_v2 = vor.u32 8388608, %v729_v56 }
 0x10f   : > { %v1119_v21 = vsel %vm1036_vm0, %v1118_v30, %v1117_v45  ;;  %v8426_v42 = vand.u32 8388607, %v1554_v13  ;;  %v11482_v6 = vand.u32 2147483647, %v8147_v39  ;;  %v7026_v36 = vadd.s32 4294967169, %v1558_v41 }
 0x110   : > { %v1122_v47 = vsel %vm8351_vm14, %v8042_v34, %v1119_v21  ;;  %v1928_v58 = vshrl.u32 %v1927_v53, 30  ;;  %vm733_vm15 = vcmp.gt.s32.totalorder %v732_v60, 0  ;;  %v629_v44 = vrot.slane %v7893_v27, %v7903_v31 }
 0x111   : > { %7548 = vcosq.f32 %v1122_v47  ;;  %v734_v43 = vsel %vm733_vm15, %v732_v60, 0  ;;  %vm8430_vm0 = vcmp.le.f32.partialorder %v11482_v6, 0.7853982  ;;  %vm1130_vm1 = vcmp.eq.s32.totalorder %v1128_v22, 0 }
 0x112   : > { %7550 = vsinq.f32 %v1122_v47  ;;  %v1929_v11 = vshll.u32 %v1928_v58, 30  ;;  %v1952_v55 = vsub.s32 4, %v1928_v58  ;;  %v736_v10 = vand.u32 31, %v734_v43 }
 0x113   : > { %vm1868_vm2 = vcmp.lt.s32.totalorder %v8147_v39, 0  ;;  %v8438_v25 = vshrl.u32 %v734_v43, 5  ;;  %vm1129_vm3 = vcmp.lt.s32.totalorder %v1128_v22, 2  ;;  %vm1133_vm4 = vcmp.eq.s32.totalorder %v1128_v22, 2 }
 0x114   : > { %v8422_v0 = vsub.s32 %v1926_v52, %v1929_v11  ;;  %v737_v35 = vsub.s32 32, %v736_v10  ;;  %v1922_v12 = vadd.s32 %v8371_v17, %v8368_v23  ;;  %v1953_v26 = vsel %vm1868_vm2, %v1952_v55, %v1928_v58 }
 0x115   : > { %v8444_v15 = vand.u32 3, %v1123_v29  ;;  %vm1126_vm5 = vweird.f32 %v8042_v34  ;;  %v8449_v33 = vshll.u32 %v730_v2, 8  ;;  %v1562_v3 = vor.u32 8388608, %v8426_v42 }
 0x116   : > { %v1932_v50 = vsub.s32 0, %v8422_v0  ;;  %v746_v20 = vshrl.u32 %v11467_v59, %v737_v35  ;;  %v740_v46 = vshrl.u32 %v11465_v32, %v737_v35  ;;  %v743_v63 = vshrl.u32 %v11466_v8, %v737_v35 }
 0x117   : > { %v1564_v23 = vadd.s32 1, %v7026_v36  ;;  %v8455_v17 = vrot.slane %v629_v44, %v7903_v31  ;;  %v8459_v45 = vsel %vm8430_vm0, 0, %v1953_v26  ;;  %v745_v29 = vshll.u32 %v11466_v8, %v736_v10 }
 0x118   : > { %v7039_v27 = vmin.u32 %v1932_v50, %v8422_v0  ;;  %vm754_vm6 = vcmp.lt.s32.totalorder %v8438_v25, 1  ;;  %v739_v52 = vshll.u32 %v11464_v1, %v736_v10  ;;  %v742_v38 = vshll.u32 %v11465_v32, %v736_v10 }
 0x119   : > { %v749_v30 = vshrl.u32 %v11468_v62, %v737_v35  ;;  %v11485_v61 = vmov 1326507024   ;;  %vm755_vm7 = vcmp.lt.s32.totalorder %v8438_v25, 2  ;;  %v747_v56 = vor.u32 %v746_v20, %v745_v29 }
 0x11a   : > { %v1934_v40 = vclz %v7039_v27  ;;  %v752_v37 = vshrl.u32 %v11485_v61, %v737_v35  ;;  %v748_v47 = vshll.u32 %v11467_v59, %v736_v10  ;;  %v741_v43 = vor.u32 %v740_v46, %v739_v52 }
 0x11b   : > { %v8463_v7 = vpop.eup %7548  ;;  %v744_v41 = vor.u32 %v743_v63, %v742_v38  ;;  %v751_v11 = vshll.u32 %v11468_v62, %v736_v10  ;;  %v738_v2 = vshrl.u32 %v11464_v1, %v737_v35  ;;  %vm757_vm9 = vcmp.lt.s32.totalorder %v8438_v25, 4 }
 0x11c   : > { %v8470_v53 = vpop.eup %7550  ;;  %v1134_v60 = vxor.u32 2147483648, %v8463_v7  ;;  %v7040_v21 = vadd.s32 4294967294, %v1934_v40  ;;  %v750_v6 = vor.u32 %v749_v30, %v748_v47  ;;  %v759_v20 = vsel %vm757_vm9, %v747_v56, 2102212464 }
 0x11d   : > { %v1131_v58 = vxor.u32 2147483648, %v8470_v53  ;;  %v753_v50 = vor.u32 %v752_v37, %v751_v11  ;;  %vm756_vm10 = vcmp.lt.s32.totalorder %v8438_v25, 3  ;;  %v758_v46 = vsel %vm754_vm6, %v738_v2, %v741_v43 }
 0x11e   : > { %v1135_v55 = vsel %vm1133_vm4, %v1134_v60, %v8470_v53  ;;  %vm7041_vm8 = vcmp.lt.s32.totalorder %v7040_v21, 0  ;;  %v762_v63 = vsel %vm754_vm6, %v741_v43, %v744_v41  ;;  %v763_v52 = vsel %vm757_vm9, %v750_v6, 920167782 }
 0x11f   : > { %v1132_v36 = vsel %vm1130_vm1, %v8463_v7, %v1131_v58  ;;  %v1937_v44 = vsel %vm7041_vm8, 0, %v7040_v21  ;;  %v760_v38 = vsel %vm756_vm10, %v744_v41, %v759_v20  ;;  %v764_v30 = vsel %vm756_vm10, %v747_v56, %v763_v52 }
 0x120   : > { %v1136_v10 = vsel %vm1129_vm3, %v1132_v36, %v1135_v55  ;;  %v1938_v26 = vsub.s32 32, %v1937_v44  ;;  %v1942_v27 = vsub.s32 4294967266, %v1937_v44  ;;  %v1939_v22 = vshll.u32 %v8422_v0, %v1937_v44 }
 0x121   : > { %v8491_v35 = vsel %vm1126_vm5, nan, %v1136_v10  ;;  %v766_v37 = vsel %vm754_vm6, %v744_v41, %v747_v56  ;;  %v767_v21 = vsel %vm757_vm9, %v753_v50, 1326507024  ;;  %v765_v43 = vsel %vm755_vm7, %v762_v63, %v764_v30 }
 0x122   : > { %v1940_v40 = vshrl.u32 %v1922_v12, %v1938_v26  ;;  %v1943_v29 = vadd.s32 127, %v1942_v27  ;;  %v768_v55 = vsel %vm756_vm10, %v750_v6, %v767_v21  ;;  %vm1565_vm12 = vcmp.gt.s32.totalorder %v1564_v23, 0 }
 0x123   : > { %v769_v0 = vsel %vm755_vm7, %v766_v37, %v768_v55  ;;  %v8510_v12 = vmul.u32.u64.low %v8449_v33, %v765_v43  ;;  %v8511_v2 = vmul.u32.u64.high %v8449_v33, %v765_v43, %v8510_v12  ;;  %v11486_v56 = vrot.slane %v7861_v9, %v7878_v18 }
 0x124   : > { %v1941_v47 = vor.u32 %v1940_v40, %v1939_v22  ;;  %v1944_v11 = vshll.u32 %v1943_v29, 23  ;;  %v8521_v44 = vmul.u32.u64.low %v8449_v33, %v769_v0  ;;  %v8522_v50 = vmul.u32.u64.high %v8449_v33, %v769_v0, %v8521_v44 }
 0x125   : > { %v8518_v41 = vrot.slane %v11486_v56, %v7903_v31  ;;  %v1959_v6 = vadd.s32 3, %v8459_v45  ;;  %v761_v10 = vsel %vm755_vm7, %v758_v46, %v760_v38  ;;  %v1566_v26 = vsel %vm1565_vm12, %v1564_v23, 0 }
 0x126   : > { %v1945_v36 = vor.u32 4788187, %v1944_v11  ;;  %v8529_v27 = vadd.f32 %v7935_v49, %v7944_v54  ;;  %v1948_v63 = vcvt.s32.f32 %v1941_v47  ;;  %vm2790_vm13 = vcmp.eq.s32.totalorder %v8444_v15, 0 }
 0x127   : > { %vm2793_vm14 = vcmp.eq.s32.totalorder %v8444_v15, 2  ;;  %v1568_v9 = vand.u32 31, %v1566_v26  ;;  %v8535_v22 = vadd.f32 %v7965_v4, %v7973_v14  ;;  %v8538_v40 = vand.u32 3, %v8459_v45 }
 0x128   : > { %v1946_v20 = vand.u32 2147483647, %v1945_v36  ;;  %v780_v25 = vadd.s32 1, %v8511_v2  ;;  %v8543_v49 = vshll.u32 %v1562_v3, 8  ;;  %v692_v54 = vmul.f32 %v8455_v17, %v7981_v19 }
 0x129   : > { %v777_v46 = vmul.u32 %v8449_v33, %v761_v10  ;;  %vm779_vm11 = vc.u32 %v8522_v50, %v8510_v12  ;;  %v1569_v4 = vsub.s32 32, %v1568_v9  ;;  %v8550_v14 = vand.u32 3, %v1959_v6 }
 0x12a   : > { %v1949_v23 = vmul.f32 %v1948_v63, %v1946_v20  ;;  %v781_v45 = vsel %vm779_vm11, %v780_v25, %v8511_v2  ;;  %v1571_v29 = vshll.u32 %v11464_v1, %v1568_v9  ;;  %v1574_v42 = vshll.u32 %v11465_v32, %v1568_v9 }
 0x12b   : > { %vm2789_vm15 = vcmp.lt.s32.totalorder %v8444_v15, 2  ;;  %v782_v52 = vadd.s32 %v781_v45, %v777_v46  ;;  %v1572_v38 = vshrl.u32 %v11465_v32, %v1569_v4  ;;  %v1577_v33 = vshll.u32 %v11466_v8, %v1568_v9 }
 0x12c   : > { %v1950_v3 = vxor.u32 2147483648, %v1949_v23  ;;  %v1575_v30 = vshrl.u32 %v11466_v8, %v1569_v4  ;;  %v1578_v37 = vshrl.u32 %v11467_v59, %v1569_v4  ;;  %v1580_v21 = vshll.u32 %v11467_v59, %v1568_v9 }
 0x12d   : > { %v1581_v47 = vshrl.u32 %v11468_v62, %v1569_v4  ;;  %v783_v43 = vadd.s32 536870912, %v782_v52  ;;  %v1567_v55 = vshrl.u32 %v1566_v26, 5  ;;  %v1573_v0 = vor.u32 %v1572_v38, %v1571_v29 }
 0x12e   : > { %v1951_v11 = vsel %vm1868_vm2, %v1950_v3, %v1949_v23  ;;  %v1576_v56 = vor.u32 %v1575_v30, %v1574_v42  ;;  %v1579_v36 = vor.u32 %v1578_v37, %v1577_v33  ;;  %v1583_v10 = vshll.u32 %v11468_v62, %v1568_v9  ;;  %v11487_v42 = vld [vmem:[#allocation18_spill] sm:$0xff] }
 0x12f   : > { %v1954_v2 = vsel %vm8430_vm0, %v8147_v39, %v1951_v11  ;;  %v1582_v44 = vor.u32 %v1581_v47, %v1580_v21  ;;  %v784_v6 = vshrl.u32 %v783_v43, 30  ;;  %v1584_v20 = vshrl.u32 %v11485_v61, %v1569_v4 }
 0x130   : > { %7552 = vcosq.f32 %v1954_v2  ;;  %v2792_v26 = vsel %vm2790_vm13, %v8463_v7, %v1131_v58  ;;  %v2795_v48 = vsel %vm2793_vm14, %v1134_v60, %v8470_v53  ;;  %v1570_v63 = vshrl.u32 %v11464_v1, %v1569_v4 }
 0x131   : > { %7554 = vsinq.f32 %v1954_v2  ;;  %vm724_vm0 = vcmp.lt.s32.totalorder %v8318_v57, 0  ;;  %v785_v9 = vshll.u32 %v784_v6, 30  ;;  %v1585_v25 = vor.u32 %v1584_v20, %v1583_v10 }
 0x132   : > { %vm1586_vm1 = vcmp.lt.s32.totalorder %v1567_v55, 1  ;;  %vm1589_vm2 = vcmp.lt.s32.totalorder %v1567_v55, 4  ;;  %vm1588_vm3 = vcmp.lt.s32.totalorder %v1567_v55, 3  ;;  %vm1587_vm4 = vcmp.lt.s32.totalorder %v1567_v55, 2 }
 0x133   : > { %v1591_v23 = vsel %vm1589_vm2, %v1579_v36, 2102212464  ;;  %v1594_v46 = vsel %vm1586_vm1, %v1573_v0, %v1576_v56  ;;  %v1595_v45 = vsel %vm1589_vm2, %v1582_v44, 920167782  ;;  %v8582_v58 = vsub.s32 %v782_v52, %v785_v9 }
 0x134   : > { %v1596_v7 = vsel %vm1588_vm3, %v1579_v36, %v1595_v45  ;;  %v1598_v53 = vsel %vm1586_vm1, %v1576_v56, %v1579_v36  ;;  %v2796_v60 = vsel %vm2789_vm15, %v2792_v26, %v2795_v48  ;;  %vm3614_vm6 = vcmp.eq.s32.totalorder %v8538_v40, 0 }
 0x135   : > { %v1597_v4 = vsel %vm1587_vm4, %v1594_v46, %v1596_v7  ;;  %v1599_v29 = vsel %vm1589_vm2, %v1585_v25, 1326507024  ;;  %v8591_v3 = vadd.f32 %v692_v54, %v11487_v42  ;;  %vm3613_vm7 = vcmp.lt.s32.totalorder %v8538_v40, 2 }
 0x136   : > { %v788_v52 = vsub.s32 0, %v8582_v58  ;;  %v1590_v38 = vsel %vm1586_vm1, %v1570_v63, %v1573_v0  ;;  %v1592_v33 = vsel %vm1588_vm3, %v1576_v56, %v1591_v23  ;;  %v1600_v30 = vsel %vm1588_vm3, %v1582_v44, %v1599_v29  ;;  %v11488_v44 = vld [vmem:[#allocation13_spill] sm:$0xff] }
 0x137   : > { %vm1958_vm8 = vweird.f32 %v8147_v39  ;;  %v808_v15 = vsub.s32 4, %v784_v6  ;;  %v1601_v37 = vsel %vm1587_vm4, %v1598_v53, %v1600_v30  ;;  %vm3617_vm9 = vcmp.eq.s32.totalorder %v8538_v40, 2 }
 0x138   : > { %v8601_v21 = vmul.u32.u64.low %v8543_v49, %v1597_v4  ;;  %v8602_v47 = vmul.u32.u64.high %v8543_v49, %v1597_v4, %v8601_v21  ;;  %v6995_v54 = vmin.u32 %v788_v52, %v8582_v58  ;;  %vm1961_vm10 = vcmp.lt.s32.totalorder %v8550_v14, 2 }
 0x139   : > { %v8608_v11 = vmul.u32.u64.low %v8543_v49, %v1601_v37  ;;  %v8609_v43 = vmul.u32.u64.high %v8543_v49, %v1601_v37, %v8608_v11  ;;  %vm1962_vm12 = vcmp.eq.s32.totalorder %v8550_v14, 0  ;;  %vm1965_vm13 = vcmp.eq.s32.totalorder %v8550_v14, 2 }
 0x13a   : > { %v1593_v0 = vsel %vm1587_vm4, %v1590_v38, %v1592_v33  ;;  %v7553_v2 = vpop.eup %7552  ;;  %v2797_v56 = vsel %vm1126_vm5, nan, %v2796_v60  ;;  %v790_v36 = vclz %v6995_v54  ;;  %v700_v10 = vmul.f32 %v8455_v17, %v11488_v44 }
 0x13b   : > { %v930_v20 = vand.u32 2147483647, %v8591_v3  ;;  %v7555_v26 = vpop.eup %7554  ;;  %v1966_v48 = vxor.u32 2147483648, %v7553_v2  ;;  %v809_v63 = vsel %vm724_vm0, %v808_v15, %v784_v6  ;;  %v1612_v9 = vadd.s32 1, %v8602_v47 }
 0x13c   : > { %v933_v55 = vand.u32 2139095040, %v8591_v3  ;;  %v1963_v25 = vxor.u32 2147483648, %v7555_v26  ;;  %v6996_v23 = vadd.s32 4294967294, %v790_v36  ;;  %v1609_v34 = vmul.u32 %v8543_v49, %v1593_v0 }
 0x13d   : > { %vm1611_vm5 = vc.u32 %v8609_v43, %v8601_v21  ;;  %v1967_v17 = vsel %vm1965_vm13, %v1966_v48, %v7555_v26  ;;  %v3619_v46 = vsel %vm3617_vm9, %v1966_v48, %v7555_v26  ;;  %v778_v33 = vadd.s32 %v8510_v12, %v8522_v50 }
 0x13e   : > { %v1613_v45 = vsel %vm1611_vm5, %v1612_v9, %v8602_v47  ;;  %v934_v6 = vshrl.u32 %v933_v55, 23  ;;  %v1964_v7 = vsel %vm1962_vm12, %v7553_v2, %v1963_v25  ;;  %v3616_v53 = vsel %vm3614_vm6, %v7553_v2, %v1963_v25  ;;  %v11491_v47 = vld [vmem:[#allocation7_spill] sm:$0xff] }
 0x13f   : > { %vm6997_vm14 = vcmp.lt.s32.totalorder %v6996_v23, 0  ;;  %v1614_v49 = vadd.s32 %v1613_v45, %v1609_v34  ;;  %v1968_v60 = vsel %vm1961_vm10, %v1964_v7, %v1967_v17  ;;  %v3620_v4 = vsel %vm3613_vm7, %v3616_v53, %v3619_v46  ;;  %v11494_v46 = vld [vmem:[#allocation16_spill] sm:$0xff] }
 0x140   : > { %v793_v29 = vsel %vm6997_vm14, 0, %v6996_v23  ;;  %v7002_v42 = vadd.s32 4294967169, %v934_v6  ;;  %v8642_v52 = vsel %vm1958_vm8, nan, %v1968_v60  ;;  %v3621_v38 = vsel %vm1958_vm8, nan, %v3620_v4  ;;  %v11493_v23 = vld [vmem:[#allocation14_spill] sm:$0xff] }
 0x141   : > { %v794_v30 = vsub.s32 32, %v793_v29  ;;  %v7232_v15 = vpack.c.bf16 %v3621_v38, %v2797_v56  ;;  %vm8650_vm11 = vcmp.le.f32.partialorder %v722_v28, 0.7853982  ;;  %v798_v40 = vsub.s32 4294967266, %v793_v29 }
 0x142   : > { %v1615_v37 = vadd.s32 536870912, %v1614_v49  ;;  %v11492_v54 = vrot.slane %v11491_v47, %v7878_v18  ;;  %v811_v12 = vsel %vm8650_vm11, 0, %v809_v63  ;;  %v940_v50 = vadd.s32 1, %v7002_v42 }
 0x143   : > { %v796_v39 = vshrl.u32 %v778_v33, %v794_v30  ;;  %7233 = vmatprep.subr.bf16.mxu1 %v7232_v15  ;;  %v795_v0 = vshll.u32 %v8582_v58, %v793_v29  ;;  %v799_v28 = vadd.s32 127, %v798_v40  ;;  %v937_v56 = vand.u32 8388607, %v930_v20 }
 0x144   : > { %v8658_v11 = vrot.slane %v11492_v54, %v7903_v31  ;;  %v1616_v2 = vshrl.u32 %v1615_v37, 30  ;;  %v8667_v36 = vmul.f32 %v8518_v41, %v11488_v44  ;;  %v8670_v18 = vadd.f32 %v700_v10, %v8416_v51 }
 0x145   : > { %vm941_vm15 = vcmp.gt.s32.totalorder %v940_v50, 0  ;;  %v797_v31 = vor.u32 %v796_v39, %v795_v0  ;;  %v800_v26 = vshll.u32 %v799_v28, 23  ;;  %v8678_v9 = vmul.f32 %v8518_v41, %v7981_v19 }
 0x146   : > { %v1617_v48 = vshll.u32 %v1616_v2, 30  ;;  %v942_v63 = vsel %vm941_vm15, %v940_v50, 0  ;;  %v8674_v58 = vmul.f32 %v8658_v11, %v11488_v44  ;;  %v815_v55 = vadd.s32 3, %v811_v12 }
 0x147   : > { %v944_v25 = vand.u32 31, %v942_v63  ;;  %v1973_v34 = vand.u32 2139095040, %v11493_v23  ;;  %v801_v17 = vor.u32 4788187, %v800_v26  ;;  %v938_v10 = vor.u32 8388608, %v937_v56 }
 0x148   : > { %v8681_v51 = vsub.s32 %v1614_v49, %v1617_v48  ;;  %v1141_v45 = vand.u32 2139095040, %v11494_v46  ;;  %v1640_v6 = vsub.s32 4, %v1616_v2  ;;  %v1765_v53 = vand.u32 2139095040, %v8670_v18 }
 0x149   : > { %v945_v7 = vsub.s32 32, %v944_v25  ;;  %v802_v44 = vand.u32 2147483647, %v801_v17  ;;  %v804_v60 = vcvt.s32.f32 %v797_v31  ;;  %vm1556_vm1 = vcmp.lt.s32.totalorder %v8321_v24, 0 }
 0x14a   : > { %v1620_v41 = vsub.s32 0, %v8681_v51  ;;  %v8687_v4 = vand.u32 3, %v815_v55  ;;  %v1610_v29 = vadd.s32 %v8601_v21, %v8609_v43  ;;  %v8691_v49 = vand.u32 3, %v811_v12 }
 0x14b   : > { %v948_v42 = vshrl.u32 %v11465_v32, %v945_v7  ;;  %v805_v38 = vmul.f32 %v804_v60, %v802_v44  ;;  %v951_v30 = vshrl.u32 %v11466_v8, %v945_v7  ;;  %v8696_v15 = vshll.u32 %v938_v10, 8 }
 0x14c   : > { %v7027_v33 = vmin.u32 %v1620_v41, %v8681_v51  ;;  %v1641_v40 = vsel %vm1556_vm1, %v1640_v6, %v1616_v2  ;;  %v943_v37 = vshrl.u32 %v942_v63, 5  ;;  %v947_v47 = vshll.u32 %v11464_v1, %v944_v25 }
 0x14d   : > { %v1766_v54 = vshrl.u32 %v1765_v53, 23  ;;  %v806_v39 = vxor.u32 2147483648, %v805_v38  ;;  %v950_v43 = vshll.u32 %v11465_v32, %v944_v25  ;;  %v953_v12 = vshll.u32 %v11466_v8, %v944_v25 }
 0x14e   : > { %v1622_v21 = vclz %v7027_v33  ;;  %v949_v50 = vor.u32 %v948_v42, %v947_v47  ;;  %v954_v0 = vshrl.u32 %v11467_v59, %v945_v7  ;;  %v956_v28 = vshll.u32 %v11467_v59, %v944_v25 }
 0x14f   : > { %v957_v56 = vshrl.u32 %v11468_v62, %v945_v7  ;;  %v807_v2 = vsel %vm724_vm0, %v806_v39, %v805_v38  ;;  %v952_v26 = vor.u32 %v951_v30, %v950_v43  ;;  %v960_v48 = vshrl.u32 %v11485_v61, %v945_v7 }
 0x150   : > { %v7028_v31 = vadd.s32 4294967294, %v1622_v21  ;;  %v810_v63 = vsel %vm8650_vm11, %v8318_v57, %v807_v2  ;;  %vm8714_vm2 = vcmp.le.f32.partialorder %v1554_v13, 0.7853982  ;;  %v955_v17 = vor.u32 %v954_v0, %v953_v12 }
 0x151   : > { %v958_v10 = vor.u32 %v957_v56, %v956_v28  ;;  %v959_v6 = vshll.u32 %v11468_v62, %v944_v25  ;;  %7556 = vcosq.f32 %v810_v63  ;;  %v946_v53 = vshrl.u32 %v11464_v1, %v945_v7 }
 0x152   : > { %vm7029_vm0 = vcmp.lt.s32.totalorder %v7028_v31, 0  ;;  %vm962_vm3 = vcmp.lt.s32.totalorder %v943_v37, 1  ;;  %7558 = vsinq.f32 %v810_v63  ;;  %vm963_vm4 = vcmp.lt.s32.totalorder %v943_v37, 2 }
 0x153   : > { %v1625_v44 = vsel %vm7029_vm0, 0, %v7028_v31  ;;  %v961_v60 = vor.u32 %v960_v48, %v959_v6  ;;  %vm964_vm6 = vcmp.lt.s32.totalorder %v943_v37, 3  ;;  %vm965_vm7 = vcmp.lt.s32.totalorder %v943_v37, 4 }
 0x154   : > { %v1626_v14 = vsub.s32 32, %v1625_v44  ;;  %v1630_v41 = vsub.s32 4294967266, %v1625_v44  ;;  %v1627_v13 = vshll.u32 %v8681_v51, %v1625_v44  ;;  %v967_v42 = vsel %vm965_vm7, %v955_v17, 2102212464 }
 0x155   : > { %v970_v38 = vsel %vm962_vm3, %v949_v50, %v952_v26  ;;  %v971_v33 = vsel %vm965_vm7, %v958_v10, 920167782  ;;  %vm821_vm8 = vcmp.eq.s32.totalorder %v8687_v4, 2  ;;  %v974_v47 = vsel %vm962_vm3, %v952_v26, %v955_v17 }
 0x156   : > { %v1628_v25 = vshrl.u32 %v1610_v29, %v1626_v14  ;;  %v1631_v30 = vadd.s32 127, %v1630_v41  ;;  %v972_v7 = vsel %vm964_vm6, %v955_v17, %v971_v33  ;;  %vm818_vm9 = vcmp.eq.s32.totalorder %v8687_v4, 0  ;;  %v11499_v41 = vld [vmem:[#allocation9_spill] sm:$0xff] }
 0x157   : > { %v966_v39 = vsel %vm962_vm3, %v946_v53, %v949_v50  ;;  %v973_v21 = vsel %vm963_vm4, %v970_v38, %v972_v7  ;;  %v975_v43 = vsel %vm965_vm7, %v961_v60, 1326507024  ;;  %v7034_v51 = vadd.s32 4294967169, %v1766_v54  ;;  %v11501_v38 = vld [vmem:[#allocation11_spill] sm:$0xff] }
 0x158   : > { %v1629_v12 = vor.u32 %v1628_v25, %v1627_v13  ;;  %v1632_v0 = vshll.u32 %v1631_v30, 23  ;;  %v968_v28 = vsel %vm964_vm6, %v952_v26, %v967_v42  ;;  %v976_v56 = vsel %vm964_vm6, %v958_v10, %v975_v43  ;;  %v11500_v42 = vld [vmem:[#allocation12_spill] sm:$0xff] }
 0x159   : > { %vm814_vm10 = vweird.f32 %v8318_v57  ;;  %v977_v29 = vsel %vm963_vm4, %v974_v47, %v976_v56  ;;  %v8733_v2 = vmul.u32.u64.low %v8696_v15, %v973_v21  ;;  %v8734_v31 = vmul.u32.u64.high %v8696_v15, %v973_v21, %v8733_v2 }
 0x15a   : > { %v1762_v50 = vand.u32 2147483647, %v8670_v18  ;;  %v1633_v48 = vor.u32 4788187, %v1632_v0  ;;  %v1643_v54 = vsel %vm8714_vm2, 0, %v1641_v40  ;;  %v1636_v17 = vcvt.s32.f32 %v1629_v12  ;;  %v11498_v40 = vld [vmem:[#allocation10_spill] sm:$0xff] }
 0x15b   : > { %v8741_v63 = vmul.u32.u64.low %v8696_v15, %v977_v29  ;;  %v8742_v26 = vmul.u32.u64.high %v8696_v15, %v977_v29, %v8741_v63  ;;  %v969_v10 = vsel %vm963_vm4, %v966_v39, %v968_v28  ;;  %v1772_v6 = vadd.s32 1, %v7034_v51  ;;  %v8749_v44 = vpop.eup %7556 }
 0x15c   : > { %v8747_v53 = vadd.f32 %v8678_v9, %v8529_v27  ;;  %v1634_v60 = vand.u32 2147483647, %v1633_v48  ;;  %v8753_v14 = vadd.f32 %v8667_v36, %v8535_v22  ;;  %v8757_v13 = vadd.f32 %v11499_v41, %v11498_v40  ;;  %v7559_v33 = vpop.eup %7558 }
 0x15d   : > { %v8761_v37 = vadd.f32 %v11501_v38, %v11500_v42  ;;  %v822_v25 = vxor.u32 2147483648, %v8749_v44  ;;  %v1647_v27 = vadd.s32 3, %v1643_v54  ;;  %v988_v9 = vadd.s32 1, %v8734_v31 }
 0x15e   : > { %11497 = vst [vmem:[#allocation18_spill] sm:$0xff] %v8753_v14  ;;  %vm1773_vm12 = vcmp.gt.s32.totalorder %v1772_v6, 0  ;;  %v819_v30 = vxor.u32 2147483648, %v7559_v33  ;;  %v1637_v7 = vmul.f32 %v1636_v17, %v1634_v60  ;;  %v985_v22 = vmul.u32 %v8696_v15, %v969_v10 }
 0x15f   : > { %vm987_vm13 = vc.u32 %v8742_v26, %v8733_v2  ;;  %v823_v36 = vsel %vm821_vm8, %v822_v25, %v7559_v33  ;;  %v1769_v39 = vand.u32 8388607, %v1762_v50  ;;  %v1774_v21 = vsel %vm1773_vm12, %v1772_v6, 0 }
 0x160   : > { %v989_v47 = vsel %vm987_vm13, %v988_v9, %v8734_v31  ;;  %vm817_vm5 = vcmp.lt.s32.totalorder %v8687_v4, 2  ;;  %v820_v43 = vsel %vm818_vm9, %v8749_v44, %v819_v30  ;;  %v1638_v51 = vxor.u32 2147483648, %v1637_v7 }
 0x161   : > { %v990_v15 = vadd.s32 %v989_v47, %v985_v22  ;;  %v824_v12 = vsel %vm817_vm5, %v820_v43, %v823_v36  ;;  %vm2481_vm14 = vcmp.eq.s32.totalorder %v8691_v49, 0  ;;  %vm2484_vm11 = vcmp.eq.s32.totalorder %v8691_v49, 2 }
 0x162   : > { %v8779_v0 = vand.u32 3, %v1643_v54  ;;  %v1776_v28 = vand.u32 31, %v1774_v21  ;;  %v8783_v56 = vsel %vm814_vm10, nan, %v824_v12  ;;  %v1639_v29 = vsel %vm1556_vm1, %v1638_v51, %v1637_v7 }
 0x163   : > { %11502 = vst [vmem:[#allocation13_spill] sm:$0xff] %v8783_v56  ;;  %v8787_v31 = vand.u32 3, %v1647_v27  ;;  %v991_v4 = vadd.s32 536870912, %v990_v15  ;;  %v1642_v48 = vsel %vm8714_vm2, %v8321_v24, %v1639_v29  ;;  %v1770_v63 = vor.u32 8388608, %v1769_v39 }
 0x164   : > { %v8792_v17 = vshrl.u32 %v1774_v21, 5  ;;  %v1777_v54 = vsub.s32 32, %v1776_v28  ;;  %7560 = vcosq.f32 %v1642_v48  ;;  %vm2480_vm15 = vcmp.lt.s32.totalorder %v8691_v49, 2 }
 0x165   : > { %v8795_v10 = vshrl.u32 %v991_v4, 30  ;;  %v1779_v6 = vshll.u32 %v11464_v1, %v1776_v28  ;;  %v1782_v60 = vshll.u32 %v11465_v32, %v1776_v28  ;;  %7562 = vsinq.f32 %v1642_v48 }
 0x166   : > { %v1780_v40 = vshrl.u32 %v11465_v32, %v1777_v54  ;;  %v1783_v41 = vshrl.u32 %v11466_v8, %v1777_v54  ;;  %v1785_v55 = vshll.u32 %v11466_v8, %v1776_v28  ;;  %v1786_v38 = vshrl.u32 %v11467_v59, %v1777_v54 }
 0x167   : > { %v993_v42 = vshll.u32 %v8795_v10, 30  ;;  %v1788_v27 = vshll.u32 %v11467_v59, %v1776_v28  ;;  %v1789_v9 = vshrl.u32 %v11468_v62, %v1777_v54  ;;  %v1791_v36 = vshll.u32 %v11468_v62, %v1776_v28 }
 0x168   : > { %v1781_v7 = vor.u32 %v1780_v40, %v1779_v6  ;;  %v1784_v22 = vor.u32 %v1783_v41, %v1782_v60  ;;  %v1792_v47 = vshrl.u32 %v11485_v61, %v1777_v54  ;;  %vm3308_vm1 = vcmp.eq.s32.totalorder %v8779_v0, 2 }
 0x169   : > { %v8809_v39 = vsub.s32 %v990_v15, %v993_v42  ;;  %v1787_v21 = vor.u32 %v1786_v38, %v1785_v55  ;;  %v1790_v43 = vor.u32 %v1789_v9, %v1788_v27  ;;  %vm1650_vm2 = vcmp.eq.s32.totalorder %v8787_v31, 0 }
 0x16a   : > { %v2486_v51 = vsel %vm2484_vm11, %v822_v25, %v7559_v33  ;;  %vm3305_vm0 = vcmp.eq.s32.totalorder %v8779_v0, 0  ;;  %v1793_v12 = vor.u32 %v1792_v47, %v1791_v36  ;;  %v8815_v29 = vshll.u32 %v1770_v63, 8 }
 0x16b   : > { %vm1649_vm3 = vcmp.lt.s32.totalorder %v8787_v31, 2  ;;  %v2483_v28 = vsel %vm2481_vm14, %v8749_v44, %v819_v30  ;;  %vm3304_vm4 = vcmp.lt.s32.totalorder %v8779_v0, 2  ;;  %v996_v15 = vsub.s32 0, %v8809_v39 }
 0x16c   : > { %vm1794_vm6 = vcmp.lt.s32.totalorder %v8792_v17, 1  ;;  %vm1797_vm7 = vcmp.lt.s32.totalorder %v8792_v17, 4  ;;  %vm1646_vm8 = vweird.f32 %v8321_v24  ;;  %vm1796_vm9 = vcmp.lt.s32.totalorder %v8792_v17, 3  ;;  %v11505_v24 = vld [vmem:[#allocation17_spill] sm:$0xff] }
 0x16d   : > { %v1799_v33 = vsel %vm1797_vm7, %v1787_v21, 2102212464  ;;  %v1802_v25 = vsel %vm1794_vm6, %v1781_v7, %v1784_v22  ;;  %v1803_v4 = vsel %vm1797_vm7, %v1790_v43, 920167782  ;;  %v7003_v48 = vmin.u32 %v996_v15, %v8809_v39 }
 0x16e   : > { %v1778_v44 = vshrl.u32 %v11464_v1, %v1777_v54  ;;  %vm1795_vm12 = vcmp.lt.s32.totalorder %v8792_v17, 2  ;;  %v1804_v30 = vsel %vm1796_vm9, %v1787_v21, %v1803_v4  ;;  %v2487_v63 = vsel %vm2480_vm15, %v2483_v28, %v2486_v51  ;;  %v7561_v41 = vpop.eup %7560 }
 0x16f   : > { %v1805_v6 = vsel %vm1795_vm12, %v1802_v25, %v1804_v30  ;;  %v1806_v60 = vsel %vm1794_vm6, %v1784_v22, %v1787_v21  ;;  %v1807_v40 = vsel %vm1797_vm7, %v1793_v12, 1326507024  ;;  %vm1653_vm13 = vcmp.eq.s32.totalorder %v8787_v31, 2  ;;  %v7563_v38 = vpop.eup %7562 }
 0x170   : > { %v998_v55 = vclz %v7003_v48  ;;  %v1798_v54 = vsel %vm1794_vm6, %v1778_v44, %v1781_v7  ;;  %v1800_v42 = vsel %vm1796_vm9, %v1784_v22, %v1799_v33  ;;  %v1654_v49 = vxor.u32 2147483648, %v7561_v41 }
 0x171   : > { %v1808_v27 = vsel %vm1796_vm9, %v1790_v43, %v1807_v40  ;;  %v8848_v9 = vmul.u32.u64.low %v8815_v29, %v1805_v6  ;;  %v8849_v36 = vmul.u32.u64.high %v8815_v29, %v1805_v6, %v8848_v9  ;;  %v1651_v47 = vxor.u32 2147483648, %v7563_v38 }
 0x172   : > { %v2488_v21 = vsel %vm814_vm10, nan, %v2487_v63  ;;  %v7004_v51 = vadd.s32 4294967294, %v998_v55  ;;  %v1809_v7 = vsel %vm1795_vm12, %v1806_v60, %v1808_v27  ;;  %v1655_v12 = vsel %vm1653_vm13, %v1654_v49, %v7563_v38  ;;  %v11504_v60 = vld [vmem:[#allocation15_spill] sm:$0xff] }
 0x173   : > { %v3310_v22 = vsel %vm3308_vm1, %v1654_v49, %v7563_v38  ;;  %v8859_v28 = vmul.u32.u64.low %v8815_v29, %v1809_v7  ;;  %v8860_v43 = vmul.u32.u64.high %v8815_v29, %v1809_v7, %v8859_v28  ;;  %v1652_v15 = vsel %vm1650_vm2, %v7561_v41, %v1651_v47 }
 0x174   : > { %v3307_v33 = vsel %vm3305_vm0, %v7561_v41, %v1651_v47  ;;  %vm7005_vm5 = vcmp.lt.s32.totalorder %v7004_v51, 0  ;;  %v1801_v57 = vsel %vm1795_vm12, %v1798_v54, %v1800_v42  ;;  %v1656_v25 = vsel %vm1649_vm3, %v1652_v15, %v1655_v12 }
 0x175   : > { %v3311_v4 = vsel %vm3304_vm4, %v3307_v33, %v3310_v22  ;;  %v1001_v48 = vsel %vm7005_vm5, 0, %v7004_v51  ;;  %v1820_v44 = vadd.s32 1, %v8849_v36  ;;  %v8875_v30 = vsel %vm1646_vm8, nan, %v1656_v25 }
 0x176   : > { %11503 = vst [vmem:[#allocation7_spill] sm:$0xff] %v8875_v30  ;;  %v3312_v63 = vsel %vm1646_vm8, nan, %v3311_v4  ;;  %v986_v17 = vadd.s32 %v8733_v2, %v8742_v26  ;;  %v1002_v6 = vsub.s32 32, %v1001_v48  ;;  %v2181_v31 = vand.u32 2139095040, %v11504_v60 }
 0x177   : > { %v7230_v40 = vpack.c.bf16 %v3312_v63, %v2488_v21  ;;  %v1006_v41 = vsub.s32 4294967266, %v1001_v48  ;;  %v1016_v54 = vsub.s32 4, %v8795_v10  ;;  %v1817_v42 = vmul.u32 %v8815_v29, %v1801_v57 }
 0x178   : > { %v1004_v55 = vshrl.u32 %v986_v17, %v1002_v6  ;;  %vm1819_vm10 = vc.u32 %v8860_v43, %v8848_v9  ;;  %v1349_v38 = vand.u32 2139095040, %v11505_v24  ;;  %v1003_v2 = vshll.u32 %v8809_v39, %v1001_v48 }
 0x179   : > { %7231 = vmatpush1.bf16.msra.mxu0 %v7230_v40  ;;  %v1007_v26 = vadd.s32 127, %v1006_v41  ;;  %v1821_v49 = vsel %vm1819_vm10, %v1820_v44, %v8849_v36  ;;  %v697_v27 = vmul.f32 %v8658_v11, %v7981_v19  ;;  %v1142_v47 = vshrl.u32 %v1141_v45, 23 }
 0x17a   : > { %v1822_v21 = vadd.s32 %v1821_v49, %v1817_v42  ;;  %v1245_v29 = vand.u32 2139095040, %v8747_v53  ;;  %v1974_v51 = vshrl.u32 %v1973_v34, 23  ;;  %vm932_vm14 = vcmp.lt.s32.totalorder %v8591_v3, 0 }
 0x17b   : > { %v1005_v7 = vor.u32 %v1004_v55, %v1003_v2  ;;  %v1008_v12 = vshll.u32 %v1007_v26, 23  ;;  %v1017_v39 = vsel %vm932_vm14, %v1016_v54, %v8795_v10  ;;  %v1242_v19 = vand.u32 2147483647, %v8747_v53 }
 0x17c   : > { %v1823_v36 = vadd.s32 536870912, %v1822_v21  ;;  %v1246_v11 = vshrl.u32 %v1245_v29, 23  ;;  %v2182_v22 = vshrl.u32 %v2181_v31, 23  ;;  %v1350_v45 = vshrl.u32 %v1349_v38, 23 }
 0x17d   : > { %v1009_v28 = vor.u32 4788187, %v1008_v12  ;;  %v2077_v15 = vand.u32 2139095040, %v8753_v14  ;;  %v7010_v33 = vadd.s32 4294967169, %v1142_v47  ;;  %vm8906_vm11 = vcmp.le.f32.partialorder %v930_v20, 0.7853982 }
 0x17e   : > { %v1824_v57 = vshrl.u32 %v1823_v36, 30  ;;  %v7014_v25 = vadd.s32 4294967169, %v1246_v11  ;;  %v1012_v10 = vcvt.s32.f32 %v1005_v7  ;;  %v1019_v48 = vsel %vm8906_vm11, 0, %v1017_v39 }
 0x17f   : > { %v1010_v4 = vand.u32 2147483647, %v1009_v28  ;;  %v8913_v44 = vadd.f32 %v697_v27, %v8757_v13  ;;  %v1249_v17 = vand.u32 8388607, %v1242_v19  ;;  %v2074_v20 = vand.u32 2147483647, %v8753_v14 }
 0x180   : > { %v1825_v63 = vshll.u32 %v1824_v57, 30  ;;  %v1252_v6 = vadd.s32 1, %v7014_v25  ;;  %v8918_v31 = vadd.s32 4294967169, %v1974_v51  ;;  %v2078_v41 = vshrl.u32 %v2077_v15, 23 }
 0x181   : > { %11508 = vst [vmem:[#allocation14_spill] sm:$0xff] %v8913_v44  ;;  %v1013_v40 = vmul.f32 %v1012_v10, %v1010_v4  ;;  %v8922_v55 = vadd.f32 %v8674_v58, %v8761_v37  ;;  %v8924_v54 = vadd.s32 4294967169, %v2182_v22  ;;  %v1023_v42 = vadd.s32 3, %v1019_v48 }
 0x182   : > { %v8926_v13 = vsub.s32 %v1822_v21, %v1825_v63  ;;  %vm1253_vm15 = vcmp.gt.s32.totalorder %v1252_v6, 0  ;;  %v8928_v38 = vadd.s32 1, %v7010_v33  ;;  %v8930_v2 = vadd.s32 4294967169, %v1350_v45 }
 0x183   : > { %v1014_v26 = vxor.u32 2147483648, %v1013_v40  ;;  %v1254_v49 = vsel %vm1253_vm15, %v1252_v6, 0  ;;  %vm1764_vm1 = vcmp.lt.s32.totalorder %v8670_v18, 0  ;;  %v1250_v47 = vor.u32 8388608, %v1249_v17 }
 0x184   : > { %v1828_v27 = vsub.s32 0, %v8926_v13  ;;  %v8936_v58 = vand.u32 8388607, %v2074_v20  ;;  %v1848_v21 = vsub.s32 4, %v1824_v57  ;;  %v1256_v29 = vand.u32 31, %v1254_v49 }
 0x185   : > { %v1015_v37 = vsel %vm932_vm14, %v1014_v26, %v1013_v40  ;;  %v7046_v51 = vadd.s32 4294967169, %v2078_v41  ;;  %v8943_v12 = vand.u32 3, %v1023_v42  ;;  %vm8947_vm2 = vcmp.le.f32.partialorder %v1762_v50, 0.7853982 }
 0x186   : > { %v1018_v7 = vsel %vm8906_vm11, %v8591_v3, %v1015_v37  ;;  %v7035_v36 = vmin.u32 %v1828_v27, %v8926_v13  ;;  %v1818_v11 = vadd.s32 %v8848_v9, %v8860_v43  ;;  %v8954_v22 = vand.u32 3, %v1019_v48 }
 0x187   : > { %7564 = vcosq.f32 %v1018_v7  ;;  %v1257_v45 = vsub.s32 32, %v1256_v29  ;;  %v8956_v15 = vshll.u32 %v1250_v47, 8  ;;  %v2082_v33 = vor.u32 8388608, %v8936_v58 }
 0x188   : > { %7566 = vsinq.f32 %v1018_v7  ;;  %v1830_v28 = vclz %v7035_v36  ;;  %v1849_v50 = vsel %vm1764_vm1, %v1848_v21, %v1824_v57  ;;  %v8961_v34 = vshrl.u32 %v1254_v49, 5 }
 0x189   : > { %v1260_v25 = vshrl.u32 %v11465_v32, %v1257_v45  ;;  %v2084_v4 = vadd.s32 1, %v7046_v51  ;;  %v1259_v9 = vshll.u32 %v11464_v1, %v1256_v29  ;;  %v1262_v43 = vshll.u32 %v11465_v32, %v1256_v29 }
 0x18a   : > { %v7036_v10 = vadd.s32 4294967294, %v1830_v28  ;;  %v1263_v48 = vshrl.u32 %v11466_v8, %v1257_v45  ;;  %vm1029_vm0 = vcmp.eq.s32.totalorder %v8943_v12, 2  ;;  %v1265_v63 = vshll.u32 %v11466_v8, %v1256_v29 }
 0x18b   : > { %v1266_v17 = vshrl.u32 %v11467_v59, %v1257_v45  ;;  %v1268_v57 = vshll.u32 %v11467_v59, %v1256_v29  ;;  %v1269_v6 = vshrl.u32 %v11468_v62, %v1257_v45  ;;  %vm1026_vm3 = vcmp.eq.s32.totalorder %v8943_v12, 0 }
 0x18c   : > { %vm7037_vm4 = vcmp.lt.s32.totalorder %v7036_v10, 0  ;;  %v1261_v40 = vor.u32 %v1260_v25, %v1259_v9  ;;  %v1271_v41 = vshll.u32 %v11468_v62, %v1256_v29  ;;  %v1272_v42 = vshrl.u32 %v11485_v61, %v1257_v45 }
 0x18d   : > { %vm1025_vm6 = vcmp.lt.s32.totalorder %v8943_v12, 2  ;;  %v1833_v26 = vsel %vm7037_vm4, 0, %v7036_v10  ;;  %v1264_v49 = vor.u32 %v1263_v48, %v1262_v43  ;;  %v1267_v27 = vor.u32 %v1266_v17, %v1265_v63 }
 0x18e   : > { %v1270_v47 = vor.u32 %v1269_v6, %v1268_v57  ;;  %vm1022_vm7 = vweird.f32 %v8591_v3  ;;  %v1834_v37 = vsub.s32 32, %v1833_v26  ;;  %v1838_v21 = vsub.s32 4294967266, %v1833_v26 }
 0x18f   : > { %v1851_v51 = vsel %vm8947_vm2, 0, %v1849_v50  ;;  %v1273_v7 = vor.u32 %v1272_v42, %v1271_v41  ;;  %v1835_v36 = vshll.u32 %v8926_v13, %v1833_v26  ;;  %v1258_v29 = vshrl.u32 %v11464_v1, %v1257_v45 }
 0x190   : > { %vm1274_vm8 = vcmp.lt.s32.totalorder %v8961_v34, 1  ;;  %vm2085_vm9 = vcmp.gt.s32.totalorder %v2084_v4, 0  ;;  %v1836_v28 = vshrl.u32 %v1818_v11, %v1834_v37  ;;  %v1839_v25 = vadd.s32 127, %v1838_v21 }
 0x191   : > { %vm1276_vm12 = vcmp.lt.s32.totalorder %v8961_v34, 3  ;;  %vm1277_vm13 = vcmp.lt.s32.totalorder %v8961_v34, 4  ;;  %v7565_v10 = vpop.eup %7564  ;;  %vm2687_vm5 = vcmp.eq.s32.totalorder %v8954_v22, 0  ;;  %vm2690_vm10 = vcmp.eq.s32.totalorder %v8954_v22, 2 }
 0x192   : > { %v1279_v50 = vsel %vm1277_vm13, %v1267_v27, 2102212464  ;;  %v1282_v13 = vsel %vm1274_vm8, %v1261_v40, %v1264_v49  ;;  %v1283_v9 = vsel %vm1277_vm13, %v1270_v47, 920167782  ;;  %v1287_v45 = vsel %vm1277_vm13, %v1273_v7, 1326507024  ;;  %v7567_v43 = vpop.eup %7566 }
 0x193   : > { %v1030_v48 = vxor.u32 2147483648, %v7565_v10  ;;  %v1837_v63 = vor.u32 %v1836_v28, %v1835_v36  ;;  %v1840_v11 = vshll.u32 %v1839_v25, 23  ;;  %v1286_v17 = vsel %vm1274_vm8, %v1264_v49, %v1267_v27 }
 0x194   : > { %v1027_v57 = vxor.u32 2147483648, %v7567_v43  ;;  %vm1275_vm14 = vcmp.lt.s32.totalorder %v8961_v34, 2  ;;  %v1284_v6 = vsel %vm1276_vm12, %v1267_v27, %v1283_v9  ;;  %v1288_v41 = vsel %vm1276_vm12, %v1270_v47, %v1287_v45 }
 0x195   : > { %v1031_v42 = vsel %vm1029_vm0, %v1030_v48, %v7567_v43  ;;  %v1841_v26 = vor.u32 4788187, %v1840_v11  ;;  %v1278_v37 = vsel %vm1274_vm8, %v1258_v29, %v1261_v40  ;;  %v1280_v21 = vsel %vm1276_vm12, %v1264_v49, %v1279_v50 }
 0x196   : > { %v1028_v7 = vsel %vm1026_vm3, %v7565_v10, %v1027_v57  ;;  %v1855_v36 = vadd.s32 3, %v1851_v51  ;;  %v1285_v27 = vsel %vm1275_vm14, %v1282_v13, %v1284_v6  ;;  %v1289_v47 = vsel %vm1275_vm14, %v1286_v17, %v1288_v41 }
 0x197   : > { %v1032_v28 = vsel %vm1025_vm6, %v1028_v7, %v1031_v42  ;;  %v1842_v25 = vand.u32 2147483647, %v1841_v26  ;;  %v1844_v9 = vcvt.s32.f32 %v1837_v63  ;;  %v2086_v40 = vsel %vm2085_vm9, %v2084_v4, 0 }
 0x198   : > { %v9012_v49 = vsel %vm1022_vm7, nan, %v1032_v28  ;;  %v1281_v29 = vsel %vm1275_vm14, %v1278_v37, %v1280_v21  ;;  %v9017_v50 = vmul.u32.u64.low %v8956_v15, %v1289_v47  ;;  %v9018_v13 = vmul.u32.u64.high %v8956_v15, %v1289_v47, %v9017_v50 }
 0x199   : > { %11511 = vst [vmem:[#allocation16_spill] sm:$0xff] %v9012_v49  ;;  %v1845_v45 = vmul.f32 %v1844_v9, %v1842_v25  ;;  %v9021_v11 = vmul.u32.u64.low %v8956_v15, %v1285_v27  ;;  %v9022_v12 = vmul.u32.u64.high %v8956_v15, %v1285_v27, %v9021_v11  ;;  %v11388_v63 = vand.u32 2147483647, %v8913_v44 }
 0x19a   : > { %v9026_v4 = vand.u32 3, %v1855_v36  ;;  %v9028_v17 = vand.u32 3, %v1851_v51  ;;  %v2088_v6 = vand.u32 31, %v2086_v40  ;;  %v9032_v34 = vshll.u32 %v2082_v33, 8 }
 0x19b   : > { %v1846_v41 = vxor.u32 2147483648, %v1845_v45  ;;  %v2689_v42 = vsel %vm2687_vm5, %v7565_v10, %v1027_v57  ;;  %v2692_v26 = vsel %vm2690_vm10, %v1030_v48, %v7567_v43  ;;  %v1297_v37 = vmul.u32 %v8956_v15, %v1281_v29 }
 0x19c   : > { %vm1299_vm11 = vc.u32 %v9018_v13, %v9021_v11  ;;  %v2087_v21 = vshrl.u32 %v2086_v40, 5  ;;  %v2089_v51 = vsub.s32 32, %v2088_v6  ;;  %v1453_v7 = vand.u32 2139095040, %v8913_v44 }
 0x19d   : > { %v1847_v58 = vsel %vm1764_vm1, %v1846_v41, %v1845_v45  ;;  %v1300_v33 = vadd.s32 1, %v9022_v12  ;;  %v2091_v36 = vshll.u32 %v11464_v1, %v2088_v6  ;;  %v2094_v10 = vshll.u32 %v11465_v32, %v2088_v6 }
 0x19e   : > { %v1850_v15 = vsel %vm8947_vm2, %v8670_v18, %v1847_v58  ;;  %v2092_v43 = vshrl.u32 %v11465_v32, %v2089_v51  ;;  %v2095_v48 = vshrl.u32 %v11466_v8, %v2089_v51  ;;  %v2097_v57 = vshll.u32 %v11466_v8, %v2088_v6 }
 0x19f   : > { %7568 = vcosq.f32 %v1850_v15  ;;  %vm2686_vm15 = vcmp.lt.s32.totalorder %v8954_v22, 2  ;;  %v1301_v27 = vsel %vm1299_vm11, %v1300_v33, %v9022_v12  ;;  %v2098_v47 = vshrl.u32 %v11467_v59, %v2089_v51 }
 0x1a0   : > { %v2100_v28 = vshll.u32 %v11467_v59, %v2088_v6  ;;  %7570 = vsinq.f32 %v1850_v15  ;;  %v1302_v25 = vadd.s32 %v1301_v27, %v1297_v37  ;;  %v2093_v9 = vor.u32 %v2092_v43, %v2091_v36 }
 0x1a1   : > { %v2096_v39 = vor.u32 %v2095_v48, %v2094_v10  ;;  %v2099_v40 = vor.u32 %v2098_v47, %v2097_v57  ;;  %v2101_v29 = vshrl.u32 %v11468_v62, %v2089_v51  ;;  %v2103_v50 = vshll.u32 %v11468_v62, %v2088_v6 }
 0x1a2   : > { %v2104_v45 = vshrl.u32 %v11485_v61, %v2089_v51  ;;  %v1303_v41 = vadd.s32 536870912, %v1302_v25  ;;  %vm2106_vm1 = vcmp.lt.s32.totalorder %v2087_v21, 1  ;;  %vm2107_vm2 = vcmp.lt.s32.totalorder %v2087_v21, 2 }
 0x1a3   : > { %vm2109_vm0 = vcmp.lt.s32.totalorder %v2087_v21, 4  ;;  %vm3514_vm3 = vcmp.eq.s32.totalorder %v9028_v17, 2  ;;  %v2090_v12 = vshrl.u32 %v11464_v1, %v2089_v51  ;;  %v2102_v58 = vor.u32 %v2101_v29, %v2100_v28 }
 0x1a4   : > { %v2105_v33 = vor.u32 %v2104_v45, %v2103_v50  ;;  %v2111_v37 = vsel %vm2109_vm0, %v2099_v40, 2102212464  ;;  %vm3511_vm4 = vcmp.eq.s32.totalorder %v9028_v17, 0  ;;  %v1304_v36 = vshrl.u32 %v1303_v41, 30 }
 0x1a5   : > { %v2114_v10 = vsel %vm2106_vm1, %v2093_v9, %v2096_v39  ;;  %v2118_v15 = vsel %vm2106_vm1, %v2096_v39, %v2099_v40  ;;  %v1454_v43 = vshrl.u32 %v1453_v7, 23  ;;  %vm3510_vm6 = vcmp.lt.s32.totalorder %v9028_v17, 2 }
 0x1a6   : > { %vm2108_vm8 = vcmp.lt.s32.totalorder %v2087_v21, 3  ;;  %v2110_v6 = vsel %vm2106_vm1, %v2090_v12, %v2093_v9  ;;  %v2115_v48 = vsel %vm2109_vm0, %v2102_v58, 920167782  ;;  %v2119_v57 = vsel %vm2109_vm0, %v2105_v33, 1326507024 }
 0x1a7   : > { %vm1854_vm9 = vweird.f32 %v8670_v18  ;;  %v1305_v27 = vshll.u32 %v1304_v36, 30  ;;  %v2112_v47 = vsel %vm2108_vm8, %v2096_v39, %v2111_v37  ;;  %v2116_v51 = vsel %vm2108_vm8, %v2099_v40, %v2115_v48 }
 0x1a8   : > { %v2120_v28 = vsel %vm2108_vm8, %v2102_v58, %v2119_v57  ;;  %vm1857_vm12 = vcmp.lt.s32.totalorder %v9026_v4, 2  ;;  %v2117_v29 = vsel %vm2107_vm2, %v2114_v10, %v2116_v51  ;;  %v7022_v45 = vadd.s32 4294967169, %v1454_v43 }
 0x1a9   : > { %v2121_v50 = vsel %vm2107_vm2, %v2118_v15, %v2120_v28  ;;  %vm1149_vm13 = vcmp.gt.s32.totalorder %v8928_v38, 0  ;;  %v2693_v7 = vsel %vm2686_vm15, %v2689_v42, %v2692_v26  ;;  %v9071_v9 = vsub.s32 %v1302_v25, %v1305_v27  ;;  %v7569_v39 = vpop.eup %7568 }
 0x1aa   : > { %v9074_v41 = vmul.u32.u64.low %v9032_v34, %v2121_v50  ;;  %v9075_v12 = vmul.u32.u64.high %v9032_v34, %v2121_v50, %v9074_v41  ;;  %vm1858_vm5 = vcmp.eq.s32.totalorder %v9026_v4, 0  ;;  %v2113_v40 = vsel %vm2107_vm2, %v2110_v6, %v2112_v47  ;;  %v7571_v37 = vpop.eup %7570 }
 0x1ab   : > { %v9080_v58 = vmul.u32.u64.low %v9032_v34, %v2117_v29  ;;  %v9081_v33 = vmul.u32.u64.high %v9032_v34, %v2117_v29, %v9080_v58  ;;  %vm1861_vm10 = vcmp.eq.s32.totalorder %v9026_v4, 2  ;;  %v1862_v22 = vxor.u32 2147483648, %v7569_v39 }
 0x1ac   : > { %v1308_v42 = vsub.s32 0, %v9071_v9  ;;  %v1460_v26 = vadd.s32 1, %v7022_v45  ;;  %v1859_v25 = vxor.u32 2147483648, %v7571_v37  ;;  %v2694_v10 = vsel %vm1022_vm7, nan, %v2693_v7 }
 0x1ad   : > { %v1328_v15 = vsub.s32 4, %v1304_v36  ;;  %v1457_v21 = vand.u32 8388607, %v11388_v63  ;;  %v1863_v43 = vsel %vm1861_vm10, %v1862_v22, %v7571_v37  ;;  %v3516_v6 = vsel %vm3514_vm3, %v1862_v22, %v7571_v37 }
 0x1ae   : > { %v7015_v48 = vmin.u32 %v1308_v42, %v9071_v9  ;;  %v2129_v57 = vmul.u32 %v9032_v34, %v2113_v40  ;;  %v1860_v27 = vsel %vm1858_vm5, %v7569_v39, %v1859_v25  ;;  %v3513_v47 = vsel %vm3511_vm4, %v7569_v39, %v1859_v25 }
 0x1af   : > { %vm2131_vm7 = vc.u32 %v9075_v12, %v9080_v58  ;;  %v2132_v3 = vadd.s32 1, %v9081_v33  ;;  %v1864_v51 = vsel %vm1857_vm12, %v1860_v27, %v1863_v43  ;;  %v3517_v28 = vsel %vm3510_vm6, %v3513_v47, %v3516_v6 }
 0x1b0   : > { %v1310_v29 = vclz %v7015_v48  ;;  %vm1461_vm14 = vcmp.gt.s32.totalorder %v1460_v26, 0  ;;  %v9107_v34 = vsel %vm1854_vm9, nan, %v1864_v51  ;;  %v3518_v50 = vsel %vm1854_vm9, nan, %v3517_v28 }
 0x1b1   : > { %11512 = vst [vmem:[#allocation10_spill] sm:$0xff] %v9107_v34  ;;  %vm1244_vm11 = vcmp.lt.s32.totalorder %v8747_v53, 0  ;;  %v2133_v45 = vsel %vm2131_vm7, %v2132_v3, %v9081_v33  ;;  %v7234_v7 = vpack.c.bf16 %v3518_v50, %v2694_v10  ;;  %v9116_v39 = vadd.s32 1, %v8918_v31 }
 0x1b2   : > { %v7016_v41 = vadd.s32 4294967294, %v1310_v29  ;;  %v2134_v17 = vadd.s32 %v2133_v45, %v2129_v57  ;;  %v1329_v40 = vsel %vm1244_vm11, %v1328_v15, %v1304_v36  ;;  %v1458_v37 = vor.u32 8388608, %v1457_v21 }
 0x1b3   : > { %v1462_v22 = vsel %vm1461_vm14, %v1460_v26, 0  ;;  %v9121_v18 = vadd.s32 1, %v8924_v54  ;;  %7235 = vmatpush1.bf16.msra.mxu1 %v7234_v7  ;;  %v9126_v25 = vsel %vm1149_vm13, %v8928_v38, 0  ;;  %vm9130_vm1 = vcmp.le.f32.partialorder %v1242_v19, 0.7853982 }
 0x1b4   : > { %vm7017_vm15 = vcmp.lt.s32.totalorder %v7016_v41, 0  ;;  %v2135_v33 = vadd.s32 536870912, %v2134_v17  ;;  %v1464_v42 = vand.u32 31, %v1462_v22  ;;  %v1298_v36 = vadd.s32 %v9021_v11, %v9018_v13 }
 0x1b5   : > { %v1313_v54 = vsel %vm7017_vm15, 0, %v7016_v41  ;;  %v9138_v15 = vsel %vm9130_vm1, 0, %v1329_v40  ;;  %v9142_v43 = vshll.u32 %v1458_v37, 8  ;;  %v11380_v19 = vand.u32 2147483647, %v8922_v55 }
 0x1b6   : > { %v1314_v26 = vsub.s32 32, %v1313_v54  ;;  %v1318_v10 = vsub.s32 4294967266, %v1313_v54  ;;  %v9140_v21 = vshrl.u32 %v2135_v33, 30  ;;  %v1465_v38 = vsub.s32 32, %v1464_v42 }
 0x1b7   : > { %v2285_v6 = vand.u32 2139095040, %v8922_v55  ;;  %v1315_v48 = vshll.u32 %v9071_v9, %v1313_v54  ;;  %v1467_v27 = vshll.u32 %v11464_v1, %v1464_v42  ;;  %v1470_v3 = vshll.u32 %v11465_v32, %v1464_v42 }
 0x1b8   : > { %v1316_v57 = vshrl.u32 %v1298_v36, %v1314_v26  ;;  %v1319_v13 = vadd.s32 127, %v1318_v10  ;;  %v2137_v11 = vshll.u32 %v9140_v21, 30  ;;  %v1468_v47 = vshrl.u32 %v11465_v32, %v1465_v38 }
 0x1b9   : > { %v1471_v51 = vshrl.u32 %v11466_v8, %v1465_v38  ;;  %v1474_v45 = vshrl.u32 %v11467_v59, %v1465_v38  ;;  %v2130_v9 = vadd.s32 %v9080_v58, %v9075_v12  ;;  %v1463_v7 = vshrl.u32 %v1462_v22, 5 }
 0x1ba   : > { %v1317_v28 = vor.u32 %v1316_v57, %v1315_v48  ;;  %v1320_v29 = vshll.u32 %v1319_v13, 23  ;;  %v9152_v50 = vsub.s32 %v2134_v17, %v2137_v11  ;;  %v1473_v41 = vshll.u32 %v11466_v8, %v1464_v42 }
 0x1bb   : > { %v2286_v40 = vshrl.u32 %v2285_v6, 23  ;;  %v1469_v36 = vor.u32 %v1468_v47, %v1467_v27  ;;  %v1472_v54 = vor.u32 %v1471_v51, %v1470_v3  ;;  %v1476_v26 = vshll.u32 %v11467_v59, %v1464_v42 }
 0x1bc   : > { %v1321_v37 = vor.u32 4788187, %v1320_v29  ;;  %v2140_v33 = vsub.s32 0, %v9152_v50  ;;  %v1477_v10 = vshrl.u32 %v11468_v62, %v1465_v38  ;;  %v1479_v17 = vshll.u32 %v11468_v62, %v1464_v42 }
 0x1bd   : > { %v1480_v48 = vshrl.u32 %v11485_v61, %v1465_v38  ;;  %v1324_v13 = vcvt.s32.f32 %v1317_v28  ;;  %v1475_v58 = vor.u32 %v1474_v45, %v1473_v41  ;;  %v2160_v22 = vsub.s32 4, %v9140_v21 }
 0x1be   : > { %v1322_v57 = vand.u32 2147483647, %v1321_v37  ;;  %v7047_v12 = vmin.u32 %v2140_v33, %v9152_v50  ;;  %v1478_v6 = vor.u32 %v1477_v10, %v1476_v26  ;;  %v9167_v27 = vand.u32 8388607, %v11380_v19 }
 0x1bf   : > { %v1481_v11 = vor.u32 %v1480_v48, %v1479_v17  ;;  %v1466_v51 = vshrl.u32 %v11464_v1, %v1465_v38  ;;  %vm1482_vm2 = vcmp.lt.s32.totalorder %v1463_v7, 1  ;;  %vm2076_vm0 = vcmp.lt.s32.totalorder %v8753_v14, 0 }
 0x1c0   : > { %v1325_v47 = vmul.f32 %v1324_v13, %v1322_v57  ;;  %v2142_v3 = vclz %v7047_v12  ;;  %vm1483_vm3 = vcmp.lt.s32.totalorder %v1463_v7, 2  ;;  %vm1484_vm4 = vcmp.lt.s32.totalorder %v1463_v7, 3 }
 0x1c1   : > { %vm1485_vm6 = vcmp.lt.s32.totalorder %v1463_v7, 4  ;;  %v1490_v42 = vsel %vm1482_vm2, %v1469_v36, %v1472_v54  ;;  %v1486_v37 = vsel %vm1482_vm2, %v1466_v51, %v1469_v36  ;;  %v1494_v26 = vsel %vm1482_vm2, %v1472_v54, %v1475_v58 }
 0x1c2   : > { %v1326_v28 = vxor.u32 2147483648, %v1325_v47  ;;  %v7048_v29 = vadd.s32 4294967294, %v2142_v3  ;;  %v1487_v45 = vsel %vm1485_vm6, %v1475_v58, 2102212464  ;;  %v1491_v41 = vsel %vm1485_vm6, %v1478_v6, 920167782 }
 0x1c3   : > { %v1492_v33 = vsel %vm1484_vm4, %v1475_v58, %v1491_v41  ;;  %v1495_v10 = vsel %vm1485_vm6, %v1481_v11, 1326507024  ;;  %vm1981_vm8 = vcmp.gt.s32.totalorder %v9116_v39, 0  ;;  %v1488_v17 = vsel %vm1484_vm4, %v1472_v54, %v1487_v45 }
 0x1c4   : > { %v1327_v38 = vsel %vm1244_vm11, %v1326_v28, %v1325_v47  ;;  %vm7049_vm9 = vcmp.lt.s32.totalorder %v7048_v29, 0  ;;  %v1493_v48 = vsel %vm1483_vm3, %v1490_v42, %v1492_v33  ;;  %v1496_v36 = vsel %vm1484_vm4, %v1478_v6, %v1495_v10 }
 0x1c5   : > { %v1330_v57 = vsel %vm9130_vm1, %v8747_v53, %v1327_v38  ;;  %v2145_v13 = vsel %vm7049_vm9, 0, %v7048_v29  ;;  %v7054_v12 = vadd.s32 4294967169, %v2286_v40  ;;  %v1497_v47 = vsel %vm1483_vm3, %v1494_v26, %v1496_v36  ;;  %v4042_v40 = vld [vmem:[%s11348_s3] sm:$0xff] }
 0x1c6   : > { %7572 = vcosq.f32 %v1330_v57  ;;  %v2146_v58 = vsub.s32 32, %v2145_v13  ;;  %v2147_v11 = vshll.u32 %v9152_v50, %v2145_v13  ;;  %v2150_v3 = vsub.s32 4294967266, %v2145_v13 }
 0x1c7   : > { %7574 = vsinq.f32 %v1330_v57  ;;  %v9184_v54 = vmul.u32.u64.low %v9142_v43, %v1493_v48  ;;  %v9185_v51 = vmul.u32.u64.high %v9142_v43, %v1493_v48, %v9184_v54  ;;  %v1489_v50 = vsel %vm1483_vm3, %v1486_v37, %v1488_v17 }
 0x1c8   : > { %v2148_v42 = vshrl.u32 %v2130_v9, %v2146_v58  ;;  %v2151_v31 = vadd.s32 127, %v2150_v3  ;;  %v9189_v28 = vmul.u32.u64.low %v9142_v43, %v1497_v47  ;;  %v9190_v29 = vmul.u32.u64.high %v9142_v43, %v1497_v47, %v9189_v28 }
 0x1c9   : > { %v2292_v6 = vadd.s32 1, %v7054_v12  ;;  %vm4050_vm12 = vcmask 130048   ;;  %vm2189_vm13 = vcmp.gt.s32.totalorder %v9121_v18, 0  ;;  %v2161_v9 = vsel %vm2076_vm0, %v2160_v22, %v9140_v21 }
 0x1ca   : > { %v2149_v45 = vor.u32 %v2148_v42, %v2147_v11  ;;  %v2152_v41 = vshll.u32 %v2151_v31, 23  ;;  %v11381_v33 = vmov 0.0   ;;  %v9203_v26 = vand.u32 31, %v9126_v25 }
 0x1cb   : > { %4139 = vmatprep.mubr.f32.mxu0 %v11381_v33  ;;  %4252 = vmatprep.mubr.f32.mxu1 %v11381_v33  ;;  %v9206_v7 = vand.u32 3, %v9138_v15  ;;  %v1508_v37 = vadd.s32 1, %v9185_v51  ;;  %vm2293_vm5 = vcmp.gt.s32.totalorder %v2292_v6, 0  ;;  %vm9213_vm10 = vcmp.le.f32.partialorder %v2074_v20, 0.7853982 }
 0x1cc   : > { %7122 = vmatmul.mubr.msk.f32.vlgmr.msra.gmra.mrb[0].mxu0 %vm4050_vm12, %v4042_v40  ;;  %7130 = vmatmul.mubr.msk.f32.vlgmr.msra.gmra.mrb[0].mxu1 %vm4050_vm12, %v4042_v40  ;;  %v2153_v22 = vor.u32 4788187, %v2152_v41  ;;  %v1505_v10 = vmul.u32 %v9142_v43, %v1489_v50  ;;  %vm1507_vm7 = vc.u32 %v9190_v29, %v9184_v54  ;;  %v9224_v38 = vsel %vm9213_vm10, 0, %v2161_v9 }
 0x1cd   : > { %4145 = vmatprep.mubr.f32.mxu0 %v11381_v33  ;;  %4258 = vmatprep.mubr.f32.mxu1 %v11381_v33  ;;  %v1509_v17 = vsel %vm1507_vm7, %v1508_v37, %v9185_v51  ;;  %v2290_v20 = vor.u32 8388608, %v9167_v27  ;;  %v2294_v48 = vsel %vm2293_vm5, %v2292_v6, 0  ;;  %v2156_v13 = vcvt.s32.f32 %v2149_v45 }
 0x1ce   : > { %v2154_v57 = vand.u32 2147483647, %v2153_v22  ;;  %v1510_v36 = vadd.s32 %v1509_v17, %v1505_v10  ;;  %v2296_v43 = vand.u32 31, %v2294_v48  ;;  %v9231_v12 = vsel %vm1981_vm8, %v9116_v39, 0 }
 0x1cf   : > { %v9236_v58 = vsel %vm2189_vm13, %v9121_v18, 0  ;;  %v9239_v11 = vadd.s32 1, %v8930_v2  ;;  %vm2996_vm14 = vcmp.eq.s32.totalorder %v9206_v7, 0  ;;  %vm2999_vm11 = vcmp.eq.s32.totalorder %v9206_v7, 2 }
 0x1d0   : > { %v9242_v27 = vpop.eup %7572  ;;  %v2157_v3 = vmul.f32 %v2156_v13, %v2154_v57  ;;  %v1511_v47 = vadd.s32 536870912, %v1510_v36  ;;  %v2297_v51 = vsub.s32 32, %v2296_v43  ;;  %v9248_v39 = vand.u32 3, %v9224_v38 }
 0x1d1   : > { %v9245_v42 = vpop.eup %7574  ;;  %v2295_v31 = vshrl.u32 %v2294_v48, 5  ;;  %v9250_v18 = vshll.u32 %v2290_v20, 8  ;;  %v11386_v2 = vand.u32 2147483647, %v11494_v46  ;;  %v11383_v28 = vxor.u32 2147483648, %v9242_v27 }
 0x1d2   : > { %v2158_v40 = vxor.u32 2147483648, %v2157_v3  ;;  %v9254_v50 = vshrl.u32 %v1511_v47, 30  ;;  %v9257_v6 = vsub.s32 32, %v9203_v26  ;;  %v2299_v45 = vshll.u32 %v11464_v1, %v2296_v43 }
 0x1d3   : > { %v2300_v41 = vshrl.u32 %v11465_v32, %v2297_v51  ;;  %v2303_v9 = vshrl.u32 %v11466_v8, %v2297_v51  ;;  %v2306_v37 = vshrl.u32 %v11467_v59, %v2297_v51  ;;  %v11384_v22 = vxor.u32 2147483648, %v9245_v42 }
 0x1d4   : > { %v2159_v10 = vsel %vm2076_vm0, %v2158_v40, %v2157_v3  ;;  %vm2995_vm15 = vcmp.lt.s32.totalorder %v9206_v7, 2  ;;  %v1513_v17 = vshll.u32 %v9254_v50, 30  ;;  %v2302_v20 = vshll.u32 %v11465_v32, %v2296_v43 }
 0x1d5   : > { %v2162_v48 = vsel %vm9213_vm10, %v8753_v14, %v2159_v10  ;;  %v2298_v57 = vshrl.u32 %v11464_v1, %v2297_v51  ;;  %v2305_v13 = vshll.u32 %v11466_v8, %v2296_v43  ;;  %v2308_v47 = vshll.u32 %v11467_v59, %v2296_v43 }
 0x1d6   : > { %7576 = vcosq.f32 %v2162_v48  ;;  %v3001_v3 = vsel %vm2999_vm11, %v11383_v28, %v9245_v42  ;;  %v9280_v40 = vsub.s32 %v1510_v36, %v1513_v17  ;;  %v2301_v4 = vor.u32 %v2300_v41, %v2299_v45 }
 0x1d7   : > { %7578 = vsinq.f32 %v2162_v48  ;;  %v2304_v0 = vor.u32 %v2303_v9, %v2302_v20  ;;  %v2307_v21 = vor.u32 %v2306_v37, %v2305_v13  ;;  %v2309_v10 = vshrl.u32 %v11468_v62, %v2297_v51 }
 0x1d8   : > { %vm1334_vm1 = vweird.f32 %v8747_v53  ;;  %v2998_v19 = vsel %vm2996_vm14, %v9242_v27, %v11384_v22  ;;  %v1516_v33 = vsub.s32 0, %v9280_v40  ;;  %v2311_v28 = vshll.u32 %v11468_v62, %v2296_v43 }
 0x1d9   : > { %v2312_v36 = vshrl.u32 %v11485_v61, %v2297_v51  ;;  %v2310_v45 = vor.u32 %v2309_v10, %v2308_v47  ;;  %vm2314_vm2 = vcmp.lt.s32.totalorder %v2295_v31, 1  ;;  %vm2316_vm0 = vcmp.lt.s32.totalorder %v2295_v31, 3 }
 0x1da   : > { %vm2317_vm3 = vcmp.lt.s32.totalorder %v2295_v31, 4  ;;  %v7023_v41 = vmin.u32 %v1516_v33, %v9280_v40  ;;  %v2318_v37 = vsel %vm2314_vm2, %v2298_v57, %v2301_v4  ;;  %vm3820_vm4 = vcmp.eq.s32.totalorder %v9248_v39, 0 }
 0x1db   : > { %v2313_v9 = vor.u32 %v2312_v36, %v2311_v28  ;;  %v2319_v17 = vsel %vm2317_vm3, %v2307_v21, 2102212464  ;;  %v2322_v48 = vsel %vm2314_vm2, %v2301_v4, %v2304_v0  ;;  %v2323_v13 = vsel %vm2317_vm3, %v2310_v45, 920167782 }
 0x1dc   : > { %v2320_v20 = vsel %vm2316_vm0, %v2304_v0, %v2319_v17  ;;  %v2326_v22 = vsel %vm2314_vm2, %v2304_v0, %v2307_v21  ;;  %vm3819_vm6 = vcmp.lt.s32.totalorder %v9248_v39, 2  ;;  %v1518_v43 = vclz %v7023_v41 }
 0x1dd   : > { %vm2315_vm8 = vcmp.lt.s32.totalorder %v2295_v31, 2  ;;  %v2324_v51 = vsel %vm2316_vm0, %v2307_v21, %v2323_v13  ;;  %v2327_v47 = vsel %vm2317_vm3, %v2313_v9, 1326507024  ;;  %vm2166_vm9 = vweird.f32 %v8753_v14 }
 0x1de   : > { %v3002_v33 = vsel %vm2995_vm15, %v2998_v19, %v3001_v3  ;;  %v2321_v28 = vsel %vm2315_vm8, %v2318_v37, %v2320_v20  ;;  %v2325_v57 = vsel %vm2315_vm8, %v2322_v48, %v2324_v51  ;;  %v2328_v10 = vsel %vm2316_vm0, %v2310_v45, %v2327_v47 }
 0x1df   : > { %v7024_v36 = vadd.s32 4294967294, %v1518_v43  ;;  %v2329_v4 = vsel %vm2315_vm8, %v2326_v22, %v2328_v10  ;;  %v9302_v0 = vmul.u32.u64.low %v9250_v18, %v2325_v57  ;;  %v9303_v17 = vmul.u32.u64.high %v9250_v18, %v2325_v57, %v9302_v0 }
 0x1e0   : > { %vm3823_vm13 = vcmp.eq.s32.totalorder %v9248_v39, 2  ;;  %v9308_v21 = vmul.u32.u64.low %v9250_v18, %v2329_v4  ;;  %v9309_v41 = vmul.u32.u64.high %v9250_v18, %v2329_v4, %v9308_v21  ;;  %v9312_v7 = vshrl.u32 %v9126_v25, 5  ;;  %v9314_v19 = vpop.eup %7576 }
 0x1e1   : > { %v1506_v31 = vadd.s32 %v9184_v54, %v9190_v29  ;;  %vm7025_vm5 = vcmp.lt.s32.totalorder %v7024_v36, 0  ;;  %v9320_v22 = vand.u32 8388607, %v11386_v2  ;;  %v1155_v3 = vshll.u32 %v11464_v1, %v9203_v26  ;;  %v9324_v45 = vpop.eup %7578 }
 0x1e2   : > { %v11385_v9 = vxor.u32 2147483648, %v9314_v19  ;;  %v3003_v25 = vsel %vm1334_vm1, nan, %v3002_v33  ;;  %v1521_v37 = vsel %vm7025_vm5, 0, %v7024_v36  ;;  %v2337_v20 = vmul.u32 %v9250_v18, %v2321_v28 }
 0x1e3   : > { %v11387_v54 = vxor.u32 2147483648, %v9324_v45  ;;  %v1522_v29 = vsub.s32 32, %v1521_v37  ;;  %v1526_v48 = vsub.s32 4294967266, %v1521_v37  ;;  %v1156_v13 = vshrl.u32 %v11465_v32, %v9257_v6 }
 0x1e4   : > { %v3825_v43 = vsel %vm3823_vm13, %v11385_v9, %v9324_v45  ;;  %vm2339_vm10 = vc.u32 %v9309_v41, %v9302_v0  ;;  %v2340_v51 = vadd.s32 1, %v9303_v17  ;;  %v1159_v18 = vshrl.u32 %v11466_v8, %v9257_v6 }
 0x1e5   : > { %v3822_v47 = vsel %vm3820_vm4, %v9314_v19, %v11387_v54  ;;  %v1523_v33 = vshll.u32 %v9280_v40, %v1521_v37  ;;  %v1524_v28 = vshrl.u32 %v1506_v31, %v1522_v29  ;;  %v1527_v57 = vadd.s32 127, %v1526_v48 }
 0x1e6   : > { %v3826_v10 = vsel %vm3819_vm6, %v3822_v47, %v3825_v43  ;;  %v2341_v36 = vsel %vm2339_vm10, %v2340_v51, %v9303_v17  ;;  %v1158_v4 = vshll.u32 %v11465_v32, %v9203_v26  ;;  %v1162_v21 = vshrl.u32 %v11467_v59, %v9257_v6 }
 0x1e7   : > { %v3827_v9 = vsel %vm2166_vm9, nan, %v3826_v10  ;;  %v1525_v2 = vor.u32 %v1524_v28, %v1523_v33  ;;  %v1528_v54 = vshll.u32 %v1527_v57, 23  ;;  %v2342_v63 = vadd.s32 %v2341_v36, %v2337_v20 }
 0x1e8   : > { %v7236_v40 = vpack.c.bf16 %v3827_v9, %v3003_v25  ;;  %v1161_v31 = vshll.u32 %v11466_v8, %v9203_v26  ;;  %v1164_v39 = vshll.u32 %v11467_v59, %v9203_v26  ;;  %v1165_v17 = vshrl.u32 %v11468_v62, %v9257_v6 }
 0x1e9   : > { %vm1357_vm7 = vcmp.gt.s32.totalorder %v9239_v11, 0  ;;  %v11517_v37 = vand.u32 2147483647, %v8913_v44  ;;  %v1529_v48 = vor.u32 4788187, %v1528_v54  ;;  %v2343_v20 = vadd.s32 536870912, %v2342_v63 }
 0x1ea   : > { %v1157_v9 = vor.u32 %v1156_v13, %v1155_v3  ;;  %v1160_v25 = vor.u32 %v1159_v18, %v1158_v4  ;;  %7237 = vmatprep.subr.bf16.mxu0 %v7236_v40  ;;  %v1163_v43 = vor.u32 %v1162_v21, %v1161_v31  ;;  %v1166_v51 = vor.u32 %v1165_v17, %v1164_v39 }
 0x1eb   : > { %vm9367_vm14 = vcmp.le.f32.partialorder %v11517_v37, 0.7853982  ;;  %v1167_v47 = vshll.u32 %v11468_v62, %v9203_v26  ;;  %v1168_v33 = vshrl.u32 %v11485_v61, %v9257_v6  ;;  %vm1452_vm11 = vcmp.lt.s32.totalorder %v8913_v44, 0 }
 0x1ec   : > { %v1530_v28 = vand.u32 2147483647, %v1529_v48  ;;  %v1532_v57 = vcvt.s32.f32 %v1525_v2  ;;  %v2344_v10 = vshrl.u32 %v2343_v20, 30  ;;  %v1536_v36 = vsub.s32 4, %v9254_v50 }
 0x1ed   : > { %v1146_v54 = vor.u32 8388608, %v9320_v22  ;;  %v1169_v3 = vor.u32 %v1168_v33, %v1167_v47  ;;  %vm1170_vm15 = vcmp.lt.s32.totalorder %v9312_v7, 1  ;;  %vm1172_vm2 = vcmp.lt.s32.totalorder %v9312_v7, 3 }
 0x1ee   : > { %v1533_v13 = vmul.f32 %v1532_v57, %v1530_v28  ;;  %v2345_v18 = vshll.u32 %v2344_v10, 30  ;;  %vm1173_vm0 = vcmp.lt.s32.totalorder %v9312_v7, 4  ;;  %v1178_v26 = vsel %vm1170_vm15, %v1157_v9, %v1160_v25 }
 0x1ef   : > { %v1179_v4 = vsel %vm1173_vm0, %v1166_v51, 920167782  ;;  %v1182_v2 = vsel %vm1170_vm15, %v1160_v25, %v1163_v43  ;;  %v1183_v21 = vsel %vm1173_vm0, %v1169_v3, 1326507024  ;;  %v1154_v22 = vshrl.u32 %v11464_v1, %v9257_v6 }
 0x1f0   : > { %v1534_v40 = vxor.u32 2147483648, %v1533_v13  ;;  %v9385_v31 = vsub.s32 %v2342_v63, %v2345_v18  ;;  %v1180_v39 = vsel %vm1172_vm2, %v1163_v43, %v1179_v4  ;;  %vm1171_vm3 = vcmp.lt.s32.totalorder %v9312_v7, 2 }
 0x1f1   : > { %v1175_v17 = vsel %vm1173_vm0, %v1163_v43, 2102212464  ;;  %v1184_v37 = vsel %vm1172_vm2, %v1166_v51, %v1183_v21  ;;  %v1186_v48 = vshll.u32 %v1146_v54, 8  ;;  %v1181_v63 = vsel %vm1171_vm3, %v1178_v26, %v1180_v39 }
 0x1f2   : > { %v1535_v20 = vsel %vm1452_vm11, %v1534_v40, %v1533_v13  ;;  %v2348_v47 = vsub.s32 0, %v9385_v31  ;;  %v1185_v6 = vsel %vm1171_vm3, %v1182_v2, %v1184_v37  ;;  %v1537_v33 = vsel %vm1452_vm11, %v1536_v36, %v9254_v50 }
 0x1f3   : > { %v1538_v43 = vsel %vm9367_vm14, %v8913_v44, %v1535_v20  ;;  %v9407_v51 = vmul.u32.u64.low %v1186_v48, %v1185_v6  ;;  %v9408_v28 = vmul.u32.u64.high %v1186_v48, %v1185_v6, %v9407_v51  ;;  %v9411_v57 = vand.u32 31, %v9231_v12 }
 0x1f4   : > { %v7055_v54 = vmin.u32 %v2348_v47, %v9385_v31  ;;  %v1174_v3 = vsel %vm1170_vm15, %v1154_v22, %v1157_v9  ;;  %v1176_v13 = vsel %vm1172_vm2, %v1160_v25, %v1175_v17  ;;  %v9421_v50 = vsel %vm1357_vm7, %v9239_v11, 0  ;;  %v9446_v22 = vld [vmem:[%s11348_s3 + $0x8] sm:$0xff] }
 0x1f5   : > { %7580 = vcosq.f32 %v1538_v43  ;;  %v9423_v36 = vmul.u32.u64.low %v1186_v48, %v1181_v63  ;;  %v9424_v18 = vmul.u32.u64.high %v1186_v48, %v1181_v63, %v9423_v36  ;;  %v9429_v26 = vsel %vm9367_vm14, 0, %v1537_v33  ;;  %11521 = vst [vmem:[#allocation12_spill] sm:$0xff] %v9446_v22  ;;  %7123 = vmatmul.mubr.msk.f32.gmra.mrb[2].mxu0 %vm4050_vm12, %v9446_v22  ;;  %7131 = vmatmul.mubr.msk.f32.gmra.mrb[2].mxu1 %vm4050_vm12, %v9446_v22 }
 0x1f6   : > { %11520 = vst [vmem:[#allocation9_spill] sm:$0xff] %v9429_v26  ;;  %7582 = vsinq.f32 %v1538_v43  ;;  %v2350_v4 = vclz %v7055_v54  ;;  %v2368_v9 = vsub.s32 4, %v2344_v10  ;;  %v9432_v2 = vand.u32 31, %v9236_v58 }
 0x1f7   : > { %v1177_v25 = vsel %vm1171_vm3, %v1174_v3, %v1176_v13  ;;  %v11389_v11 = vand.u32 2147483647, %v11493_v23  ;;  %v9438_v21 = vand.u32 31, %v9421_v50  ;;  %vm1195_vm4 = vc.u32 %v9408_v28, %v9423_v36 }
 0x1f8   : > { %v7056_v40 = vadd.s32 4294967294, %v2350_v4  ;;  %v1985_v29 = vsub.s32 32, %v9411_v57  ;;  %vm2284_vm6 = vcmp.lt.s32.totalorder %v8922_v55, 0  ;;  %v2338_v7 = vadd.s32 %v9302_v0, %v9309_v41  ;;  %v9471_v41 = vld [vmem:[%s11348_s3 + $0x10] sm:$0xff] }
 0x1f9   : > { %v9452_v39 = vand.u32 3, %v9429_v26  ;;  %v1196_v17 = vadd.s32 1, %v9424_v18  ;;  %v9461_v37 = vsel %vm2284_vm6, %v2368_v9, %v2344_v10  ;;  %v1193_v20 = vmul.u32 %v1186_v48, %v1177_v25  ;;  %11523 = vst [vmem:[#allocation11_spill] sm:$0xff] %v9471_v41 }
 0x1fa   : > { %vm7057_vm8 = vcmp.lt.s32.totalorder %v7056_v40, 0  ;;  %v9464_v47 = vshrl.u32 %v9231_v12, 5  ;;  %v11522_v0 = vmov 0.0   ;;  %v9479_v48 = vand.u32 8388607, %v11389_v11 }
 0x1fb   : > { %4151 = vmatprep.mubr.f32.mxu0 %v11522_v0  ;;  %4264 = vmatprep.mubr.f32.mxu1 %v11522_v0  ;;  %v2353_v63 = vsel %vm7057_vm8, 0, %v7056_v40  ;;  %v1197_v10 = vsel %vm1195_vm4, %v1196_v17, %v9424_v18  ;;  %v1987_v12 = vshll.u32 %v11464_v1, %v9411_v57  ;;  %v1994_v51 = vshrl.u32 %v11467_v59, %v1985_v29  ;;  %v9498_v17 = vld [vmem:[%s11348_s3 + $0x18] sm:$0xff] }
 0x1fc   : > { %v2354_v6 = vsub.s32 32, %v2353_v63  ;;  %v2358_v33 = vsub.s32 4294967266, %v2353_v63  ;;  %v1198_v43 = vadd.s32 %v1197_v10, %v1193_v20  ;;  %v1988_v54 = vshrl.u32 %v11465_v32, %v1985_v29  ;;  %7124 = vmatmul.mubr.msk.f32.gmra.mrb[4].mxu0 %vm4050_vm12, %v9471_v41  ;;  %7132 = vmatmul.mubr.msk.f32.gmra.mrb[4].mxu1 %vm4050_vm12, %v9471_v41 }
 0x1fd   : > { %v1991_v3 = vshrl.u32 %v11466_v8, %v1985_v29  ;;  %v1993_v13 = vshll.u32 %v11466_v8, %v9411_v57  ;;  %v1997_v18 = vshrl.u32 %v11468_v62, %v1985_v29  ;;  %v2355_v4 = vshll.u32 %v9385_v31, %v2353_v63  ;;  %4157 = vmatprep.mubr.f32.mxu0 %v11522_v0 }
 0x1fe   : > { %v2356_v9 = vshrl.u32 %v2338_v7, %v2354_v6  ;;  %v2359_v25 = vadd.s32 127, %v2358_v33  ;;  %v1199_v40 = vadd.s32 536870912, %v1198_v43  ;;  %v1986_v10 = vshrl.u32 %v11464_v1, %v1985_v29  ;;  %4270 = vmatprep.mubr.f32.mxu1 %v11522_v0 }
 0x1ff   : > { %v9500_v20 = vpop.eup %7580  ;;  %v1990_v31 = vshll.u32 %v11465_v32, %v9411_v57  ;;  %v1996_v7 = vshll.u32 %v11467_v59, %v9411_v57  ;;  %v2000_v63 = vshrl.u32 %v11485_v61, %v1985_v29  ;;  %v1995_v34 = vor.u32 %v1994_v51, %v1993_v13 }
 0x200   : > { %11524 = vst [vmem:[#allocation15_spill] sm:$0xff] %v9500_v20  ;;  %v9509_v6 = vpop.eup %7582  ;;  %v2357_v33 = vor.u32 %v2356_v9, %v2355_v4  ;;  %v2360_v11 = vshll.u32 %v2359_v25, 23  ;;  %v9511_v49 = vshrl.u32 %v1199_v40, 30  ;;  %v1989_v26 = vor.u32 %v1988_v54, %v1987_v12  ;;  %7125 = vmatmul.mubr.msk.f32.gmra.mrb[6].mxu0 %vm4050_vm12, %v9498_v17  ;;  %7133 = vmatmul.mubr.msk.f32.gmra.mrb[6].mxu1 %vm4050_vm12, %v9498_v17 }
 0x201   : > { %11525 = vst [vmem:[#allocation17_spill] sm:$0xff] %v9509_v6  ;;  %v1992_v41 = vor.u32 %v1991_v3, %v1990_v31  ;;  %v1998_v22 = vor.u32 %v1997_v18, %v1996_v7  ;;  %v1999_v56 = vshll.u32 %v11468_v62, %v9411_v57  ;;  %v11398_v29 = vxor.u32 2147483648, %v9500_v20  ;;  %4163 = vmatprep.mubr.f32.mxu0 %v11522_v0  ;;  %v9532_v57 = vld [vmem:[%s11348_s3 + $0x20] sm:$0xff]  ;;  %v9562_v31 = vld [vmem:[%s11348_s3 + $0x28] sm:$0xff] }
 0x202   : > { %v11526_v30 = vand.u32 2147483647, %v8922_v55  ;;  %v2361_v4 = vor.u32 4788187, %v2360_v11  ;;  %v1201_v51 = vshll.u32 %v9511_v49, 30  ;;  %v1978_v12 = vor.u32 8388608, %v9479_v48  ;;  %4276 = vmatprep.mubr.f32.mxu1 %v11522_v0 }
 0x203   : > { %vm3202_vm5 = vcmp.eq.s32.totalorder %v9452_v39, 0  ;;  %v2001_v54 = vor.u32 %v2000_v63, %v1999_v56  ;;  %vm2002_vm10 = vcmp.lt.s32.totalorder %v9464_v47, 1  ;;  %vm2005_vm7 = vcmp.lt.s32.totalorder %v9464_v47, 4  ;;  %11529 = vst [vmem:[#allocation19_spill] sm:$0xff] %v9562_v31 }
 0x204   : > { %vm9520_vm13 = vcmp.le.f32.partialorder %v11526_v30, 0.7853982  ;;  %v11399_v30 = vxor.u32 2147483648, %v9509_v6  ;;  %v2362_v11 = vand.u32 2147483647, %v2361_v4  ;;  %v2364_v48 = vcvt.s32.f32 %v2357_v33  ;;  %7126 = vmatmul.mubr.msk.f32.gmra.mrb[8].mxu0 %vm4050_vm12, %v9532_v57  ;;  %7134 = vmatmul.mubr.msk.f32.gmra.mrb[8].mxu1 %vm4050_vm12, %v9532_v57 }
 0x205   : > { %v9539_v3 = vsub.s32 %v1198_v43, %v1201_v51  ;;  %v2007_v13 = vsel %vm2005_vm7, %v1995_v34, 2102212464  ;;  %vm2003_vm14 = vcmp.lt.s32.totalorder %v9464_v47, 2  ;;  %vm2004_vm11 = vcmp.lt.s32.totalorder %v9464_v47, 3  ;;  %4169 = vmatprep.mubr.f32.mxu0 %v11522_v0  ;;  %4282 = vmatprep.mubr.f32.mxu1 %v11522_v0 }
 0x206   : > { %v2010_v56 = vsel %vm2002_vm10, %v1989_v26, %v1992_v41  ;;  %v2011_v18 = vsel %vm2005_vm7, %v1998_v22, 920167782  ;;  %v2365_v9 = vmul.f32 %v2364_v48, %v2362_v11  ;;  %v2006_v25 = vsel %vm2002_vm10, %v1986_v10, %v1989_v26 }
 0x207   : > { %v1204_v43 = vsub.s32 0, %v9539_v3  ;;  %v2008_v40 = vsel %vm2004_vm11, %v1992_v41, %v2007_v13  ;;  %vm1140_vm15 = vcmp.lt.s32.totalorder %v11494_v46, 0  ;;  %v2012_v7 = vsel %vm2004_vm11, %v1995_v34, %v2011_v18 }
 0x208   : > { %v2014_v26 = vsel %vm2002_vm10, %v1992_v41, %v1995_v34  ;;  %v2015_v10 = vsel %vm2005_vm7, %v2001_v54, 1326507024  ;;  %v2018_v63 = vshll.u32 %v1978_v12, 8  ;;  %v2366_v33 = vxor.u32 2147483648, %v2365_v9  ;;  %7127 = vmatmul.mubr.msk.f32.gmra.mrb[10].mxu0 %vm4050_vm12, %v9562_v31  ;;  %7135 = vmatmul.mubr.msk.f32.gmra.mrb[10].mxu1 %vm4050_vm12, %v9562_v31 }
 0x209   : > { %v7011_v4 = vmin.u32 %v1204_v43, %v9539_v3  ;;  %v2013_v51 = vsel %vm2003_vm14, %v2010_v56, %v2012_v7  ;;  %v2016_v11 = vsel %vm2004_vm11, %v1998_v22, %v2015_v10  ;;  %vm3205_vm2 = vcmp.eq.s32.totalorder %v9452_v39, 2  ;;  %4175 = vmatprep.mubr.f32.mxu0 %v11522_v0  ;;  %v9597_v22 = vld [vmem:[%s11348_s3 + $0x30] sm:$0xff]  ;;  %4288 = vmatprep.mubr.f32.mxu1 %v11522_v0 }
 0x20a   : > { %v2017_v34 = vsel %vm2003_vm14, %v2014_v26, %v2016_v11  ;;  %v9580_v41 = vmul.u32.u64.low %v2018_v63, %v2013_v51  ;;  %v9581_v48 = vmul.u32.u64.high %v2018_v63, %v2013_v51, %v9580_v41  ;;  %v2367_v12 = vsel %vm2284_vm6, %v2366_v33, %v2365_v9  ;;  %11530 = vst [vmem:[#allocation20_spill] sm:$0xff] %v9597_v22 }
 0x20b   : > { %v1206_v54 = vclz %v7011_v4  ;;  %v9588_v13 = vmul.u32.u64.low %v2018_v63, %v2017_v34  ;;  %v9589_v56 = vmul.u32.u64.high %v2018_v63, %v2017_v34, %v9588_v13  ;;  %v2370_v18 = vsel %vm9520_vm13, %v8922_v55, %v2367_v12 }
 0x20c   : > { %v9605_v9 = vsel %vm9520_vm13, 0, %v9461_v37  ;;  %v3207_v43 = vsel %vm3205_vm2, %v11398_v29, %v9509_v6  ;;  %v2009_v7 = vsel %vm2003_vm14, %v2006_v25, %v2008_v40  ;;  %7584 = vcosq.f32 %v2370_v18  ;;  %7128 = vmatmul.mubr.msk.f32.gmra.mrb[12].mxu0 %vm4050_vm12, %v9597_v22  ;;  %7136 = vmatmul.mubr.msk.f32.gmra.mrb[12].mxu1 %vm4050_vm12, %v9597_v22 }
 0x20d   : > { %v3204_v26 = vsel %vm3202_vm5, %v9500_v20, %v11399_v30  ;;  %v7012_v10 = vadd.s32 4294967294, %v1206_v54  ;;  %v1224_v14 = vsub.s32 4, %v9511_v49  ;;  %7586 = vsinq.f32 %v2370_v18  ;;  %4181 = vmatprep.mubr.f32.mxu0 %v11522_v0  ;;  %4294 = vmatprep.mubr.f32.mxu1 %v11522_v0 }
 0x20e   : > { %vm3201_vm0 = vcmp.lt.s32.totalorder %v9452_v39, 2  ;;  %v2028_v37 = vadd.s32 1, %v9581_v48  ;;  %v11400_v47 = vand.u32 2147483647, %v11505_v24  ;;  %v9625_v25 = vand.u32 3, %v9605_v9  ;;  %v9635_v39 = vld [vmem:[%s11348_s3 + $0x38] sm:$0xff] }
 0x20f   : > { %vm7013_vm3 = vcmp.lt.s32.totalorder %v7012_v10, 0  ;;  %v2025_v40 = vmul.u32 %v2018_v63, %v2009_v7  ;;  %vm2027_vm4 = vc.u32 %v9589_v56, %v9580_v41  ;;  %11531 = vst [vmem:[#allocation21_spill] sm:$0xff] %v9635_v39  ;;  %v3208_v33 = vsel %vm3201_vm0, %v3204_v26, %v3207_v43 }
 0x210   : > { %v1194_v4 = vadd.s32 %v9423_v36, %v9408_v28  ;;  %v1209_v51 = vsel %vm7013_vm3, 0, %v7012_v10  ;;  %v2029_v63 = vsel %vm2027_vm4, %v2028_v37, %v9581_v48  ;;  %v1225_v12 = vsel %vm1140_vm15, %v1224_v14, %v9511_v49  ;;  %7129 = vmatmul.mubr.msk.f32.gmra.mrb[14].mxu0 %vm4050_vm12, %v9635_v39  ;;  %7137 = vmatmul.mubr.msk.f32.gmra.mrb[14].mxu1 %vm4050_vm12, %v9635_v39 }
 0x211   : > { %v1210_v11 = vsub.s32 32, %v1209_v51  ;;  %v1214_v34 = vsub.s32 4294967266, %v1209_v51  ;;  %v2030_v54 = vadd.s32 %v2029_v63, %v2025_v40  ;;  %vm1542_vm6 = vweird.f32 %v8913_v44  ;;  %4365 = vmatprep.mubr.f32.mxu0 %v11522_v0  ;;  %4478 = vmatprep.mubr.f32.mxu1 %v11522_v0 }
 0x212   : > { %v11532_v13 = vand.u32 2147483647, %v11494_v46  ;;  %v9653_v28 = vand.u32 8388607, %v11400_v47  ;;  %v1361_v36 = vsub.s32 32, %v9438_v21  ;;  %vm4025_vm13 = vcmp.lt.s32.totalorder %v9625_v25, 2 }
 0x213   : > { %v1211_v49 = vshll.u32 %v9539_v3, %v1209_v51  ;;  %v1212_v48 = vshrl.u32 %v1194_v4, %v1210_v11  ;;  %v1215_v43 = vadd.s32 127, %v1214_v34  ;;  %v2031_v7 = vadd.s32 536870912, %v2030_v54 }
 0x214   : > { %vm9647_vm8 = vcmp.le.f32.partialorder %v11532_v13, 0.7853982  ;;  %vm2374_vm5 = vweird.f32 %v8922_v55  ;;  %v3209_v26 = vsel %vm1542_vm6, nan, %v3208_v33  ;;  %vm4026_vm10 = vcmp.eq.s32.totalorder %v9625_v25, 0 }
 0x215   : > { %vm4029_vm7 = vcmp.eq.s32.totalorder %v9625_v25, 2  ;;  %v9670_v3 = vsel %vm9647_vm8, 0, %v1225_v12  ;;  %v1213_v10 = vor.u32 %v1212_v48, %v1211_v49  ;;  %v1216_v14 = vshll.u32 %v1215_v43, 23 }
 0x216   : > { %v9673_v37 = vshrl.u32 %v2031_v7, 30  ;;  %v9676_v40 = vshrl.u32 %v9421_v50, 5  ;;  %v1354_v4 = vor.u32 8388608, %v9653_v28  ;;  %v1363_v33 = vshll.u32 %v11464_v1, %v9438_v21  ;;  %v9684_v11 = vpop.eup %7584 }
 0x217   : > { %v1364_v51 = vshrl.u32 %v11465_v32, %v1361_v36  ;;  %v1366_v63 = vshll.u32 %v11465_v32, %v9438_v21  ;;  %v1217_v34 = vor.u32 4788187, %v1216_v14  ;;  %v1367_v13 = vshrl.u32 %v11466_v8, %v1361_v36  ;;  %v9690_v49 = vpop.eup %7586 }
 0x218   : > { %v2033_v12 = vshll.u32 %v9673_v37, 30  ;;  %v1369_v50 = vshll.u32 %v11466_v8, %v9438_v21  ;;  %v11410_v28 = vxor.u32 2147483648, %v9684_v11  ;;  %v1362_v48 = vshrl.u32 %v11464_v1, %v1361_v36 }
 0x219   : > { %v1370_v43 = vshrl.u32 %v11467_v59, %v1361_v36  ;;  %v1373_v7 = vshrl.u32 %v11468_v62, %v1361_v36  ;;  %v11413_v29 = vxor.u32 2147483648, %v9690_v49  ;;  %v1218_v14 = vand.u32 2147483647, %v1217_v34 }
 0x21a   : > { %v1220_v30 = vcvt.s32.f32 %v1213_v10  ;;  %v9697_v47 = vsub.s32 %v2030_v54, %v2033_v12  ;;  %v4031_v44 = vsel %vm4029_vm7, %v11410_v28, %v9690_v49  ;;  %v1365_v20 = vor.u32 %v1364_v51, %v1363_v33 }
 0x21b   : > { %v1372_v6 = vshll.u32 %v11467_v59, %v9438_v21  ;;  %v1376_v39 = vshrl.u32 %v11485_v61, %v1361_v36  ;;  %v4028_v10 = vsel %vm4026_vm10, %v9684_v11, %v11413_v29  ;;  %v1368_v12 = vor.u32 %v1367_v13, %v1366_v63 }
 0x21c   : > { %v1221_v54 = vmul.f32 %v1220_v30, %v1218_v14  ;;  %v2036_v34 = vsub.s32 0, %v9697_v47  ;;  %v4032_v22 = vsel %vm4025_vm13, %v4028_v10, %v4031_v44  ;;  %vm1972_vm14 = vcmp.lt.s32.totalorder %v11493_v23, 0 }
 0x21d   : > { %v1371_v33 = vor.u32 %v1370_v43, %v1369_v50  ;;  %v1374_v51 = vor.u32 %v1373_v7, %v1372_v6  ;;  %v1375_v36 = vshll.u32 %v11468_v62, %v9438_v21  ;;  %v4033_v28 = vsel %vm2374_vm5, nan, %v4032_v22 }
 0x21e   : > { %v1222_v31 = vxor.u32 2147483648, %v1221_v54  ;;  %v7043_v29 = vmin.u32 %v2036_v34, %v9697_v47  ;;  %v2056_v30 = vsub.s32 4, %v9673_v37  ;;  %v7240_v14 = vpack.c.bf16 %v4033_v28, %v3209_v26 }
 0x21f   : > { %v1377_v63 = vor.u32 %v1376_v39, %v1375_v36  ;;  %vm1378_vm11 = vcmp.lt.s32.totalorder %v9676_v40, 1  ;;  %vm1379_vm2 = vcmp.lt.s32.totalorder %v9676_v40, 2  ;;  %v11535_v6 = vand.u32 2147483647, %v11493_v23 }
 0x220   : > { %v1223_v44 = vsel %vm1140_vm15, %v1222_v31, %v1221_v54  ;;  %v2038_v22 = vclz %v7043_v29  ;;  %vm1381_vm3 = vcmp.lt.s32.totalorder %v9676_v40, 4  ;;  %v1386_v25 = vsel %vm1378_vm11, %v1365_v20, %v1368_v12  ;;  %7241 = vmatprep.subr.bf16.mxu1 %v7240_v14 }
 0x221   : > { %vm9728_vm0 = vcmp.le.f32.partialorder %v11535_v6, 0.7853982  ;;  %v1226_v39 = vsel %vm9647_vm8, %v11494_v46, %v1223_v44  ;;  %vm1380_vm4 = vcmp.lt.s32.totalorder %v9676_v40, 3  ;;  %v1383_v31 = vsel %vm1381_vm3, %v1371_v33, 2102212464 }
 0x222   : > { %v1387_v26 = vsel %vm1381_vm3, %v1374_v51, 920167782  ;;  %7588 = vcosq.f32 %v1226_v39  ;;  %v7044_v13 = vadd.s32 4294967294, %v2038_v22  ;;  %v1390_v29 = vsel %vm1378_vm11, %v1368_v12, %v1371_v33 }
 0x223   : > { %v1388_v50 = vsel %vm1380_vm4, %v1371_v33, %v1387_v26  ;;  %v2026_v28 = vadd.s32 %v9580_v41, %v9589_v56  ;;  %v1391_v7 = vsel %vm1381_vm3, %v1377_v63, 1326507024  ;;  %v1394_v10 = vshll.u32 %v1354_v4, 8 }
 0x224   : > { %v1389_v43 = vsel %vm1379_vm2, %v1386_v25, %v1388_v50  ;;  %vm7045_vm15 = vcmp.lt.s32.totalorder %v7044_v13, 0  ;;  %v1382_v18 = vsel %vm1378_vm11, %v1362_v48, %v1365_v20  ;;  %v1384_v54 = vsel %vm1380_vm4, %v1368_v12, %v1383_v31 }
 0x225   : > { %v1392_v34 = vsel %vm1380_vm4, %v1374_v51, %v1391_v7  ;;  %v2041_v36 = vsel %vm7045_vm15, 0, %v7044_v13  ;;  %v9749_v44 = vmul.u32.u64.low %v1394_v10, %v1389_v43  ;;  %v9750_v33 = vmul.u32.u64.high %v1394_v10, %v1389_v43, %v9749_v44 }
 0x226   : > { %v1393_v14 = vsel %vm1379_vm2, %v1390_v29, %v1392_v34  ;;  %7590 = vsinq.f32 %v1226_v39  ;;  %v2042_v41 = vsub.s32 32, %v2041_v36  ;;  %v2046_v56 = vsub.s32 4294967266, %v2041_v36 }
 0x227   : > { %v2057_v4 = vsel %vm1972_vm14, %v2056_v30, %v9673_v37  ;;  %v9757_v63 = vand.u32 3, %v9670_v3  ;;  %v1385_v20 = vsel %vm1379_vm2, %v1382_v18, %v1384_v54  ;;  %v2043_v51 = vshll.u32 %v9697_v47, %v2041_v36 }
 0x228   : > { %v9761_v48 = vmul.u32.u64.low %v1394_v10, %v1393_v14  ;;  %v9762_v12 = vmul.u32.u64.high %v1394_v10, %v1393_v14, %v9761_v48  ;;  %v2044_v6 = vshrl.u32 %v2026_v28, %v2042_v41  ;;  %v2047_v22 = vadd.s32 127, %v2046_v56 }
 0x229   : > { %v2178_v25 = vand.u32 2147483647, %v11504_v60  ;;  %v9768_v39 = vsel %vm9728_vm0, 0, %v2057_v4  ;;  %v1404_v37 = vadd.s32 1, %v9750_v33  ;;  %v2193_v30 = vsub.s32 32, %v9432_v2 }
 0x22a   : > { %v2045_v31 = vor.u32 %v2044_v6, %v2043_v51  ;;  %v2048_v40 = vshll.u32 %v2047_v22, 23  ;;  %vm2896_vm8 = vcmp.eq.s32.totalorder %v9757_v63, 2  ;;  %v1401_v26 = vmul.u32 %v1394_v10, %v1385_v20 }
 0x22b   : > { %vm1403_vm13 = vc.u32 %v9762_v12, %v9749_v44  ;;  %v9778_v50 = vand.u32 3, %v9768_v39  ;;  %v2185_v28 = vand.u32 8388607, %v2178_v25  ;;  %v9784_v7 = vshrl.u32 %v9236_v58, 5 }
 0x22c   : > { %v9775_v47 = vpop.eup %7588  ;;  %v2049_v13 = vor.u32 4788187, %v2048_v40  ;;  %v1405_v29 = vsel %vm1403_vm13, %v1404_v37, %v9750_v33  ;;  %v2196_v10 = vshrl.u32 %v11465_v32, %v2193_v30  ;;  %v2199_v18 = vshrl.u32 %v11466_v8, %v2193_v30 }
 0x22d   : > { %v1406_v43 = vadd.s32 %v1405_v29, %v1401_v26  ;;  %v2052_v34 = vcvt.s32.f32 %v2045_v31  ;;  %v2195_v36 = vshll.u32 %v11464_v1, %v9432_v2  ;;  %v2202_v14 = vshrl.u32 %v11467_v59, %v2193_v30 }
 0x22e   : > { %v2050_v54 = vand.u32 2147483647, %v2049_v13  ;;  %v1238_v33 = vxor.u32 2147483648, %v9775_v47  ;;  %vm2893_vm10 = vcmp.eq.s32.totalorder %v9757_v63, 0  ;;  %v2198_v58 = vshll.u32 %v11465_v32, %v9432_v2 }
 0x22f   : > { %v1407_v41 = vadd.s32 536870912, %v1406_v43  ;;  %v2205_v56 = vshrl.u32 %v11468_v62, %v2193_v30  ;;  %v2201_v48 = vshll.u32 %v11466_v8, %v9432_v2  ;;  %v2204_v51 = vshll.u32 %v11467_v59, %v9432_v2 }
 0x230   : > { %v9796_v4 = vpop.eup %7590  ;;  %v2053_v20 = vmul.f32 %v2052_v34, %v2050_v54  ;;  %v2208_v6 = vshrl.u32 %v11485_v61, %v2193_v30  ;;  %v2186_v37 = vor.u32 8388608, %v2185_v28  ;;  %v2197_v31 = vor.u32 %v2196_v10, %v2195_v36 }
 0x231   : > { %v9803_v22 = vshrl.u32 %v1407_v41, 30  ;;  %v2200_v40 = vor.u32 %v2199_v18, %v2198_v58  ;;  %v2203_v32 = vor.u32 %v2202_v14, %v2201_v48  ;;  %v2206_v13 = vor.u32 %v2205_v56, %v2204_v51 }
 0x232   : > { %v2054_v26 = vxor.u32 2147483648, %v2053_v20  ;;  %v2207_v29 = vshll.u32 %v11468_v62, %v9432_v2  ;;  %v1235_v54 = vxor.u32 2147483648, %v9796_v4  ;;  %v2898_v8 = vsel %vm2896_vm8, %v1238_v33, %v9796_v4 }
 0x233   : > { %v1409_v59 = vshll.u32 %v9803_v22, 30  ;;  %v2194_v61 = vshrl.u32 %v11464_v1, %v2193_v30  ;;  %vm2210_vm7 = vcmp.lt.s32.totalorder %v9784_v7, 1  ;;  %vm2211_vm11 = vcmp.lt.s32.totalorder %v9784_v7, 2 }
 0x234   : > { %v2055_v28 = vsel %vm1972_vm14, %v2054_v26, %v2053_v20  ;;  %v2209_v10 = vor.u32 %v2208_v6, %v2207_v29  ;;  %vm2213_vm2 = vcmp.lt.s32.totalorder %v9784_v7, 4  ;;  %v2218_v18 = vsel %vm2210_vm7, %v2197_v31, %v2200_v40 }
 0x235   : > { %v2058_v62 = vsel %vm9728_vm0, %v11493_v23, %v2055_v28  ;;  %v9822_v2 = vsub.s32 %v1406_v43, %v1409_v59  ;;  %vm2212_vm3 = vcmp.lt.s32.totalorder %v9784_v7, 3  ;;  %v2215_v1 = vsel %vm2213_vm2, %v2203_v32, 2102212464 }
 0x236   : > { %7592 = vcosq.f32 %v2058_v62  ;;  %v2219_v30 = vsel %vm2213_vm2, %v2206_v13, 920167782  ;;  %v2222_v21 = vsel %vm2210_vm7, %v2200_v40, %v2203_v32  ;;  %v2895_v43 = vsel %vm2893_vm10, %v9775_v47, %v1235_v54 }
 0x237   : > { %7594 = vsinq.f32 %v2058_v62  ;;  %v1412_v34 = vsub.s32 0, %v9822_v2  ;;  %v2220_v36 = vsel %vm2212_vm3, %v2203_v32, %v2219_v30  ;;  %v2223_v41 = vsel %vm2213_vm2, %v2209_v10, 1326507024 }
 0x238   : > { %v2221_v14 = vsel %vm2211_vm11, %v2218_v18, %v2220_v36  ;;  %v2226_v58 = vshll.u32 %v2186_v37, 8  ;;  %v2214_v20 = vsel %vm2210_vm7, %v2194_v61, %v2197_v31  ;;  %v2224_v48 = vsel %vm2212_vm3, %v2206_v13, %v2223_v41 }
 0x239   : > { %v7019_v56 = vmin.u32 %v1412_v34, %v9822_v2  ;;  %v7244_v51 = vpack.c.bf16 %v8401_v16, %v8313_v5  ;;  %v2216_v6 = vsel %vm2212_vm3, %v2200_v40, %v2215_v1  ;;  %v2225_v26 = vsel %vm2211_vm11, %v2222_v21, %v2224_v48 }
 0x23a   : > { %v9845_v32 = vmul.u32.u64.low %v2226_v58, %v2221_v14  ;;  %v9846_v29 = vmul.u32.u64.high %v2226_v58, %v2221_v14, %v9845_v32  ;;  %v9849_v28 = vmul.u32.u64.low %v2226_v58, %v2225_v26  ;;  %v9850_v37 = vmul.u32.u64.high %v2226_v58, %v2225_v26, %v9849_v28 }
 0x23b   : > { %v1414_v59 = vclz %v7019_v56  ;;  %vm1230_vm14 = vweird.f32 %v11494_v46  ;;  %vm2892_vm0 = vcmp.lt.s32.totalorder %v9757_v63, 2  ;;  %v7248_v31 = vpack.c.bf16 %v8642_v52, %v8491_v35  ;;  %v7653_v35 = vld [vmem:[%s11348_s3 + $0x8] sm:$0xff]  ;;  %v10173_v52 = vld [vmem:[%s11347_s2 + $0x30] sm:$0xff] }
 0x23c   : > { %v1335_v40 = vadd.s32 3, %v9138_v15  ;;  %vm2062_vm4 = vweird.f32 %v11493_v23  ;;  %v2899_v13 = vsel %vm2892_vm0, %v2895_v43, %v2898_v8  ;;  %v2217_v10 = vsel %vm2211_vm11, %v2214_v20, %v2216_v6 }
 0x23d   : > { %v7020_v61 = vadd.s32 4294967294, %v1414_v59  ;;  %v2167_v62 = vadd.s32 3, %v9224_v38  ;;  %vm3716_vm15 = vcmp.lt.s32.totalorder %v9778_v50, 2  ;;  %vm3717_vm8 = vcmp.eq.s32.totalorder %v9778_v50, 0 }
 0x23e   : > { %v2236_v63 = vadd.s32 1, %v9846_v29  ;;  %v1336_v18 = vand.u32 3, %v1335_v40  ;;  %vm3720_vm13 = vcmp.eq.s32.totalorder %v9778_v50, 2  ;;  %v1402_v15 = vadd.s32 %v9749_v44, %v9762_v12 }
 0x23f   : > { %vm7021_vm10 = vcmp.lt.s32.totalorder %v7020_v61, 0  ;;  %vm2235_vm7 = vc.u32 %v9850_v37, %v9845_v32  ;;  %v2900_v38 = vsel %vm1230_vm14, nan, %v2899_v13  ;;  %v2233_v1 = vmul.u32 %v2226_v58, %v2217_v10 }
 0x240   : > { %v9869_v7 = vpop.eup %7592  ;;  %v1417_v8 = vsel %vm7021_vm10, 0, %v7020_v61  ;;  %v2237_v30 = vsel %vm2235_vm7, %v2236_v63, %v9846_v29  ;;  %v2168_v44 = vand.u32 3, %v2167_v62  ;;  %vm1338_vm11 = vcmp.eq.s32.totalorder %v1336_v18, 0 }
 0x241   : > { %v9874_v34 = vpop.eup %7594  ;;  %v2070_v36 = vxor.u32 2147483648, %v9869_v7  ;;  %v1418_v21 = vsub.s32 32, %v1417_v8  ;;  %v1422_v43 = vsub.s32 4294967266, %v1417_v8  ;;  %v2238_v14 = vadd.s32 %v2237_v30, %v2233_v1 }
 0x242   : > { %v2067_v12 = vxor.u32 2147483648, %v9874_v34  ;;  %vm1341_vm2 = vcmp.eq.s32.totalorder %v1336_v18, 2  ;;  %v11538_v56 = vxor.u32 2147483648, %v9245_v42  ;;  %v11539_v48 = vxor.u32 2147483648, %v9242_v27 }
 0x243   : > { %v3722_v41 = vsel %vm3720_vm13, %v2070_v36, %v9874_v34  ;;  %v1423_v58 = vadd.s32 127, %v1422_v43  ;;  %v1420_v29 = vshrl.u32 %v1402_v15, %v1418_v21  ;;  %v2239_v59 = vadd.s32 536870912, %v2238_v14 }
 0x244   : > { %v1340_v20 = vsel %vm1338_vm11, %v9242_v27, %v11538_v56  ;;  %v1343_v6 = vsel %vm1341_vm2, %v11539_v48, %v9245_v42  ;;  %v3719_v26 = vsel %vm3717_vm8, %v9869_v7, %v2067_v12  ;;  %v2375_v28 = vadd.s32 3, %v9605_v9 }
 0x245   : > { %v3723_v40 = vsel %vm3716_vm15, %v3719_v26, %v3722_v41  ;;  %v1419_v13 = vshll.u32 %v9822_v2, %v1417_v8  ;;  %v1424_v61 = vshll.u32 %v1423_v58, 23  ;;  %vm1337_vm3 = vcmp.lt.s32.totalorder %v1336_v18, 2 }
 0x246   : > { %v3724_v27 = vsel %vm2062_vm4, nan, %v3723_v40  ;;  %v9900_v42 = vshrl.u32 %v2239_v59, 30  ;;  %v1344_v10 = vsel %vm1337_vm3, %v1340_v20, %v1343_v6  ;;  %vm2170_vm0 = vcmp.eq.s32.totalorder %v2168_v44, 0  ;;  %v11548_v59 = vld [vmem:[#allocation12_spill] sm:$0xff] }
 0x247   : > { %v7238_v62 = vpack.c.bf16 %v3724_v27, %v2900_v38  ;;  %v1425_v63 = vor.u32 4788187, %v1424_v61  ;;  %v11540_v15 = vxor.u32 2147483648, %v9324_v45  ;;  %vm2173_vm8 = vcmp.eq.s32.totalorder %v2168_v44, 2  ;;  %v11549_v27 = vld [vmem:[#allocation11_spill] sm:$0xff] }
 0x248   : > { %v1421_v50 = vor.u32 %v1420_v29, %v1419_v13  ;;  %v2241_v1 = vshll.u32 %v9900_v42, 30  ;;  %vm2169_vm15 = vcmp.lt.s32.totalorder %v2168_v44, 2  ;;  %v11541_v2 = vxor.u32 2147483648, %v9314_v19 }
 0x249   : > { %v2172_v9 = vsel %vm2170_vm0, %v9314_v19, %v11540_v15  ;;  %7239 = vmatpush1.bf16.msra.mxu0 %v7238_v62  ;;  %v1345_v8 = vsel %vm1334_vm1, nan, %v1344_v10  ;;  %v1426_v38 = vand.u32 2147483647, %v1425_v63  ;;  %v2376_v58 = vand.u32 3, %v2375_v28  ;;  %v9919_v19 = vld [vmem:[%s11348_s3] sm:$0xff] }
 0x24a   : > { %v2175_v18 = vsel %vm2173_vm8, %v11541_v2, %v9324_v45  ;;  %v2242_v21 = vsub.s32 %v2238_v14, %v2241_v1  ;;  %7245 = vmatprep.subr.bf16.mxu0 %v7244_v51  ;;  %v1428_v44 = vcvt.s32.f32 %v1421_v50  ;;  %v11543_v45 = vld [vmem:[#allocation7_spill] sm:$0xff]  ;;  %v11544_v14 = vld [vmem:[#allocation13_spill] sm:$0xff]  ;;  %v11546_v51 = vxor.u32 2147483648, %v9690_v49 }
 0x24b   : > { %v2176_v30 = vsel %vm2169_vm15, %v2172_v9, %v2175_v18  ;;  %v11545_v20 = vpack.c.bf16 %v11543_v45, %v11544_v14  ;;  %vm2378_vm1 = vcmp.eq.s32.totalorder %v2376_v58, 0  ;;  %vm2377_vm13 = vcmp.lt.s32.totalorder %v2376_v58, 2  ;;  %v5009_v45 = vld [vmem:[%s11349_s4 + $0x30] sm:$0xff]  ;;  %v5338_v9 = vld [vmem:[%s11351_s6 + $0x18] sm:$0xff] }
 0x24c   : > { %v2177_v41 = vsel %vm2166_vm9, nan, %v2176_v30  ;;  %v2244_v56 = vsub.s32 0, %v2242_v21  ;;  %7138 = vmatmul.mubr.msk.f32.vlgmr.msra.gmra.mrb[16].mxu0 %vm4050_vm12, %v9919_v19  ;;  %v1429_v5 = vmul.f32 %v1428_v44, %v1426_v38  ;;  %v2380_v48 = vsel %vm2378_vm1, %v9684_v11, %v11546_v51 }
 0x24d   : > { %v7252_v53 = vpack.c.bf16 %v2177_v41, %v1345_v8  ;;  %7247 = vmatpush1.bf16.msra.mxu0 %v11545_v20  ;;  %4371 = vmatprep.mubr.f32.mxu0 %v11522_v0  ;;  %vm2381_vm9 = vcmp.eq.s32.totalorder %v2376_v58, 2  ;;  %v11547_v26 = vxor.u32 2147483648, %v9684_v11  ;;  %v5003_v11 = vld [vmem:[%s11349_s4] sm:$0xff]  ;;  %vm1348_vm7 = vcmp.lt.s32.totalorder %v11505_v24, 0 }
 0x24e   : > { %v7051_v16 = vmin.u32 %v2244_v56, %v2242_v21  ;;  %v1430_v40 = vxor.u32 2147483648, %v1429_v5  ;;  %5013 = vperm.xlu1 %7538, %v5003_v11   ;;  %v2234_v55 = vadd.s32 %v9845_v32, %v9850_v37  ;;  %v11550_v15 = vand.u32 2147483647, %v11505_v24  ;;  %v5005_v32 = vld [vmem:[%s11349_s4 + $0x10] sm:$0xff]  ;;  %v5004_v37 = vld [vmem:[%s11349_s4 + $0x8] sm:$0xff]  ;;  %v11553_v20 = vld [vmem:[#allocation19_spill] sm:$0xff] }
 0x24f   : > { %7253 = vmatprep.subr.bf16.mxu0 %v7252_v53  ;;  %v2383_v29 = vsel %vm2381_vm9, %v11547_v26, %v9690_v49  ;;  %v1231_v18 = vadd.s32 3, %v9670_v3  ;;  %v2063_v30 = vadd.s32 3, %v9768_v39  ;;  %v5006_v3 = vld [vmem:[%s11349_s4 + $0x18] sm:$0xff]  ;;  %5018 = vperm.xlu0 %7539, %v5004_v37   ;;  %v5008_v56 = vld [vmem:[%s11349_s4 + $0x28] sm:$0xff]  ;;  %v1432_v53 = vsub.s32 4, %v9803_v22 }
 0x250   : > { %v2246_v6 = vclz %v7051_v16  ;;  %7139 = vmatmul.mubr.msk.f32.gmra.mrb[18].mxu0 %vm4050_vm12, %v11548_v59  ;;  %v2384_v28 = vsel %vm2377_vm13, %v2380_v48, %v2383_v29  ;;  %v1431_v10 = vsel %vm1348_vm7, %v1430_v40, %v1429_v5  ;;  %vm10010_vm8 = vcmp.le.f32.partialorder %v2178_v25, 0.7853982  ;;  %v5336_v59 = vld [vmem:[%s11351_s6 + $0x8] sm:$0xff]  ;;  %v5337_v40 = vld [vmem:[%s11351_s6 + $0x10] sm:$0xff] }
 0x251   : > { %4377 = vmatprep.mubr.f32.mxu0 %v11522_v0  ;;  %v9938_v61 = vsel %vm2374_vm5, nan, %v2384_v28  ;;  %vm9953_vm5 = vcmp.le.f32.partialorder %v11550_v15, 0.7853982  ;;  %v1232_v41 = vand.u32 3, %v1231_v18  ;;  %v2064_v39 = vand.u32 3, %v2063_v30  ;;  %v5950_v30 = vld [vmem:[%s11353_s8 + $0x10] sm:$0xff] }
 0x252   : > { %v7052_v13 = vadd.s32 4294967294, %v2246_v6  ;;  %v1434_v8 = vsel %vm9953_vm5, %v11505_v24, %v1431_v10  ;;  %5023 = vperm.xlu1 %7538, %v5005_v32   ;;  %v1433_v26 = vsel %vm1348_vm7, %v1432_v53, %v9803_v22  ;;  %vm2180_vm15 = vcmp.lt.s32.totalorder %v11504_v60, 0 }
 0x253   : > { %7596 = vcosq.f32 %v1434_v8  ;;  %vm1234_vm11 = vcmp.eq.s32.totalorder %v1232_v41, 0  ;;  %vm1237_vm2 = vcmp.eq.s32.totalorder %v1232_v41, 2  ;;  %vm2066_vm3 = vcmp.eq.s32.totalorder %v2064_v39, 0 }
 0x254   : > { %vm7053_vm10 = vcmp.lt.s32.totalorder %v7052_v13, 0  ;;  %7140 = vmatmul.mubr.msk.f32.gmra.mrb[20].mxu0 %vm4050_vm12, %v11549_v27  ;;  %7598 = vsinq.f32 %v1434_v8  ;;  %v1236_v5 = vsel %vm1234_vm11, %v9775_v47, %v1235_v54  ;;  %vm2069_vm0 = vcmp.eq.s32.totalorder %v2064_v39, 2  ;;  %v5010_v54 = vld [vmem:[%s11349_s4 + $0x38] sm:$0xff]  ;;  %v11557_v27 = vld [vmem:[#allocation21_spill] sm:$0xff] }
 0x255   : > { %v2249_v49 = vsel %vm7053_vm10, 0, %v7052_v13  ;;  %4383 = vmatprep.mubr.f32.mxu0 %v11522_v0  ;;  %v1239_v51 = vsel %vm1237_vm2, %v1238_v33, %v9796_v4  ;;  %v2068_v48 = vsel %vm2066_vm3, %v9869_v7, %v2067_v12  ;;  %v2071_v6 = vsel %vm2069_vm0, %v2070_v36, %v9874_v34  ;;  %v5335_v33 = vld [vmem:[%s11351_s6] sm:$0xff]  ;;  %v5949_v8 = vld [vmem:[%s11353_s8 + $0x8] sm:$0xff] }
 0x256   : > { %v2250_v62 = vsub.s32 32, %v2249_v49  ;;  %v2254_v63 = vsub.s32 4294967266, %v2249_v49  ;;  %v2251_v50 = vshll.u32 %v2242_v21, %v2249_v49  ;;  %v5007_v21 = vld [vmem:[%s11349_s4 + $0x20] sm:$0xff]  ;;  %5028 = vperm.xlu1 %7538, %v5006_v3   ;;  %v2264_v7 = vsub.s32 4, %v9900_v42 }
 0x257   : > { %5033 = vperm.xlu0 %7539, %v5007_v21   ;;  %v11556_v34 = vld [vmem:[#allocation20_spill] sm:$0xff]  ;;  %vm1233_vm1 = vcmp.lt.s32.totalorder %v1232_v41, 2  ;;  %vm2065_vm9 = vcmp.lt.s32.totalorder %v2064_v39, 2  ;;  %v10031_v29 = vsel %vm9953_vm5, 0, %v1433_v26  ;;  %vm1438_vm10 = vweird.f32 %v11505_v24 }
 0x258   : > { %v2252_v1 = vshrl.u32 %v2234_v55, %v2250_v62  ;;  %v2255_v2 = vadd.s32 127, %v2254_v63  ;;  %7141 = vmatmul.mubr.msk.f32.gmra.mrb[22].mxu0 %vm4050_vm12, %v9498_v17  ;;  %v1240_v22 = vsel %vm1233_vm1, %v1236_v5, %v1239_v51  ;;  %v2072_v36 = vsel %vm2065_vm9, %v2068_v48, %v2071_v6  ;;  %v10055_v55 = vld [vmem:[%s11347_s2] sm:$0xff]  ;;  %v11558_v63 = vld [vmem:[#allocation9_spill] sm:$0xff]  ;;  %v5951_v5 = vld [vmem:[%s11353_s8 + $0x18] sm:$0xff] }
 0x259   : > { %4389 = vmatprep.mubr.f32.mxu0 %v11522_v0  ;;  %v2265_v13 = vsel %vm2180_vm15, %v2264_v7, %v9900_v42  ;;  %v1241_v11 = vsel %vm1230_vm14, nan, %v1240_v22  ;;  %v2073_v49 = vsel %vm2062_vm4, nan, %v2072_v36  ;;  %v3097_v10 = vand.u32 3, %v10031_v29  ;;  %v11564_v36 = vld [vmem:[#allocation10_spill] sm:$0xff] }
 0x25a   : > { %v2253_v17 = vor.u32 %v2252_v1, %v2251_v50  ;;  %v2256_v38 = vshll.u32 %v2255_v2, 23  ;;  %5038 = vperm.xlu1 %7538, %v5008_v56   ;;  %v1543_v46 = vadd.s32 3, %v11558_v63  ;;  %v10062_v23 = vsel %vm10010_vm8, 0, %v2265_v13  ;;  %v5948_v50 = vld [vmem:[%s11353_s8] sm:$0xff]  ;;  %v10076_v1 = vld [vmem:[%s11347_s2 + $0x8] sm:$0xff] }
 0x25b   : > { %5043 = vperm.xlu0 %7539, %v5009_v45   ;;  %v7254_v15 = vpack.c.bf16 %v2073_v49, %v1241_v11  ;;  %vm3099_vm14 = vcmp.eq.s32.totalorder %v3097_v10, 0  ;;  %vm3102_vm4 = vcmp.eq.s32.totalorder %v3097_v10, 2  ;;  %v3921_v32 = vand.u32 3, %v10062_v23  ;;  %v11561_v56 = vld [vmem:[#allocation15_spill] sm:$0xff]  ;;  %v10159_v13 = vld [vmem:[%s11347_s2 + $0x28] sm:$0xff] }
 0x25c   : > { %v2257_v43 = vor.u32 4788187, %v2256_v38  ;;  %7142 = vmatmul.mubr.msk.f32.gmra.mrb[24].mxu0 %vm4050_vm12, %v9532_v57  ;;  %v2260_v44 = vcvt.s32.f32 %v2253_v17  ;;  %v1544_v37 = vand.u32 3, %v1543_v46  ;;  %vm3098_vm13 = vcmp.lt.s32.totalorder %v3097_v10, 2 }
 0x25d   : > { %4395 = vmatprep.mubr.f32.mxu0 %v11522_v0  ;;  %v10027_v12 = vpop.eup %7596  ;;  %vm3926_vm7 = vcmp.eq.s32.totalorder %v3921_v32, 2  ;;  %vm3923_vm2 = vcmp.eq.s32.totalorder %v3921_v32, 0  ;;  %v11562_v45 = vxor.u32 2147483648, %v11561_v56  ;;  %vm3922_vm3 = vcmp.lt.s32.totalorder %v3921_v32, 2 }
 0x25e   : > { %v2258_v58 = vand.u32 2147483647, %v2257_v43  ;;  %5048 = vperm.xlu1 %7538, %v5010_v54   ;;  %v10036_v28 = vpop.eup %7598  ;;  %v1446_v62 = vxor.u32 2147483648, %v10027_v12  ;;  %v10103_v43 = vld [vmem:[%s11347_s2 + $0x10] sm:$0xff]  ;;  %vm1546_vm5 = vcmp.eq.s32.totalorder %v1544_v37, 0  ;;  %vm1549_vm11 = vcmp.eq.s32.totalorder %v1544_v37, 2 }
 0x25f   : > { %5341 = vperm.xlu0 %7539, %v5335_v33   ;;  %v1443_v42 = vxor.u32 2147483648, %v10036_v28  ;;  %vm2270_vm0 = vweird.f32 %v11504_v60  ;;  %v10130_v54 = vld [vmem:[%s11347_s2 + $0x18] sm:$0xff]  ;;  %v1439_v11 = vadd.s32 3, %v10031_v29  ;;  %v2271_v49 = vadd.s32 3, %v10062_v23 }
 0x260   : > { %v2261_v14 = vmul.f32 %v2260_v44, %v2258_v58  ;;  %7143 = vmatmul.mubr.msk.f32.gmra.mrb[26].mxu0 %vm4050_vm12, %v11553_v20  ;;  %v3104_v18 = vsel %vm3102_vm4, %v1446_v62, %v10036_v28  ;;  %v11559_v58 = vld [vmem:[#allocation17_spill] sm:$0xff] }
 0x261   : > { %4401 = vmatprep.mubr.f32.mxu0 %v11522_v0  ;;  %v3101_v2 = vsel %vm3099_vm14, %v10027_v12, %v1443_v42  ;;  %v11560_v44 = vxor.u32 2147483648, %v11559_v58  ;;  %v1440_v10 = vand.u32 3, %v1439_v11  ;;  %v2272_v63 = vand.u32 3, %v2271_v49 }
 0x262   : > { %v2262_v16 = vxor.u32 2147483648, %v2261_v14  ;;  %5346 = vperm.xlu1 %7538, %v5336_v59   ;;  %v3105_v21 = vsel %vm3098_vm13, %v3101_v2, %v3104_v18  ;;  %v11565_v59 = vld [vmem:[#allocation16_spill] sm:$0xff] }
 0x263   : > { %5351 = vperm.xlu0 %7539, %v5337_v40   ;;  %v1548_v53 = vsel %vm1546_vm5, %v11561_v56, %v11560_v44  ;;  %v3106_v51 = vsel %vm1438_vm10, nan, %v3105_v21  ;;  %v11566_v40 = vpack.c.bf16 %v11564_v36, %v11565_v59  ;;  %vm2274_vm1 = vcmp.eq.s32.totalorder %v2272_v63, 0 }
 0x264   : > { %v2263_v4 = vsel %vm2180_vm15, %v2262_v16, %v2261_v14  ;;  %7144 = vmatmul.mubr.msk.f32.gmra.mrb[28].mxu0 %vm4050_vm12, %v11556_v34  ;;  %v1551_v14 = vsel %vm1549_vm11, %v11562_v45, %v11559_v58  ;;  %v6557_v16 = vld [vmem:[#allocation2] sm:$0x1]  ;;  %vm1445_vm15 = vcmp.eq.s32.totalorder %v1440_v10, 2  ;;  %vm2277_vm9 = vcmp.eq.s32.totalorder %v2272_v63, 2 }
 0x265   : > { %v2266_v25 = vsel %vm10010_vm8, %v11504_v60, %v2263_v4  ;;  %4407 = vmatprep.mubr.f32.mxu0 %v11522_v0  ;;  %vm1545_vm8 = vcmp.lt.s32.totalorder %v1544_v37, 2  ;;  %v1447_v29 = vsel %vm1445_vm15, %v1446_v62, %v10036_v28  ;;  %vm1441_vm14 = vcmp.lt.s32.totalorder %v1440_v10, 2 }
 0x266   : > { %7600 = vcosq.f32 %v2266_v25  ;;  %5356 = vperm.xlu1 %7538, %v5338_v9   ;;  %v1552_v47 = vsel %vm1545_vm8, %v1548_v53, %v1551_v14  ;;  %vm2273_vm4 = vcmp.lt.s32.totalorder %v2272_v63, 2 }
 0x267   : > { %7602 = vsinq.f32 %v2266_v25  ;;  %5954 = vperm.xlu0 %7539, %v5948_v50   ;;  %v1553_v7 = vsel %vm1542_vm6, nan, %v1552_v47  ;;  %v10142_v25 = vld [vmem:[%s11347_s2 + $0x20] sm:$0xff]  ;;  %vm1442_vm6 = vcmp.eq.s32.totalorder %v1440_v10, 0 }
 0x268   : > { %7145 = vmatmul.mubr.msk.f32.gmra.mrb[30].mxu0 %vm4050_vm12, %v11557_v27  ;;  %v7256_v22 = vpack.c.bf16 %v9938_v61, %v1553_v7  ;;  %v7655_v61 = vld [vmem:[%s11348_s3 + $0x18] sm:$0xff] }
 0x269   : > { %4615 = vmatprep.mubr.f32.mxu0 %v11522_v0 }
 0x26a   : > { %5959 = vperm.xlu1 %7538, %v5949_v8  }
 0x26b   : > { %5964 = vperm.xlu0 %7539, %v5950_v30  }
 0x26c   : > { %7154 = vmatmul.mubr.msk.f32.vlgmr.msra.gmra.mrb[0].mxu0 %vm4050_vm12, %v10055_v55 }
 0x26d   : > { %7255 = vmatpush1.bf16.msra.mxu0 %v7254_v15  ;;  %4621 = vmatprep.mubr.f32.mxu0 %v11522_v0 }
 0x26e   : > { %5969 = vperm.xlu1 %7538, %v5951_v5  }
 0x26f   : > { %6560 = vperm.xlu0 %7539, %v6557_v16  }
 0x270   : > { %v10091_v17 = vpop.eup %7600  ;;  %7155 = vmatmul.mubr.msk.f32.gmra.mrb[2].mxu0 %vm4050_vm12, %v10076_v1 }
 0x271   : > { %v10095_v38 = vpop.eup %7602  ;;  %v2278_v3 = vxor.u32 2147483648, %v10091_v17  ;;  %4627 = vmatprep.mubr.f32.mxu0 %v11522_v0 }
 0x272   : > { %v2275_v41 = vxor.u32 2147483648, %v10095_v38 }
 0x273   : > { %v3928_v39 = vsel %vm3926_vm7, %v2278_v3, %v10095_v38  ;;  %v2279_v46 = vsel %vm2277_vm9, %v2278_v3, %v10095_v38 }
 0x274   : > { %v3925_v48 = vsel %vm3923_vm2, %v10091_v17, %v2275_v41  ;;  %7156 = vmatmul.mubr.msk.f32.gmra.mrb[4].mxu0 %vm4050_vm12, %v10103_v43 }
 0x275   : > { %v3929_v6 = vsel %vm3922_vm3, %v3925_v48, %v3928_v39  ;;  %4633 = vmatprep.mubr.f32.mxu0 %v11522_v0 }
 0x276   : > { %v3930_v26 = vsel %vm2270_vm0, nan, %v3929_v6 }
 0x277   : > { %v7242_v33 = vpack.c.bf16 %v3930_v26, %v3106_v51 }
 0x278   : > { %7157 = vmatmul.mubr.msk.f32.gmra.mrb[6].mxu0 %vm4050_vm12, %v10130_v54 }
 0x279   : > { %7243 = vmatpush1.bf16.msra.mxu1 %v7242_v33  ;;  %4639 = vmatprep.mubr.f32.mxu0 %v11522_v0 }
 0x27a   : > { %7249 = vmatprep.subr.bf16.mxu1 %v7248_v31  ;;  %v7654_v31 = vld [vmem:[%s11348_s3 + $0x10] sm:$0xff] }
 0x27c   : > { %7146 = vmatmul.mubr.msk.f32.vlgmr.msra.gmra.mrb[16].mxu1 %vm4050_vm12, %v9919_v19  ;;  %7158 = vmatmul.mubr.msk.f32.gmra.mrb[8].mxu0 %vm4050_vm12, %v10142_v25  ;;  %v10186_v19 = vld [vmem:[%s11347_s2 + $0x38] sm:$0xff] }
 0x27d   : > { %7251 = vmatpush1.bf16.msra.mxu1 %v11566_v40  ;;  %4484 = vmatprep.mubr.f32.mxu1 %v11522_v0 }
 0x27e   : > { %7257 = vmatprep.subr.bf16.mxu1 %v7256_v22  ;;  %4645 = vmatprep.mubr.f32.mxu0 %v11522_v0 }
 0x280   : > { %7147 = vmatmul.mubr.msk.f32.gmra.mrb[18].mxu1 %vm4050_vm12, %v7653_v35  ;;  %7159 = vmatmul.mubr.msk.f32.gmra.mrb[10].mxu0 %vm4050_vm12, %v10159_v13 }
 0x281   : > { %4490 = vmatprep.mubr.f32.mxu1 %v11522_v0  ;;  %4651 = vmatprep.mubr.f32.mxu0 %v11522_v0 }
 0x284   : > { %7148 = vmatmul.mubr.msk.f32.gmra.mrb[20].mxu1 %vm4050_vm12, %v7654_v31  ;;  %7160 = vmatmul.mubr.msk.f32.gmra.mrb[12].mxu0 %vm4050_vm12, %v10173_v52 }
 0x285   : > { %4496 = vmatprep.mubr.f32.mxu1 %v11522_v0  ;;  %4657 = vmatprep.mubr.f32.mxu0 %v11522_v0 }
 0x288   : > { %7149 = vmatmul.mubr.msk.f32.gmra.mrb[22].mxu1 %vm4050_vm12, %v7655_v61  ;;  %7161 = vmatmul.mubr.msk.f32.gmra.mrb[14].mxu0 %vm4050_vm12, %v10186_v19 }
 0x289   : > { %4502 = vmatprep.mubr.f32.mxu1 %v11522_v0  ;;  %4841 = vmatprep.mubr.f32.mxu0 %v11522_v0 }
 0x28c   : > { %7150 = vmatmul.mubr.msk.f32.gmra.mrb[24].mxu1 %vm4050_vm12, %v9532_v57  ;;  %7170 = vmatmul.mubr.msk.f32.vlgmr.msra.gmra.mrb[16].mxu0 %vm4050_vm12, %v10055_v55  ;;  %v1444_v57 = vsel %vm1442_vm6, %v10027_v12, %v1443_v42 }
 0x28d   : > { %4508 = vmatprep.mubr.f32.mxu1 %v11522_v0  ;;  %4847 = vmatprep.mubr.f32.mxu0 %v11522_v0  ;;  %v1448_v12 = vsel %vm1441_vm14, %v1444_v57, %v1447_v29 }
 0x28e   : > { %v1449_v42 = vsel %vm1438_vm10, nan, %v1448_v12 }
 0x290   : > { %7151 = vmatmul.mubr.msk.f32.gmra.mrb[26].mxu1 %vm4050_vm12, %v11553_v20  ;;  %7171 = vmatmul.mubr.msk.f32.gmra.mrb[18].mxu0 %vm4050_vm12, %v10076_v1  ;;  %v2276_v20 = vsel %vm2274_vm1, %v10091_v17, %v2275_v41 }
 0x291   : > { %4514 = vmatprep.mubr.f32.mxu1 %v11522_v0  ;;  %4853 = vmatprep.mubr.f32.mxu0 %v11522_v0  ;;  %v2280_v28 = vsel %vm2273_vm4, %v2276_v20, %v2279_v46 }
 0x294   : > { %7152 = vmatmul.mubr.msk.f32.gmra.mrb[28].mxu1 %vm4050_vm12, %v11556_v34  ;;  %7172 = vmatmul.mubr.msk.f32.gmra.mrb[20].mxu0 %vm4050_vm12, %v10103_v43  ;;  %v2281_v34 = vsel %vm2270_vm0, nan, %v2280_v28 }
 0x295   : > { %4520 = vmatprep.mubr.f32.mxu1 %v11522_v0  ;;  %4859 = vmatprep.mubr.f32.mxu0 %v11522_v0  ;;  %v7258_v62 = vpack.c.bf16 %v2281_v34, %v1449_v42 }
 0x298   : > { %7153 = vmatmul.mubr.msk.f32.gmra.mrb[30].mxu1 %vm4050_vm12, %v11557_v27  ;;  %7173 = vmatmul.mubr.msk.f32.gmra.mrb[22].mxu0 %vm4050_vm12, %v10130_v54 }
 0x299   : > { %4728 = vmatprep.mubr.f32.mxu1 %v11522_v0  ;;  %4865 = vmatprep.mubr.f32.mxu0 %v11522_v0 }
 0x29c   : > { %7162 = vmatmul.mubr.msk.f32.vlgmr.msra.gmra.mrb[0].mxu1 %vm4050_vm12, %v10055_v55  ;;  %7174 = vmatmul.mubr.msk.f32.gmra.mrb[24].mxu0 %vm4050_vm12, %v10142_v25 }
 0x29d   : > { %7259 = vmatpush1.bf16.msra.mxu1 %v7258_v62  ;;  %4734 = vmatprep.mubr.f32.mxu1 %v11522_v0 }
 0x29e   : > { %4871 = vmatprep.mubr.f32.mxu0 %v11522_v0 }
 0x2a0   : > { %7163 = vmatmul.mubr.msk.f32.gmra.mrb[2].mxu1 %vm4050_vm12, %v10076_v1  ;;  %7175 = vmatmul.mubr.msk.f32.gmra.mrb[26].mxu0 %vm4050_vm12, %v10159_v13 }
 0x2a1   : > { %4740 = vmatprep.mubr.f32.mxu1 %v11522_v0  ;;  %4877 = vmatprep.mubr.f32.mxu0 %v11522_v0 }
 0x2a4   : > { %7164 = vmatmul.mubr.msk.f32.gmra.mrb[4].mxu1 %vm4050_vm12, %v10103_v43  ;;  %7176 = vmatmul.mubr.msk.f32.gmra.mrb[28].mxu0 %vm4050_vm12, %v10173_v52 }
 0x2a5   : > { %4746 = vmatprep.mubr.f32.mxu1 %v11522_v0  ;;  %4883 = vmatprep.mubr.f32.mxu0 %v11522_v0 }
 0x2a8   : > { %7165 = vmatmul.mubr.msk.f32.gmra.mrb[6].mxu1 %vm4050_vm12, %v10130_v54  ;;  %7177 = vmatmul.mubr.msk.f32.gmra.mrb[30].mxu0 %vm4050_vm12, %v10186_v19 }
 0x2a9   : > { %4752 = vmatprep.mubr.f32.mxu1 %v11522_v0  ;;  %5436 = vmatprep.mubr.f32.mxu0 %v11522_v0 }
 0x2ac   : > { %7166 = vmatmul.mubr.msk.f32.gmra.mrb[8].mxu1 %vm4050_vm12, %v10142_v25 }
 0x2ad   : > { %4758 = vmatprep.mubr.f32.mxu1 %v11522_v0 }
 0x2b0   : > { %7167 = vmatmul.mubr.msk.f32.gmra.mrb[10].mxu1 %vm4050_vm12, %v10159_v13 }
 0x2b1   : > { %4764 = vmatprep.mubr.f32.mxu1 %v11522_v0 }
 0x2b4   : > { %7168 = vmatmul.mubr.msk.f32.gmra.mrb[12].mxu1 %vm4050_vm12, %v10173_v52 }
 0x2b5   : > { %4770 = vmatprep.mubr.f32.mxu1 %v11522_v0 }
 0x2b8   : > { %7169 = vmatmul.mubr.msk.f32.gmra.mrb[14].mxu1 %vm4050_vm12, %v10186_v19 }
 0x2b9   : > { %4954 = vmatprep.mubr.f32.mxu1 %v11522_v0 }
 0x2bc   : > { %7178 = vmatmul.mubr.msk.f32.vlgmr.msra.gmra.mrb[16].mxu1 %vm4050_vm12, %v10055_v55 }
 0x2bd   : > { %4960 = vmatprep.mubr.f32.mxu1 %v11522_v0 }
 0x2c0   : > { %7179 = vmatmul.mubr.msk.f32.gmra.mrb[18].mxu1 %vm4050_vm12, %v10076_v1 }
 0x2c1   : > { %4966 = vmatprep.mubr.f32.mxu1 %v11522_v0 }
 0x2c4   : > { %7180 = vmatmul.mubr.msk.f32.gmra.mrb[20].mxu1 %vm4050_vm12, %v10103_v43 }
 0x2c5   : > { %4972 = vmatprep.mubr.f32.mxu1 %v11522_v0 }
 0x2c8   : > { %7181 = vmatmul.mubr.msk.f32.gmra.mrb[22].mxu1 %vm4050_vm12, %v10130_v54 }
 0x2c9   : > { %4978 = vmatprep.mubr.f32.mxu1 %v11522_v0 }
 0x2cc   : > { %7182 = vmatmul.mubr.msk.f32.gmra.mrb[24].mxu1 %vm4050_vm12, %v10142_v25 }
 0x2cd   : > { %4984 = vmatprep.mubr.f32.mxu1 %v11522_v0  ;;  %v10298_v60 = vpop.permute.xlu1 %5013 }
 0x2ce   : > { %v10302_v15 = vpop.permute.xlu0 %5018 }
 0x2d0   : > { %7183 = vmatmul.mubr.msk.f32.gmra.mrb[26].mxu1 %vm4050_vm12, %v10159_v13 }
 0x2d1   : > { %4990 = vmatprep.mubr.f32.mxu1 %v11522_v0  ;;  %v10307_v18 = vpop.permute.xlu1 %5023 }
 0x2d4   : > { %7184 = vmatmul.mubr.msk.f32.gmra.mrb[28].mxu1 %vm4050_vm12, %v10173_v52 }
 0x2d5   : > { %4996 = vmatprep.mubr.f32.mxu1 %v11522_v0  ;;  %v10328_v53 = vpop.permute.xlu1 %5028 }
 0x2d8   : > { %7185 = vmatmul.mubr.msk.f32.gmra.mrb[30].mxu1 %vm4050_vm12, %v10186_v19  ;;  %vm5359_vm12 = vcmask 261120  }
 0x2d9   : > { %5525 = vmatprep.mubr.f32.mxu1 %v11522_v0 }
 0x33f   : > { %v4617_v24 = vpop.f32.mrb[0].mxu0 }
 0x340   : > { %v5051_v27 = vadd.f32 %v10298_v60, %v4617_v24  ;;  %v4619_v55 = vpop.f32.mrb[1].mxu0 }
 0x341   : > { %v5052_v23 = vadd.f32 %v10298_v60, %v4619_v55 }
 0x342   : > { %v10304_v50 = vmax.f32 %v5051_v27, 0.0 }
 0x343   : > { %v4623_v9 = vpop.f32.mrb[2].mxu0  ;;  %v10309_v32 = vmax.f32 %v5052_v23, 0.0 }
 0x344   : > { %v5059_v1 = vadd.f32 %v10302_v15, %v4623_v9  ;;  %v4625_v2 = vpop.f32.mrb[3].mxu0  ;;  %v5147_v38 = vmul.f32 %v10304_v50, %v10304_v50 }
 0x345   : > { %v5060_v37 = vadd.f32 %v10302_v15, %v4625_v2  ;;  %v5148_v41 = vmul.f32 %v10309_v32, %v10309_v32  ;;  %v10354_v2 = vpop.permute.xlu0 %5033 }
 0x346   : > { %v10312_v8 = vmax.f32 %v5059_v1, 0.0 }
 0x347   : > { %v10314_v30 = vmax.f32 %v5060_v37, 0.0  ;;  %v4629_v17 = vpop.f32.mrb[4].mxu0 }
 0x348   : > { %v5155_v3 = vmul.f32 %v10312_v8, %v10312_v8  ;;  %v5067_v21 = vadd.f32 %v10307_v18, %v4629_v17  ;;  %v4631_v43 = vpop.f32.mrb[5].mxu0 }
 0x349   : > { %v5156_v39 = vmul.f32 %v10314_v30, %v10314_v30  ;;  %v5068_v58 = vadd.f32 %v10307_v18, %v4631_v43 }
 0x34a   : > { %v5179_v44 = vadd.f32 %v5155_v3, %v5147_v38  ;;  %v10326_v56 = vmax.f32 %v5067_v21, 0.0  ;;  %v10359_v3 = vpop.permute.xlu1 %5038 }
 0x34b   : > { %v5188_v45 = vadd.f32 %v5156_v39, %v5148_v41  ;;  %v10330_v14 = vmax.f32 %v5068_v58, 0.0  ;;  %v4635_v5 = vpop.f32.mrb[6].mxu0 }
 0x34c   : > { %v5163_v16 = vmul.f32 %v10326_v56, %v10326_v56  ;;  %v5075_v51 = vadd.f32 %v10328_v53, %v4635_v5  ;;  %v4637_v48 = vpop.f32.mrb[7].mxu0 }
 0x34d   : > { %v5164_v6 = vmul.f32 %v10330_v14, %v10330_v14  ;;  %v5076_v54 = vadd.f32 %v10328_v53, %v4637_v48 }
 0x34e   : > { %v5180_v26 = vadd.f32 %v5179_v44, %v5163_v16  ;;  %v10338_v47 = vmax.f32 %v5075_v51, 0.0 }
 0x34f   : > { %v5189_v33 = vadd.f32 %v5188_v45, %v5164_v6  ;;  %v10340_v4 = vmax.f32 %v5076_v54, 0.0  ;;  %v4641_v7 = vpop.f32.mrb[8].mxu0  ;;  %v10378_v54 = vpop.permute.xlu0 %5043 }
 0x350   : > { %v5171_v25 = vmul.f32 %v10338_v47, %v10338_v47  ;;  %v4643_v22 = vpop.f32.mrb[9].mxu0 }
 0x351   : > { %v5172_v36 = vmul.f32 %v10340_v4, %v10340_v4 }
 0x352   : > { %v5181_v59 = vadd.f32 %v5180_v26, %v5171_v25  ;;  %v10381_v26 = vadd.f32 %v10354_v2, %v4641_v7 }
 0x353   : > { %v5190_v40 = vadd.f32 %v5189_v33, %v5172_v36  ;;  %v4647_v13 = vpop.f32.mrb[10].mxu0  ;;  %v10385_v36 = vpop.permute.xlu1 %5048 }
 0x354   : > { %v5182_v35 = vrot.slane %v5181_v59, 4  ;;  %v10346_v52 = vpop.f32.mrb[11].mxu0  ;;  %11567 = vst [vmem:[#allocation18_spill] sm:$0xff] %v10381_v26 }
 0x355   : > { %v5191_v31 = vrot.slane %v5190_v40, 4 }
 0x356   : > { %v5183_v19 = vadd.f32 %v5182_v35, %v5181_v59  ;;  %v10388_v59 = vadd.f32 %v10354_v2, %v4643_v22 }
 0x357   : > { %v5192_v61 = vadd.f32 %v5191_v31, %v5190_v40  ;;  %v4653_v11 = vpop.f32.mrb[12].mxu0  ;;  %v10391_v40 = vadd.f32 %v10359_v3, %v4647_v13 }
 0x358   : > { %v5184_v49 = vrot.slane %v5183_v19, 2  ;;  %v10348_v10 = vpop.f32.mrb[13].mxu0  ;;  %11568 = vst [vmem:[#allocation7_spill] sm:$0xff] %v10388_v59  ;;  %v10394_v35 = vadd.f32 %v10378_v54, %v4653_v11 }
 0x359   : > { %v5193_v63 = vrot.slane %v5192_v61, 2  ;;  %11569 = vst [vmem:[#allocation13_spill] sm:$0xff] %v10391_v40 }
 0x35a   : > { %v5185_v57 = vadd.f32 %v5184_v49, %v5183_v19  ;;  %11570 = vst [vmem:[#allocation12_spill] sm:$0xff] %v10394_v35 }
 0x35b   : > { %v5194_v29 = vadd.f32 %v5193_v63, %v5192_v61  ;;  %v4659_v20 = vpop.f32.mrb[14].mxu0 }
 0x35c   : > { %v5186_v46 = vrot.slane %v5185_v57, 1  ;;  %v10350_v12 = vpop.f32.mrb[15].mxu0  ;;  %v10397_v7 = vadd.f32 %v10385_v36, %v4659_v20 }
 0x35d   : > { %v5195_v28 = vrot.slane %v5194_v29, 1 }
 0x35e   : > { %v5187_v42 = vadd.f32 %v5186_v46, %v5185_v57  ;;  %11571 = vst [vmem:[#allocation11_spill] sm:$0xff] %v10397_v7 }
 0x35f   : > { %v5196_v34 = vadd.f32 %v5195_v28, %v5194_v29  ;;  %v4843_v62 = vpop.f32.mrb[16].mxu0 }
 0x360   : > { %v5251_v24 = vmax.f32 %v5187_v42, 1e-24  ;;  %v5055_v27 = vadd.f32 %v10298_v60, %v4843_v62  ;;  %v4845_v55 = vpop.f32.mrb[17].mxu0 }
 0x361   : > { %v5252_v23 = vmax.f32 %v5196_v34, 1e-24  ;;  %v5056_v9 = vadd.f32 %v10298_v60, %v4845_v55 }
 0x362   : > { %7604 = vrsqrt.f32 %v5251_v24  ;;  %v10356_v37 = vmax.f32 %v5055_v27, 0.0 }
 0x363   : > { %7606 = vrsqrt.f32 %v5252_v23  ;;  %v4849_v1 = vpop.f32.mrb[18].mxu0  ;;  %v10361_v21 = vmax.f32 %v5056_v9, 0.0 }
 0x364   : > { %v5063_v17 = vadd.f32 %v10302_v15, %v4849_v1  ;;  %v4851_v38 = vpop.f32.mrb[19].mxu0  ;;  %v5151_v44 = vmul.f32 %v10356_v37, %v10356_v37 }
 0x365   : > { %v5064_v43 = vadd.f32 %v10302_v15, %v4851_v38  ;;  %v5152_v51 = vmul.f32 %v10361_v21, %v10361_v21 }
 0x366   : > { %v10364_v41 = vmax.f32 %v5063_v17, 0.0 }
 0x367   : > { %v10366_v39 = vmax.f32 %v5064_v43, 0.0  ;;  %v4855_v58 = vpop.f32.mrb[20].mxu0 }
 0x368   : > { %v5159_v45 = vmul.f32 %v10364_v41, %v10364_v41  ;;  %v5071_v5 = vadd.f32 %v10307_v18, %v4855_v58  ;;  %v4857_v16 = vpop.f32.mrb[21].mxu0 }
 0x369   : > { %v5160_v48 = vmul.f32 %v10366_v39, %v10366_v39  ;;  %v5072_v6 = vadd.f32 %v10307_v18, %v4857_v16 }
 0x36a   : > { %v5215_v33 = vadd.f32 %v5159_v45, %v5151_v44  ;;  %v10383_v25 = vmax.f32 %v5071_v5, 0.0 }
 0x36b   : > { %v5224_v31 = vadd.f32 %v5160_v48, %v5152_v51  ;;  %v4861_v19 = vpop.f32.mrb[22].mxu0  ;;  %v10401_v63 = vmax.f32 %v5072_v6, 0.0 }
 0x36c   : > { %v7605_v61 = vpop.eup %7604  ;;  %v5167_v49 = vmul.f32 %v10383_v25, %v10383_v25  ;;  %v5079_v22 = vadd.f32 %v10328_v53, %v4861_v19  ;;  %v4863_v57 = vpop.f32.mrb[23].mxu0 }
 0x36d   : > { %v7607_v29 = vpop.eup %7606  ;;  %v5291_v13 = vmul.f32 %v7605_v61, %v10338_v47  ;;  %v5267_v11 = vmul.f32 %v7605_v61, %v10304_v50  ;;  %v5275_v46 = vmul.f32 %v7605_v61, %v10312_v8  ;;  %v5283_v28 = vmul.f32 %v7605_v61, %v10326_v56 }
 0x36e   : > { %v5292_v20 = vmul.f32 %v7607_v29, %v10340_v4  ;;  %v5268_v42 = vmul.f32 %v7607_v29, %v10309_v32  ;;  %v5276_v34 = vmul.f32 %v7607_v29, %v10314_v30  ;;  %v5284_v62 = vmul.f32 %v7607_v29, %v10330_v14 }
 0x36f   : > { %v4730_v24 = vpop.f32.mrb[0].mxu1  ;;  %v5299_v27 = vmul.f32 %v5267_v11, %v10381_v26  ;;  %v5307_v55 = vmul.f32 %v5275_v46, %v10391_v40  ;;  %v10415_v47 = vmul.f32 %v5283_v28, %v10394_v35  ;;  %v10418_v50 = vmul.f32 %v5291_v13, %v10397_v7  ;;  %v10420_v8 = vpop.f32.mrb[24].mxu0 }
 0x370   : > { %v5053_v56 = vadd.f32 %v10298_v60, %v4730_v24  ;;  %v4732_v32 = vpop.f32.mrb[1].mxu1  ;;  %v10425_v30 = vadd.f32 %v10359_v3, %v10346_v52  ;;  %v10429_v14 = vadd.f32 %v10378_v54, %v10348_v10  ;;  %v10433_v4 = vadd.f32 %v10385_v36, %v10350_v12  ;;  %v10435_v23 = vpop.f32.mrb[25].mxu0 }
 0x371   : > { %v5054_v9 = vadd.f32 %v10298_v60, %v4732_v32  ;;  %v5300_v1 = vmul.f32 %v5268_v42, %v10388_v59  ;;  %v7262_v17 = vpack.c.bf16 %v5307_v55, %v5299_v27  ;;  %v7266_v38 = vpack.c.bf16 %v10418_v50, %v10415_v47 }
 0x372   : > { %11572 = vst [vmem:[#allocation19_spill] sm:$0xff] %v10425_v30  ;;  %11573 = vst [vmem:[#allocation20_spill] sm:$0xff] %v10429_v14  ;;  %v5308_v52 = vmul.f32 %v5276_v34, %v10425_v30  ;;  %v5216_v43 = vadd.f32 %v5215_v33, %v5167_v49  ;;  %v5168_v10 = vmul.f32 %v10401_v63, %v10401_v63  ;;  %v10444_v58 = vmax.f32 %v5079_v22, 0.0 }
 0x373   : > { %11574 = vst [vmem:[#allocation21_spill] sm:$0xff] %v10433_v4  ;;  %v4736_v12 = vpop.f32.mrb[2].mxu1  ;;  %v5316_v44 = vmul.f32 %v5284_v62, %v10429_v14  ;;  %v5324_v45 = vmul.f32 %v5292_v20, %v10433_v4  ;;  %v5080_v5 = vadd.f32 %v10328_v53, %v4863_v57  ;;  %v10449_v16 = vpop.f32.mrb[26].mxu0  ;;  %v10451_v51 = vmax.f32 %v5053_v56, 0.0 }
 0x374   : > { %v5061_v48 = vadd.f32 %v10302_v15, %v4736_v12  ;;  %v4738_v6 = vpop.f32.mrb[3].mxu1  ;;  %v5225_v33 = vadd.f32 %v5224_v31, %v5168_v10  ;;  %v5175_v19 = vmul.f32 %v10444_v58, %v10444_v58  ;;  %v10456_v61 = vpop.f32.mrb[27].mxu0  ;;  %v10458_v49 = vmax.f32 %v5054_v9, 0.0 }
 0x375   : > { %v5062_v22 = vadd.f32 %v10302_v15, %v4738_v6  ;;  %v10461_v29 = vmax.f32 %v5080_v5, 0.0  ;;  %v7260_v11 = vpack.c.bf16 %v5308_v52, %v5300_v1  ;;  %v7264_v20 = vpack.c.bf16 %v5324_v45, %v5316_v44 }
 0x376   : > { %v10463_v57 = vmax.f32 %v5061_v48, 0.0  ;;  %v5217_v13 = vadd.f32 %v5216_v43, %v5175_v19  ;;  %v5149_v34 = vmul.f32 %v10451_v51, %v10451_v51  ;;  %v5150_v50 = vmul.f32 %v10458_v49, %v10458_v49 }
 0x377   : > { %v10465_v46 = vmax.f32 %v5062_v22, 0.0  ;;  %v4742_v28 = vpop.f32.mrb[4].mxu1  ;;  %v5176_v31 = vmul.f32 %v10461_v29, %v10461_v29  ;;  %v10469_v42 = vpop.f32.mrb[28].mxu0  ;;  %7261 = vmatprep.subr.bf16.mxu0 %v7260_v11 }
 0x378   : > { %v5157_v62 = vmul.f32 %v10463_v57, %v10463_v57  ;;  %v5069_v24 = vadd.f32 %v10307_v18, %v4742_v28  ;;  %v4744_v27 = vpop.f32.mrb[5].mxu1  ;;  %v5218_v55 = vrot.slane %v5217_v13, 4  ;;  %v10476_v47 = vpop.f32.mrb[29].mxu0  ;;  %7263 = vmatpush1.bf16.msra.mxu0 %v7262_v17  ;;  %v10500_v28 = vld [vmem:[%s11350_s5] sm:$0xff] }
 0x379   : > { %v5158_v56 = vmul.f32 %v10465_v46, %v10465_v46  ;;  %v5070_v32 = vadd.f32 %v10307_v18, %v4744_v27  ;;  %v5226_v9 = vadd.f32 %v5225_v33, %v5176_v31  ;;  %7265 = vmatprep.subr.bf16.mxu0 %v7264_v20 }
 0x37a   : > { %v5197_v1 = vadd.f32 %v5157_v62, %v5149_v34  ;;  %v10483_v52 = vmax.f32 %v5069_v24, 0.0  ;;  %v5219_v43 = vadd.f32 %v5218_v55, %v5217_v13 }
 0x37b   : > { %v5206_v10 = vadd.f32 %v5158_v56, %v5150_v50  ;;  %v10485_v12 = vmax.f32 %v5070_v32, 0.0  ;;  %v4748_v44 = vpop.f32.mrb[6].mxu1  ;;  %v5227_v45 = vrot.slane %v5226_v9, 4  ;;  %v10487_v5 = vpop.f32.mrb[30].mxu0 }
 0x37c   : > { %v5165_v48 = vmul.f32 %v10483_v52, %v10483_v52  ;;  %v5077_v6 = vadd.f32 %v10328_v53, %v4748_v44  ;;  %v4750_v19 = vpop.f32.mrb[7].mxu1  ;;  %v5220_v33 = vrot.slane %v5219_v43, 2  ;;  %v10492_v17 = vpop.f32.mrb[31].mxu0  ;;  %7267 = vmatpush1.bf16.msra.mxu0 %v7266_v38 }
 0x37d   : > { %v5166_v22 = vmul.f32 %v10485_v12, %v10485_v12  ;;  %v5078_v13 = vadd.f32 %v10328_v53, %v4750_v19  ;;  %v5228_v11 = vadd.f32 %v5227_v45, %v5226_v9 }
 0x37e   : > { %v5198_v31 = vadd.f32 %v5197_v1, %v5165_v48  ;;  %v10502_v20 = vmax.f32 %v5077_v6, 0.0  ;;  %v5221_v34 = vadd.f32 %v5220_v33, %v5219_v43  ;;  %v10516_v1 = vld [vmem:[%s11350_s5 + $0x8] sm:$0xff] }
 0x37f   : > { %v5207_v62 = vadd.f32 %v5206_v10, %v5166_v22  ;;  %v10504_v24 = vmax.f32 %v5078_v13, 0.0  ;;  %v4754_v27 = vpop.f32.mrb[8].mxu1  ;;  %v5229_v55 = vrot.slane %v5228_v11, 2  ;;  %7186 = vmatmul.mubr.msk.f32.vlgmr.msra.gmra.mrb[32].mxu0 %vm5359_vm12, %v10500_v28 }
 0x380   : > { %v5173_v50 = vmul.f32 %v10502_v20, %v10502_v20  ;;  %v4756_v56 = vpop.f32.mrb[9].mxu1  ;;  %v5222_v38 = vrot.slane %v5221_v34, 1  ;;  %5442 = vmatprep.mubr.f32.mxu0 %v11522_v0  ;;  %v10580_v14 = vadd.f32 %v10354_v2, %v4754_v27 }
 0x381   : > { %v5174_v32 = vmul.f32 %v10504_v24, %v10504_v24  ;;  %v5230_v9 = vadd.f32 %v5229_v55, %v5228_v11  ;;  %v10526_v11 = vld [vmem:[%s11350_s5 + $0x10] sm:$0xff] }
 0x382   : > { %v5199_v43 = vadd.f32 %v5198_v31, %v5173_v50  ;;  %v5223_v10 = vadd.f32 %v5222_v38, %v5221_v34 }
 0x383   : > { %v5208_v44 = vadd.f32 %v5207_v62, %v5174_v32  ;;  %v4760_v45 = vpop.f32.mrb[10].mxu1  ;;  %v5231_v48 = vrot.slane %v5230_v9, 1  ;;  %7187 = vmatmul.mubr.msk.f32.gmra.mrb[34].mxu0 %vm5359_vm12, %v10516_v1 }
 0x384   : > { %v5200_v6 = vrot.slane %v5199_v43, 4  ;;  %v10518_v19 = vpop.f32.mrb[11].mxu1  ;;  %v5255_v33 = vmax.f32 %v5223_v10, 1e-24  ;;  %5448 = vmatprep.mubr.f32.mxu0 %v11522_v0 }
 0x385   : > { %v5209_v22 = vrot.slane %v5208_v44, 4  ;;  %v5232_v13 = vadd.f32 %v5231_v48, %v5230_v9  ;;  %v10538_v9 = vld [vmem:[%s11350_s5 + $0x18] sm:$0xff] }
 0x386   : > { %v5201_v31 = vadd.f32 %v5200_v6, %v5199_v43  ;;  %7608 = vrsqrt.f32 %v5255_v33 }
 0x387   : > { %v5210_v34 = vadd.f32 %v5209_v22, %v5208_v44  ;;  %v10528_v62 = vpop.f32.mrb[12].mxu1  ;;  %v5256_v55 = vmax.f32 %v5232_v13, 1e-24  ;;  %7188 = vmatmul.mubr.msk.f32.gmra.mrb[36].mxu0 %vm5359_vm12, %v10526_v11  ;;  %v10548_v22 = vadd.f32 %v10354_v2, %v10420_v8  ;;  %v10552_v13 = vadd.f32 %v10354_v2, %v10435_v23 }
 0x388   : > { %v5202_v50 = vrot.slane %v5201_v31, 2  ;;  %v10530_v38 = vpop.f32.mrb[13].mxu1  ;;  %5454 = vmatprep.mubr.f32.mxu0 %v11522_v0  ;;  %v10569_v23 = vadd.f32 %v10378_v54, %v10476_v47 }
 0x389   : > { %v5211_v32 = vrot.slane %v5210_v34, 2  ;;  %7610 = vrsqrt.f32 %v5256_v55  ;;  %11575 = vst [vmem:[#allocation9_spill] sm:$0xff] %v10548_v22  ;;  %v10561_v55 = vadd.f32 %v10359_v3, %v10456_v61 }
 0x38a   : > { %v5203_v43 = vadd.f32 %v5202_v50, %v5201_v31  ;;  %v10565_v50 = vadd.f32 %v10378_v54, %v10469_v42  ;;  %11578 = vst [vmem:[#allocation14_spill] sm:$0xff] %v10569_v23  ;;  %v10583_v42 = vadd.f32 %v10354_v2, %v4756_v56  ;;  %v10594_v56 = vadd.f32 %v10359_v3, %v4760_v45 }
 0x38b   : > { %v5212_v10 = vadd.f32 %v5211_v32, %v5210_v34  ;;  %v10540_v44 = vpop.f32.mrb[14].mxu1  ;;  %7189 = vmatmul.mubr.msk.f32.gmra.mrb[38].mxu0 %vm5359_vm12, %v10538_v9  ;;  %v10557_v34 = vadd.f32 %v10359_v3, %v10449_v16  ;;  %11577 = vst [vmem:[#allocation15_spill] sm:$0xff] %v10561_v55  ;;  %v10577_v16 = vadd.f32 %v10385_v36, %v10492_v17 }
 0x38c   : > { %v5204_v48 = vrot.slane %v5203_v43, 1  ;;  %v10542_v6 = vpop.f32.mrb[15].mxu1  ;;  %5614 = vmatprep.mubr.f32.mxu0 %v11522_v0 }
 0x38d   : > { %v5213_v33 = vrot.slane %v5212_v10, 1  ;;  %11576 = vst [vmem:[#allocation17_spill] sm:$0xff] %v10557_v34 }
 0x38e   : > { %v5205_v31 = vadd.f32 %v5204_v48, %v5203_v43  ;;  %v10573_v43 = vadd.f32 %v10385_v36, %v10487_v5 }
 0x38f   : > { %v5214_v8 = vadd.f32 %v5213_v33, %v5212_v10  ;;  %v4956_v32 = vpop.f32.mrb[16].mxu1 }
 0x390   : > { %v7609_v61 = vpop.eup %7608  ;;  %v5253_v48 = vmax.f32 %v5205_v31, 1e-24  ;;  %v5057_v10 = vadd.f32 %v10298_v60, %v4956_v32  ;;  %v4958_v47 = vpop.f32.mrb[17].mxu1 }
 0x391   : > { %v5254_v33 = vmax.f32 %v5214_v8, 1e-24  ;;  %v5058_v40 = vadd.f32 %v10298_v60, %v4958_v47  ;;  %v5295_v5 = vmul.f32 %v7609_v61, %v10444_v58  ;;  %v5271_v26 = vmul.f32 %v7609_v61, %v10356_v37 }
 0x392   : > { %7612 = vrsqrt.f32 %v5253_v48  ;;  %v10589_v17 = vmax.f32 %v5057_v10, 0.0  ;;  %v5279_v31 = vmul.f32 %v7609_v61, %v10364_v41  ;;  %v5287_v27 = vmul.f32 %v7609_v61, %v10383_v25 }
 0x393   : > { %v7611_v30 = vpop.eup %7610  ;;  %7614 = vrsqrt.f32 %v5254_v33  ;;  %v10596_v32 = vmax.f32 %v5058_v40, 0.0  ;;  %v4962_v8 = vpop.f32.mrb[18].mxu1  ;;  %v5303_v60 = vmul.f32 %v5271_v26, %v10548_v22  ;;  %v5327_v41 = vmul.f32 %v5295_v5, %v10573_v43 }
 0x394   : > { %v5065_v58 = vadd.f32 %v10302_v15, %v4962_v8  ;;  %v4964_v37 = vpop.f32.mrb[19].mxu1  ;;  %v5296_v48 = vmul.f32 %v7611_v30, %v10461_v29  ;;  %v5272_v10 = vmul.f32 %v7611_v30, %v10361_v21  ;;  %v5153_v25 = vmul.f32 %v10589_v17, %v10589_v17 }
 0x395   : > { %v5066_v45 = vadd.f32 %v10302_v15, %v4964_v37  ;;  %v5311_v40 = vmul.f32 %v5279_v31, %v10557_v34  ;;  %v5280_v61 = vmul.f32 %v7611_v30, %v10366_v39  ;;  %v5319_v33 = vmul.f32 %v5287_v27, %v10565_v50 }
 0x396   : > { %v10608_v47 = vmax.f32 %v5065_v58, 0.0  ;;  %v5304_v26 = vmul.f32 %v5272_v10, %v10552_v13  ;;  %v5288_v29 = vmul.f32 %v7611_v30, %v10401_v63  ;;  %v5328_v15 = vmul.f32 %v5296_v48, %v10577_v16 }
 0x397   : > { %v10613_v21 = vmax.f32 %v5066_v45, 0.0  ;;  %v4968_v5 = vpop.f32.mrb[20].mxu1  ;;  %v7278_v8 = vpack.c.bf16 %v5311_v40, %v5303_v60  ;;  %v5312_v22 = vmul.f32 %v5280_v61, %v10561_v55  ;;  %v7282_v10 = vpack.c.bf16 %v5327_v41, %v5319_v33 }
 0x398   : > { %v5161_v31 = vmul.f32 %v10608_v47, %v10608_v47  ;;  %v5073_v39 = vadd.f32 %v10307_v18, %v4968_v5  ;;  %v4970_v58 = vpop.f32.mrb[21].mxu1  ;;  %v5320_v37 = vmul.f32 %v5288_v29, %v10569_v23  ;;  %v5154_v63 = vmul.f32 %v10596_v32, %v10596_v32 }
 0x399   : > { %v5162_v30 = vmul.f32 %v10613_v21, %v10613_v21  ;;  %v5074_v27 = vadd.f32 %v10307_v18, %v4970_v58  ;;  %v7276_v60 = vpack.c.bf16 %v5312_v22, %v5304_v26  ;;  %v10628_v48 = vadd.f32 %v10359_v3, %v10518_v19 }
 0x39a   : > { %v5233_v45 = vadd.f32 %v5161_v31, %v5153_v25  ;;  %v10630_v40 = vmax.f32 %v5073_v39, 0.0  ;;  %v7280_v61 = vpack.c.bf16 %v5328_v15, %v5320_v37  ;;  %v10634_v41 = vadd.f32 %v10378_v54, %v10528_v62 }
 0x39b   : > { %v10638_v33 = vadd.f32 %v10378_v54, %v10530_v38  ;;  %v10642_v18 = vadd.f32 %v10385_v36, %v10540_v44  ;;  %v5242_v22 = vadd.f32 %v5162_v30, %v5154_v63  ;;  %v4974_v26 = vpop.f32.mrb[22].mxu1  ;;  %7277 = vmatprep.subr.bf16.mxu0 %v7276_v60  ;;  %v10646_v25 = vadd.f32 %v10385_v36, %v10542_v6 }
 0x39c   : > { %v7613_v19 = vpop.eup %7612  ;;  %v5169_v62 = vmul.f32 %v10630_v40, %v10630_v40  ;;  %v10650_v29 = vmax.f32 %v5074_v27, 0.0  ;;  %v5081_v38 = vadd.f32 %v10328_v53, %v4974_v26  ;;  %v4976_v5 = vpop.f32.mrb[23].mxu1  ;;  %7279 = vmatpush1.bf16.msra.mxu0 %v7278_v8 }
 0x39d   : > { %v7615_v15 = vpop.eup %7614  ;;  %v5293_v44 = vmul.f32 %v7613_v19, %v10502_v20  ;;  %v5269_v31 = vmul.f32 %v7613_v19, %v10451_v51  ;;  %v5277_v39 = vmul.f32 %v7613_v19, %v10463_v57  ;;  %v5285_v58 = vmul.f32 %v7613_v19, %v10483_v52  ;;  %7281 = vmatprep.subr.bf16.mxu0 %v7280_v61 }
 0x39e   : > { %v5294_v6 = vmul.f32 %v7615_v15, %v10504_v24  ;;  %v5270_v37 = vmul.f32 %v7615_v15, %v10458_v49  ;;  %v5278_v63 = vmul.f32 %v7615_v15, %v10465_v46  ;;  %v5286_v30 = vmul.f32 %v7615_v15, %v10485_v12 }
 0x39f   : > { %v5301_v8 = vmul.f32 %v5269_v31, %v10580_v14  ;;  %v5309_v27 = vmul.f32 %v5277_v39, %v10594_v56  ;;  %v5317_v20 = vmul.f32 %v5285_v58, %v10634_v41  ;;  %v5325_v51 = vmul.f32 %v5293_v44, %v10642_v18  ;;  %v10665_v57 = vpop.f32.mrb[24].mxu1 }
 0x3a0   : > { %v5302_v52 = vmul.f32 %v5270_v37, %v10583_v42  ;;  %v5310_v24 = vmul.f32 %v5278_v63, %v10628_v48  ;;  %v5318_v49 = vmul.f32 %v5286_v30, %v10638_v33  ;;  %v5326_v46 = vmul.f32 %v5294_v6, %v10646_v25  ;;  %v4982_v60 = vpop.f32.mrb[25].mxu1  ;;  %7283 = vmatpush1.bf16.msra.mxu0 %v7282_v10 }
 0x3a1   : > { %v7270_v12 = vpack.c.bf16 %v5309_v27, %v5301_v8  ;;  %v7274_v61 = vpack.c.bf16 %v5325_v51, %v5317_v20  ;;  %v5234_v26 = vadd.f32 %v5233_v45, %v5169_v62  ;;  %v5170_v19 = vmul.f32 %v10650_v29, %v10650_v29 }
 0x3a2   : > { %v5145_v15 = vmax.f32 %v5081_v38, 0.0  ;;  %v5082_v44 = vadd.f32 %v10328_v53, %v4976_v5  ;;  %v7268_v58 = vpack.c.bf16 %v5310_v24, %v5302_v52  ;;  %v7272_v37 = vpack.c.bf16 %v5326_v46, %v5318_v49 }
 0x3a3   : > { %v5243_v31 = vadd.f32 %v5242_v22, %v5170_v19  ;;  %v4986_v39 = vpop.f32.mrb[26].mxu1  ;;  %7194 = vmatmul.mubr.msk.f32.vlgmr.msra.gmra.mrb[40].mxu0 %vm5359_vm12, %v10500_v28 }
 0x3a4   : > { %v5177_v63 = vmul.f32 %v5145_v15, %v5145_v15  ;;  %v5146_v6 = vmax.f32 %v5082_v44, 0.0  ;;  %v4988_v30 = vpop.f32.mrb[27].mxu1  ;;  %5620 = vmatprep.mubr.f32.mxu0 %v11522_v0  ;;  %7269 = vmatprep.subr.bf16.mxu1 %v7268_v58 }
 0x3a5   : > { %7271 = vmatpush1.bf16.msra.mxu1 %v7270_v12 }
 0x3a6   : > { %v5235_v10 = vadd.f32 %v5234_v26, %v5177_v63  ;;  %v5178_v45 = vmul.f32 %v5146_v6, %v5146_v6  ;;  %7273 = vmatprep.subr.bf16.mxu1 %v7272_v37  ;;  %v10700_v37 = vadd.f32 %v10354_v2, %v10665_v57  ;;  %v10703_v63 = vadd.f32 %v10354_v2, %v4982_v60 }
 0x3a7   : > { %v4992_v62 = vpop.f32.mrb[28].mxu1  ;;  %7195 = vmatmul.mubr.msk.f32.gmra.mrb[42].mxu0 %vm5359_vm12, %v10516_v1 }
 0x3a8   : > { %v5236_v53 = vrot.slane %v5235_v10, 4  ;;  %v5244_v22 = vadd.f32 %v5243_v31, %v5178_v45  ;;  %v4994_v38 = vpop.f32.mrb[29].mxu1  ;;  %5626 = vmatprep.mubr.f32.mxu0 %v11522_v0  ;;  %11579 = vst [vmem:[#allocation10_spill] sm:$0xff] %v10700_v37  ;;  %11580 = vst [vmem:[#allocation16_spill] sm:$0xff] %v10703_v63  ;;  %v10709_v45 = vadd.f32 %v10359_v3, %v4988_v30 }
 0x3a9   : > { %7275 = vmatpush1.bf16.msra.mxu1 %v7274_v61  ;;  %v10715_v57 = vadd.f32 %v10378_v54, %v4992_v62  ;;  %v10718_v2 = vadd.f32 %v10378_v54, %v4994_v38 }
 0x3aa   : > { %v5237_v5 = vadd.f32 %v5236_v53, %v5235_v10  ;;  %v5245_v8 = vrot.slane %v5244_v22, 4  ;;  %v10706_v10 = vadd.f32 %v10359_v3, %v4986_v39  ;;  %11582 = vst [vmem:[#allocation23_spill] sm:$0xff] %v10709_v45 }
 0x3ab   : > { %v4998_v27 = vpop.f32.mrb[30].mxu1  ;;  %7196 = vmatmul.mubr.msk.f32.gmra.mrb[44].mxu0 %vm5359_vm12, %v10526_v11  ;;  %11583 = vst [vmem:[#allocation24_spill] sm:$0xff] %v10715_v57  ;;  %11584 = vst [vmem:[#allocation25_spill] sm:$0xff] %v10718_v2 }
 0x3ac   : > { %v5238_v20 = vrot.slane %v5237_v5, 2  ;;  %v5246_v51 = vadd.f32 %v5245_v8, %v5244_v22  ;;  %v5000_v52 = vpop.f32.mrb[31].mxu1  ;;  %5632 = vmatprep.mubr.f32.mxu0 %v11522_v0  ;;  %7190 = vmatmul.mubr.msk.f32.vlgmr.msra.gmra.mrb[32].mxu1 %vm5359_vm12, %v10500_v28  ;;  %11581 = vst [vmem:[#allocation22_spill] sm:$0xff] %v10706_v10  ;;  %v10721_v60 = vadd.f32 %v10385_v36, %v4998_v27 }
 0x3ad   : > { %5531 = vmatprep.mubr.f32.mxu1 %v11522_v0  ;;  %v10724_v3 = vadd.f32 %v10385_v36, %v5000_v52 }
 0x3ae   : > { %v5239_v24 = vadd.f32 %v5238_v20, %v5237_v5  ;;  %v5247_v49 = vrot.slane %v5246_v51, 2  ;;  %11585 = vst [vmem:[#allocation26_spill] sm:$0xff] %v10721_v60 }
 0x3af   : > { %7197 = vmatmul.mubr.msk.f32.gmra.mrb[46].mxu0 %vm5359_vm12, %v10538_v9  ;;  %11586 = vst [vmem:[#allocation27_spill] sm:$0xff] %v10724_v3 }
 0x3b0   : > { %v5240_v46 = vrot.slane %v5239_v24, 1  ;;  %v5248_v12 = vadd.f32 %v5247_v49, %v5246_v51  ;;  %6048 = vmatprep.mubr.f32.mxu0 %v11522_v0  ;;  %7191 = vmatmul.mubr.msk.f32.gmra.mrb[34].mxu1 %vm5359_vm12, %v10516_v1 }
 0x3b1   : > { %5537 = vmatprep.mubr.f32.mxu1 %v11522_v0 }
 0x3b2   : > { %v5241_v61 = vadd.f32 %v5240_v46, %v5239_v24  ;;  %v5249_v26 = vrot.slane %v5248_v12, 1  ;;  %v10753_v46 = vpop.permute.xlu1 %5346 }
 0x3b4   : > { %v5257_v19 = vmax.f32 %v5241_v61, 1e-24  ;;  %v5250_v44 = vadd.f32 %v5249_v26, %v5248_v12  ;;  %7192 = vmatmul.mubr.msk.f32.gmra.mrb[36].mxu1 %vm5359_vm12, %v10526_v11 }
 0x3b5   : > { %5543 = vmatprep.mubr.f32.mxu1 %v11522_v0 }
 0x3b6   : > { %7616 = vrsqrt.f32 %v5257_v19  ;;  %v5258_v31 = vmax.f32 %v5250_v44, 1e-24 }
 0x3b8   : > { %7618 = vrsqrt.f32 %v5258_v31  ;;  %7193 = vmatmul.mubr.msk.f32.gmra.mrb[38].mxu1 %vm5359_vm12, %v10538_v9 }
 0x3b9   : > { %5703 = vmatprep.mubr.f32.mxu1 %v11522_v0 }
 0x3c0   : > { %v7617_v58 = vpop.eup %7616 }
 0x3c1   : > { %v5297_v53 = vmul.f32 %v7617_v58, %v5145_v15  ;;  %v5273_v22 = vmul.f32 %v7617_v58, %v10589_v17  ;;  %v5281_v5 = vmul.f32 %v7617_v58, %v10608_v47  ;;  %v5289_v8 = vmul.f32 %v7617_v58, %v10630_v40 }
 0x3c2   : > { %v7619_v20 = vpop.eup %7618 }
 0x3c3   : > { %v5298_v15 = vmul.f32 %v7619_v20, %v5146_v6  ;;  %v5305_v17 = vmul.f32 %v5273_v22, %v10700_v37  ;;  %v5274_v47 = vmul.f32 %v7619_v20, %v10596_v32  ;;  %v5313_v40 = vmul.f32 %v5281_v5, %v10706_v10 }
 0x3c4   : > { %v5282_v39 = vmul.f32 %v7619_v20, %v10613_v21  ;;  %v5321_v30 = vmul.f32 %v5289_v8, %v10715_v57  ;;  %v5290_v54 = vmul.f32 %v7619_v20, %v10650_v29  ;;  %v5329_v62 = vmul.f32 %v5297_v53, %v10721_v60  ;;  %v10749_v21 = vpop.permute.xlu0 %5341 }
 0x3c5   : > { %v5306_v38 = vmul.f32 %v5274_v47, %v10703_v63  ;;  %v7286_v27 = vpack.c.bf16 %v5313_v40, %v5305_v17  ;;  %v5330_v36 = vmul.f32 %v5298_v15, %v10724_v3  ;;  %v11587_v3 = vld [vmem:[#allocation19_spill] sm:$0xff] }
 0x3c6   : > { %v5314_v6 = vmul.f32 %v5282_v39, %v10709_v45  ;;  %v5322_v51 = vmul.f32 %v5290_v54, %v10718_v2  ;;  %v7290_v32 = vpack.c.bf16 %v5329_v62, %v5321_v30  ;;  %v10777_v30 = vpop.permute.xlu1 %5356 }
 0x3c8   : > { %v7284_v52 = vpack.c.bf16 %v5314_v6, %v5306_v38  ;;  %v7288_v24 = vpack.c.bf16 %v5330_v36, %v5322_v51  ;;  %v10763_v31 = vpop.permute.xlu0 %5351 }
 0x3ca   : > { %7285 = vmatprep.subr.bf16.mxu1 %v7284_v52 }
 0x3cb   : > { %7287 = vmatpush1.bf16.msra.mxu1 %v7286_v27 }
 0x3cc   : > { %7289 = vmatprep.subr.bf16.mxu1 %v7288_v24 }
 0x3cf   : > { %7291 = vmatpush1.bf16.msra.mxu1 %v7290_v32 }
 0x3d2   : > { %7198 = vmatmul.mubr.msk.f32.vlgmr.msra.gmra.mrb[40].mxu1 %vm5359_vm12, %v10500_v28 }
 0x3d3   : > { %5709 = vmatprep.mubr.f32.mxu1 %v11522_v0 }
 0x3d6   : > { %7199 = vmatmul.mubr.msk.f32.gmra.mrb[42].mxu1 %vm5359_vm12, %v10516_v1 }
 0x3d7   : > { %5715 = vmatprep.mubr.f32.mxu1 %v11522_v0 }
 0x3da   : > { %7200 = vmatmul.mubr.msk.f32.gmra.mrb[44].mxu1 %vm5359_vm12, %v10526_v11 }
 0x3db   : > { %5721 = vmatprep.mubr.f32.mxu1 %v11522_v0 }
 0x3de   : > { %7201 = vmatmul.mubr.msk.f32.gmra.mrb[46].mxu1 %vm5359_vm12, %v10538_v9 }
 0x3df   : > { %6137 = vmatprep.mubr.f32.mxu1 %v11522_v0 }
 0x452   : > { %v5438_v28 = vpop.f32.mrb[32].mxu0 }
 0x453   : > { %v5439_v29 = vadd.f32 %v5438_v28, %v10749_v21  ;;  %v5440_v49 = vpop.f32.mrb[33].mxu0 }
 0x454   : > { %v5441_v1 = vadd.f32 %v5440_v49, %v10749_v21 }
 0x455   : > { %v10755_v61 = vmax.f32 %v5439_v29, 0.0 }
 0x456   : > { %v5444_v12 = vpop.f32.mrb[34].mxu0  ;;  %v10758_v19 = vmax.f32 %v5441_v1, 0.0 }
 0x457   : > { %v5445_v11 = vadd.f32 %v5444_v12, %v10753_v46  ;;  %v5446_v26 = vpop.f32.mrb[35].mxu0  ;;  %v5760_v22 = vmul.f32 %v10755_v61, %v10755_v61 }
 0x458   : > { %v5447_v9 = vadd.f32 %v5446_v26, %v10753_v46  ;;  %v5761_v15 = vmul.f32 %v10758_v19, %v10758_v19 }
 0x459   : > { %v10761_v44 = vmax.f32 %v5445_v11, 0.0 }
 0x45a   : > { %v10765_v58 = vmax.f32 %v5447_v9, 0.0  ;;  %v5450_v53 = vpop.f32.mrb[36].mxu0 }
 0x45b   : > { %v5768_v5 = vmul.f32 %v10761_v44, %v10761_v44  ;;  %v5451_v8 = vadd.f32 %v5450_v53, %v10763_v31  ;;  %v5452_v20 = vpop.f32.mrb[37].mxu0 }
 0x45c   : > { %v5769_v17 = vmul.f32 %v10765_v58, %v10765_v58  ;;  %v5453_v47 = vadd.f32 %v5452_v20, %v10763_v31 }
 0x45d   : > { %v5792_v40 = vadd.f32 %v5768_v5, %v5760_v22  ;;  %v5744_v39 = vmax.f32 %v5451_v8, 0.0 }
 0x45e   : > { %v5801_v54 = vadd.f32 %v5769_v17, %v5761_v15  ;;  %v10779_v62 = vmax.f32 %v5453_v47, 0.0  ;;  %v5456_v38 = vpop.f32.mrb[38].mxu0 }
 0x45f   : > { %v5776_v27 = vmul.f32 %v5744_v39, %v5744_v39  ;;  %v5457_v36 = vadd.f32 %v5456_v38, %v10777_v30  ;;  %v5458_v6 = vpop.f32.mrb[39].mxu0 }
 0x460   : > { %v5777_v51 = vmul.f32 %v10779_v62, %v10779_v62  ;;  %v5459_v32 = vadd.f32 %v5458_v6, %v10777_v30 }
 0x461   : > { %v5793_v52 = vadd.f32 %v5792_v40, %v5776_v27  ;;  %v5752_v24 = vmax.f32 %v5457_v36, 0.0 }
 0x462   : > { %v5802_v28 = vadd.f32 %v5801_v54, %v5777_v51  ;;  %v5753_v29 = vmax.f32 %v5459_v32, 0.0 }
 0x463   : > { %v5784_v49 = vmul.f32 %v5752_v24, %v5752_v24 }
 0x464   : > { %v5785_v1 = vmul.f32 %v5753_v29, %v5753_v29 }
 0x465   : > { %v5794_v12 = vadd.f32 %v5793_v52, %v5784_v49 }
 0x466   : > { %v5803_v11 = vadd.f32 %v5802_v28, %v5785_v1 }
 0x467   : > { %v5795_v26 = vrot.slane %v5794_v12, 4 }
 0x468   : > { %v5804_v9 = vrot.slane %v5803_v11, 4 }
 0x469   : > { %v5796_v53 = vadd.f32 %v5795_v26, %v5794_v12 }
 0x46a   : > { %v5805_v22 = vadd.f32 %v5804_v9, %v5803_v11 }
 0x46b   : > { %v5797_v5 = vrot.slane %v5796_v53, 2 }
 0x46c   : > { %v5806_v8 = vrot.slane %v5805_v22, 2 }
 0x46d   : > { %v5798_v20 = vadd.f32 %v5797_v5, %v5796_v53 }
 0x46e   : > { %v5807_v15 = vadd.f32 %v5806_v8, %v5805_v22 }
 0x46f   : > { %v5799_v17 = vrot.slane %v5798_v20, 1 }
 0x470   : > { %v5808_v47 = vrot.slane %v5807_v15, 1 }
 0x471   : > { %v5800_v38 = vadd.f32 %v5799_v17, %v5798_v20 }
 0x472   : > { %v5809_v6 = vadd.f32 %v5808_v47, %v5807_v15 }
 0x473   : > { %v5864_v40 = vmax.f32 %v5800_v38, 1e-24 }
 0x474   : > { %v5865_v27 = vmax.f32 %v5809_v6, 1e-24 }
 0x475   : > { %7620 = vrsqrt.f32 %v5864_v40 }
 0x476   : > { %v5616_v54 = vpop.f32.mrb[40].mxu0  ;;  %7622 = vrsqrt.f32 %v5865_v27 }
 0x477   : > { %v5617_v36 = vadd.f32 %v5616_v54, %v10749_v21  ;;  %v5618_v51 = vpop.f32.mrb[41].mxu0 }
 0x478   : > { %v5619_v32 = vadd.f32 %v5618_v51, %v10749_v21 }
 0x479   : > { %v10787_v28 = vmax.f32 %v5617_v36, 0.0 }
 0x47a   : > { %v5622_v52 = vpop.f32.mrb[42].mxu0  ;;  %v10790_v12 = vmax.f32 %v5619_v32, 0.0 }
 0x47b   : > { %v5623_v49 = vadd.f32 %v5622_v52, %v10753_v46  ;;  %v5624_v1 = vpop.f32.mrb[43].mxu0  ;;  %v5764_v22 = vmul.f32 %v10787_v28, %v10787_v28 }
 0x47c   : > { %v5625_v11 = vadd.f32 %v5624_v1, %v10753_v46  ;;  %v5765_v47 = vmul.f32 %v10790_v12, %v10790_v12 }
 0x47d   : > { %v10793_v26 = vmax.f32 %v5623_v49, 0.0 }
 0x47e   : > { %v10795_v9 = vmax.f32 %v5625_v11, 0.0  ;;  %v5628_v53 = vpop.f32.mrb[44].mxu0 }
 0x47f   : > { %v5772_v5 = vmul.f32 %v10793_v26, %v10793_v26  ;;  %v5629_v8 = vadd.f32 %v5628_v53, %v10763_v31  ;;  %v5630_v20 = vpop.f32.mrb[45].mxu0  ;;  %v7621_v15 = vpop.eup %7620 }
 0x480   : > { %v5527_v17 = vpop.f32.mrb[32].mxu1  ;;  %v5773_v38 = vmul.f32 %v10795_v9, %v10795_v9  ;;  %v5631_v6 = vadd.f32 %v5630_v20, %v10763_v31  ;;  %v10807_v40 = vpop.eup %7622  ;;  %v5896_v36 = vmul.f32 %v7621_v15, %v5744_v39  ;;  %v5904_v51 = vmul.f32 %v7621_v15, %v5752_v24 }
 0x481   : > { %v5528_v27 = vadd.f32 %v5527_v17, %v10749_v21  ;;  %v5529_v54 = vpop.f32.mrb[33].mxu1  ;;  %v5828_v32 = vadd.f32 %v5772_v5, %v5764_v22  ;;  %v5905_v49 = vmul.f32 %v10807_v40, %v5753_v29  ;;  %v10812_v11 = vmax.f32 %v5629_v8, 0.0 }
 0x482   : > { %v5530_v52 = vadd.f32 %v5529_v54, %v10749_v21  ;;  %v5837_v1 = vadd.f32 %v5773_v38, %v5765_v47  ;;  %v5634_v53 = vpop.f32.mrb[46].mxu0  ;;  %v10817_v20 = vmul.f32 %v5896_v36, %v10394_v35  ;;  %v10820_v45 = vmul.f32 %v5904_v51, %v10397_v7 }
 0x483   : > { %v10814_v2 = vmax.f32 %v5528_v27, 0.0  ;;  %v10822_v17 = vmax.f32 %v5631_v6, 0.0  ;;  %v5636_v39 = vpop.f32.mrb[47].mxu0  ;;  %v5533_v22 = vpop.f32.mrb[34].mxu1  ;;  %v10827_v29 = vmul.f32 %v5905_v49, %v10433_v4  ;;  %v5780_v5 = vmul.f32 %v10812_v11, %v10812_v11 }
 0x484   : > { %v10824_v24 = vmax.f32 %v5530_v52, 0.0  ;;  %v5635_v8 = vadd.f32 %v5634_v53, %v10777_v30  ;;  %v5534_v38 = vadd.f32 %v5533_v22, %v10753_v46  ;;  %v5535_v27 = vpop.f32.mrb[35].mxu1  ;;  %v5637_v22 = vadd.f32 %v5636_v39, %v10777_v30 }
 0x485   : > { %v5762_v47 = vmul.f32 %v10814_v2, %v10814_v2  ;;  %v5781_v54 = vmul.f32 %v10822_v17, %v10822_v17  ;;  %v5536_v51 = vadd.f32 %v5535_v27, %v10753_v46  ;;  %v5829_v52 = vadd.f32 %v5828_v32, %v5780_v5 }
 0x486   : > { %v5763_v36 = vmul.f32 %v10824_v24, %v10824_v24  ;;  %v10842_v49 = vmax.f32 %v5635_v8, 0.0  ;;  %v10844_v53 = vmax.f32 %v5534_v38, 0.0  ;;  %v5881_v7 = vmul.f32 %v10807_v40, %v10758_v19 }
 0x487   : > { %v5838_v4 = vadd.f32 %v5837_v1, %v5781_v54  ;;  %v10849_v6 = vmax.f32 %v5536_v51, 0.0  ;;  %v5539_v35 = vpop.f32.mrb[36].mxu1  ;;  %v5889_v27 = vmul.f32 %v10807_v40, %v10765_v58  ;;  %v5880_v32 = vmul.f32 %v7621_v15, %v10755_v61 }
 0x488   : > { %v5788_v63 = vmul.f32 %v10842_v49, %v10842_v49  ;;  %v5770_v5 = vmul.f32 %v10844_v53, %v10844_v53  ;;  %v5540_v1 = vadd.f32 %v5539_v35, %v10763_v31  ;;  %v5541_v39 = vpop.f32.mrb[37].mxu1  ;;  %v10859_v8 = vmax.f32 %v5637_v22, 0.0 }
 0x489   : > { %v5913_v19 = vmul.f32 %v5881_v7, %v10388_v59  ;;  %v5771_v38 = vmul.f32 %v10849_v6, %v10849_v6  ;;  %v5542_v54 = vadd.f32 %v5541_v39, %v10763_v31  ;;  %v5921_v58 = vmul.f32 %v5889_v27, %v11587_v3  ;;  %v11588_v27 = vld [vmem:[#allocation18_spill] sm:$0xff] }
 0x48a   : > { %v5830_v51 = vadd.f32 %v5829_v52, %v5788_v63  ;;  %v5810_v10 = vadd.f32 %v5770_v5, %v5762_v47  ;;  %v10866_v61 = vmax.f32 %v5540_v1, 0.0  ;;  %v5789_v37 = vmul.f32 %v10859_v8, %v10859_v8 }
 0x48b   : > { %v5888_v35 = vmul.f32 %v7621_v15, %v10761_v44  ;;  %v5819_v22 = vadd.f32 %v5771_v38, %v5763_v36  ;;  %v10871_v60 = vmax.f32 %v5542_v54, 0.0  ;;  %v5545_v7 = vpop.f32.mrb[38].mxu1  ;;  %v7292_v57 = vpack.c.bf16 %v5921_v58, %v5913_v19  ;;  %v11589_v36 = vld [vmem:[#allocation13_spill] sm:$0xff] }
 0x48c   : > { %v5831_v59 = vrot.slane %v5830_v51, 4  ;;  %v5778_v39 = vmul.f32 %v10866_v61, %v10866_v61  ;;  %v5546_v63 = vadd.f32 %v5545_v7, %v10777_v30  ;;  %v5547_v52 = vpop.f32.mrb[39].mxu1  ;;  %v5839_v47 = vadd.f32 %v5838_v4, %v5789_v37 }
 0x48d   : > { %v5912_v5 = vmul.f32 %v5880_v32, %v11588_v27  ;;  %v5779_v1 = vmul.f32 %v10871_v60, %v10871_v60  ;;  %v5548_v44 = vadd.f32 %v5547_v52, %v10777_v30  ;;  %7293 = vmatprep.subr.bf16.mxu0 %v7292_v57  ;;  %v5920_v38 = vmul.f32 %v5888_v35, %v11589_v36 }
 0x48e   : > { %v5832_v15 = vadd.f32 %v5831_v59, %v5830_v51  ;;  %v5811_v54 = vadd.f32 %v5810_v10, %v5778_v39  ;;  %v10881_v19 = vmax.f32 %v5546_v63, 0.0  ;;  %v5840_v58 = vrot.slane %v5839_v47, 4  ;;  %v11590_v59 = vld [vmem:[#allocation20_spill] sm:$0xff] }
 0x48f   : > { %v5897_v7 = vmul.f32 %v10807_v40, %v10779_v62  ;;  %v5820_v3 = vadd.f32 %v5819_v22, %v5779_v1  ;;  %v10885_v4 = vmax.f32 %v5548_v44, 0.0  ;;  %v7294_v32 = vpack.c.bf16 %v5920_v38, %v5912_v5 }
 0x490   : > { %v5833_v37 = vrot.slane %v5832_v15, 2  ;;  %v5786_v27 = vmul.f32 %v10881_v19, %v10881_v19  ;;  %v5841_v52 = vadd.f32 %v5840_v58, %v5839_v47  ;;  %v11591_v47 = vpack.c.bf16 %v10820_v45, %v10817_v20  ;;  %v10907_v45 = vld [vmem:[%s11352_s7 + $0x8] sm:$0xff] }
 0x491   : > { %v5929_v57 = vmul.f32 %v5897_v7, %v11590_v59  ;;  %v5787_v10 = vmul.f32 %v10885_v4, %v10885_v4  ;;  %7295 = vmatpush1.bf16.msra.mxu0 %v7294_v32 }
 0x492   : > { %v5834_v51 = vadd.f32 %v5833_v37, %v5832_v15  ;;  %v5812_v35 = vadd.f32 %v5811_v54, %v5786_v27  ;;  %v5842_v39 = vrot.slane %v5841_v52, 2  ;;  %v10899_v15 = vld [vmem:[%s11352_s7] sm:$0xff] }
 0x493   : > { %v7296_v62 = vpack.c.bf16 %v10827_v29, %v5929_v57  ;;  %v5821_v40 = vadd.f32 %v5820_v3, %v5787_v10  ;;  %v10915_v10 = vld [vmem:[%s11352_s7 + $0x10] sm:$0xff] }
 0x494   : > { %v5835_v22 = vrot.slane %v5834_v51, 1  ;;  %v5813_v63 = vrot.slane %v5812_v35, 4  ;;  %v5843_v1 = vadd.f32 %v5842_v39, %v5841_v52 }
 0x495   : > { %7297 = vmatprep.subr.bf16.mxu0 %v7296_v62  ;;  %v5822_v5 = vrot.slane %v5821_v40, 4 }
 0x496   : > { %v5836_v44 = vadd.f32 %v5835_v22, %v5834_v51  ;;  %7299 = vmatpush1.bf16.msra.mxu0 %v11591_v47  ;;  %v5814_v27 = vadd.f32 %v5813_v63, %v5812_v35  ;;  %v5844_v38 = vrot.slane %v5843_v1, 1 }
 0x497   : > { %v5823_v54 = vadd.f32 %v5822_v5, %v5821_v40  ;;  %v10923_v40 = vld [vmem:[%s11352_s7 + $0x18] sm:$0xff] }
 0x498   : > { %v5868_v29 = vmax.f32 %v5836_v44, 1e-24  ;;  %v5815_v3 = vrot.slane %v5814_v27, 2  ;;  %v5845_v58 = vadd.f32 %v5844_v38, %v5843_v1 }
 0x499   : > { %7202 = vmatmul.mubr.msk.f32.vlgmr.msra.gmra.mrb[48].mxu0 %vm5359_vm12, %v10899_v15  ;;  %v5824_v7 = vrot.slane %v5823_v54, 2 }
 0x49a   : > { %7624 = vrsqrt.f32 %v5868_v29  ;;  %6054 = vmatprep.mubr.f32.mxu0 %v11522_v0  ;;  %v5816_v20 = vadd.f32 %v5815_v3, %v5814_v27  ;;  %v5869_v37 = vmax.f32 %v5845_v58, 1e-24 }
 0x49b   : > { %v5825_v32 = vadd.f32 %v5824_v7, %v5823_v54 }
 0x49c   : > { %v5817_v52 = vrot.slane %v5816_v20, 1  ;;  %7626 = vrsqrt.f32 %v5869_v37 }
 0x49d   : > { %7203 = vmatmul.mubr.msk.f32.gmra.mrb[50].mxu0 %vm5359_vm12, %v10907_v45  ;;  %v5826_v57 = vrot.slane %v5825_v32, 1 }
 0x49e   : > { %6060 = vmatprep.mubr.f32.mxu0 %v11522_v0  ;;  %v5818_v51 = vadd.f32 %v5817_v52, %v5816_v20 }
 0x49f   : > { %v5827_v35 = vadd.f32 %v5826_v57, %v5825_v32 }
 0x4a0   : > { %v5866_v39 = vmax.f32 %v5818_v51, 1e-24 }
 0x4a1   : > { %7204 = vmatmul.mubr.msk.f32.gmra.mrb[52].mxu0 %vm5359_vm12, %v10915_v10  ;;  %v5867_v62 = vmax.f32 %v5827_v35, 1e-24 }
 0x4a2   : > { %6066 = vmatprep.mubr.f32.mxu0 %v11522_v0  ;;  %7628 = vrsqrt.f32 %v5866_v39 }
 0x4a3   : > { %7630 = vrsqrt.f32 %v5867_v62 }
 0x4a4   : > { %v7625_v22 = vpop.eup %7624 }
 0x4a5   : > { %v5705_v63 = vpop.f32.mrb[40].mxu1  ;;  %v5900_v1 = vmul.f32 %v7625_v22, %v10812_v11  ;;  %v5908_v5 = vmul.f32 %v7625_v22, %v10842_v49  ;;  %7205 = vmatmul.mubr.msk.f32.gmra.mrb[54].mxu0 %vm5359_vm12, %v10923_v40  ;;  %v5884_v44 = vmul.f32 %v7625_v22, %v10787_v28  ;;  %v5892_v47 = vmul.f32 %v7625_v22, %v10793_v26  ;;  %v11592_v49 = vld [vmem:[#allocation9_spill] sm:$0xff] }
 0x4a6   : > { %v5706_v27 = vadd.f32 %v5705_v63, %v10749_v21  ;;  %v5707_v38 = vpop.f32.mrb[41].mxu1  ;;  %6226 = vmatprep.mubr.f32.mxu0 %v11522_v0  ;;  %v7627_v54 = vpop.eup %7626 }
 0x4a7   : > { %v5708_v29 = vadd.f32 %v5707_v38, %v10749_v21  ;;  %v10935_v3 = vmul.f32 %v5900_v1, %v10565_v50  ;;  %v10938_v11 = vmul.f32 %v5908_v5, %v10573_v43  ;;  %v5916_v58 = vmul.f32 %v5884_v44, %v11592_v49 }
 0x4a8   : > { %v10941_v7 = vmax.f32 %v5706_v27, 0.0  ;;  %v5909_v28 = vmul.f32 %v7627_v54, %v10859_v8  ;;  %v5885_v26 = vmul.f32 %v7627_v54, %v10790_v12  ;;  %v5893_v20 = vmul.f32 %v7627_v54, %v10795_v9 }
 0x4a9   : > { %v10946_v37 = vmax.f32 %v5708_v29, 0.0  ;;  %v5711_v32 = vpop.f32.mrb[42].mxu1  ;;  %v7314_v21 = vpack.c.bf16 %v10938_v11, %v10935_v3  ;;  %v5924_v52 = vmul.f32 %v5892_v47, %v10557_v34  ;;  %v5901_v57 = vmul.f32 %v7627_v54, %v10822_v17 }
 0x4aa   : > { %v5712_v51 = vadd.f32 %v5711_v32, %v10753_v46  ;;  %v5713_v35 = vpop.f32.mrb[43].mxu1  ;;  %v5917_v39 = vmul.f32 %v5885_v26, %v10552_v13  ;;  %v5925_v12 = vmul.f32 %v5893_v20, %v10561_v55  ;;  %v5766_v62 = vmul.f32 %v10941_v7, %v10941_v7 }
 0x4ab   : > { %v5714_v8 = vadd.f32 %v5713_v35, %v10753_v46  ;;  %v7310_v9 = vpack.c.bf16 %v5924_v52, %v5916_v58  ;;  %v5941_v63 = vmul.f32 %v5909_v28, %v10577_v16  ;;  %v5767_v17 = vmul.f32 %v10946_v37, %v10946_v37 }
 0x4ac   : > { %v10958_v22 = vmax.f32 %v5712_v51, 0.0  ;;  %v7629_v1 = vpop.eup %7628  ;;  %v7308_v47 = vpack.c.bf16 %v5925_v12, %v5917_v39  ;;  %v5933_v46 = vmul.f32 %v5901_v57, %v10569_v23 }
 0x4ad   : > { %v10963_v5 = vmax.f32 %v5714_v8, 0.0  ;;  %v5717_v44 = vpop.f32.mrb[44].mxu1  ;;  %v7631_v27 = vpop.eup %7630  ;;  %v5898_v38 = vmul.f32 %v7629_v1, %v10866_v61  ;;  %v5906_v54 = vmul.f32 %v7629_v1, %v10881_v19 }
 0x4ae   : > { %v5774_v29 = vmul.f32 %v10958_v22, %v10958_v22  ;;  %v5718_v58 = vadd.f32 %v5717_v44, %v10763_v31  ;;  %v5719_v28 = vpop.f32.mrb[45].mxu1  ;;  %v5907_v26 = vmul.f32 %v7631_v27, %v10885_v4  ;;  %v5883_v52 = vmul.f32 %v7631_v27, %v10824_v24  ;;  %7309 = vmatprep.subr.bf16.mxu0 %v7308_v47 }
 0x4af   : > { %v5775_v20 = vmul.f32 %v10963_v5, %v10963_v5  ;;  %v5720_v32 = vadd.f32 %v5719_v28, %v10763_v31  ;;  %v5930_v61 = vmul.f32 %v5898_v38, %v10634_v41  ;;  %v5938_v19 = vmul.f32 %v5906_v54, %v10642_v18  ;;  %7311 = vmatpush1.bf16.msra.mxu0 %v7310_v9 }
 0x4b0   : > { %v5846_v57 = vadd.f32 %v5774_v29, %v5766_v62  ;;  %v10978_v51 = vmax.f32 %v5718_v58, 0.0  ;;  %v5939_v35 = vmul.f32 %v5907_v26, %v10646_v25  ;;  %v5891_v12 = vmul.f32 %v7631_v27, %v10849_v6 }
 0x4b1   : > { %v5855_v39 = vadd.f32 %v5775_v20, %v5767_v17  ;;  %v10981_v4 = vmax.f32 %v5720_v32, 0.0  ;;  %v5723_v8 = vpop.f32.mrb[46].mxu1  ;;  %v7306_v31 = vpack.c.bf16 %v5938_v19, %v5930_v61  ;;  %v5915_v62 = vmul.f32 %v5883_v52, %v10583_v42 }
 0x4b2   : > { %v5782_v24 = vmul.f32 %v10978_v51, %v10978_v51  ;;  %v5724_v44 = vadd.f32 %v5723_v8, %v10777_v30  ;;  %v5725_v47 = vpop.f32.mrb[47].mxu1  ;;  %v5923_v17 = vmul.f32 %v5891_v12, %v10628_v48  ;;  %v5882_v54 = vmul.f32 %v7629_v1, %v10814_v2 }
 0x4b3   : > { %v5783_v9 = vmul.f32 %v10981_v4, %v10981_v4  ;;  %v5726_v38 = vadd.f32 %v5725_v47, %v10777_v30  ;;  %v5890_v58 = vmul.f32 %v7629_v1, %v10844_v53  ;;  %v5899_v28 = vmul.f32 %v7631_v27, %v10871_v60 }
 0x4b4   : > { %v5847_v29 = vadd.f32 %v5846_v57, %v5782_v24  ;;  %v5758_v6 = vmax.f32 %v5724_v44, 0.0  ;;  %v7300_v32 = vpack.c.bf16 %v5923_v17, %v5915_v62  ;;  %v5914_v52 = vmul.f32 %v5882_v54, %v10580_v14 }
 0x4b5   : > { %v5856_v26 = vadd.f32 %v5855_v39, %v5783_v9  ;;  %v5759_v20 = vmax.f32 %v5726_v38, 0.0  ;;  %v5922_v19 = vmul.f32 %v5890_v58, %v10594_v56  ;;  %v5931_v30 = vmul.f32 %v5899_v28, %v10638_v33 }
 0x4b6   : > { %v5790_v61 = vmul.f32 %v5758_v6, %v5758_v6  ;;  %v7312_v8 = vpack.c.bf16 %v5941_v63, %v5933_v46  ;;  %7301 = vmatprep.subr.bf16.mxu1 %v7300_v32 }
 0x4b7   : > { %v5791_v12 = vmul.f32 %v5759_v20, %v5759_v20  ;;  %v7302_v57 = vpack.c.bf16 %v5922_v19, %v5914_v52  ;;  %v7304_v24 = vpack.c.bf16 %v5939_v35, %v5931_v30  ;;  %v11594_v30 = vld [vmem:[#allocation26_spill] sm:$0xff] }
 0x4b8   : > { %v5848_v2 = vadd.f32 %v5847_v29, %v5790_v61  ;;  %7313 = vmatprep.subr.bf16.mxu0 %v7312_v8  ;;  %v11593_v61 = vld [vmem:[#allocation24_spill] sm:$0xff] }
 0x4b9   : > { %v5857_v53 = vadd.f32 %v5856_v26, %v5791_v12  ;;  %7315 = vmatpush1.bf16.msra.mxu0 %v7314_v21  ;;  %7303 = vmatpush1.bf16.msra.mxu1 %v7302_v57  ;;  %v11595_v12 = vld [vmem:[#allocation10_spill] sm:$0xff] }
 0x4ba   : > { %v5849_v60 = vrot.slane %v5848_v2, 4  ;;  %7305 = vmatprep.subr.bf16.mxu1 %v7304_v24  ;;  %v11596_v57 = vld [vmem:[#allocation22_spill] sm:$0xff] }
 0x4bb   : > { %v5858_v1 = vrot.slane %v5857_v53, 4 }
 0x4bc   : > { %v5850_v27 = vadd.f32 %v5849_v60, %v5848_v2  ;;  %7210 = vmatmul.mubr.msk.f32.vlgmr.msra.gmra.mrb[56].mxu0 %vm5359_vm12, %v10899_v15  ;;  %v11600_v60 = vld [vmem:[#allocation25_spill] sm:$0xff] }
 0x4bd   : > { %v5859_v63 = vadd.f32 %v5858_v1, %v5857_v53  ;;  %6232 = vmatprep.mubr.f32.mxu0 %v11522_v0  ;;  %7307 = vmatpush1.bf16.msra.mxu1 %v7306_v31 }
 0x4be   : > { %v5851_v46 = vrot.slane %v5850_v27, 2 }
 0x4bf   : > { %v5860_v35 = vrot.slane %v5859_v63, 2 }
 0x4c0   : > { %v5852_v39 = vadd.f32 %v5851_v46, %v5850_v27  ;;  %7211 = vmatmul.mubr.msk.f32.gmra.mrb[58].mxu0 %vm5359_vm12, %v10907_v45  ;;  %7206 = vmatmul.mubr.msk.f32.vlgmr.msra.gmra.mrb[48].mxu1 %vm5359_vm12, %v10899_v15 }
 0x4c1   : > { %v5861_v3 = vadd.f32 %v5860_v35, %v5859_v63  ;;  %6238 = vmatprep.mubr.f32.mxu0 %v11522_v0  ;;  %6143 = vmatprep.mubr.f32.mxu1 %v11522_v0  ;;  %v11051_v63 = vpop.permute.xlu0 %5954 }
 0x4c2   : > { %v5853_v11 = vrot.slane %v5852_v39, 1 }
 0x4c3   : > { %v5862_v21 = vrot.slane %v5861_v3, 1 }
 0x4c4   : > { %v5854_v44 = vadd.f32 %v5853_v11, %v5852_v39  ;;  %7212 = vmatmul.mubr.msk.f32.gmra.mrb[60].mxu0 %vm5359_vm12, %v10915_v10  ;;  %7207 = vmatmul.mubr.msk.f32.gmra.mrb[50].mxu1 %vm5359_vm12, %v10907_v45  ;;  %v11055_v39 = vpop.permute.xlu1 %5959 }
 0x4c5   : > { %v5863_v31 = vadd.f32 %v5862_v21, %v5861_v3  ;;  %6244 = vmatprep.mubr.f32.mxu0 %v11522_v0  ;;  %6149 = vmatprep.mubr.f32.mxu1 %v11522_v0 }
 0x4c6   : > { %v5870_v47 = vmax.f32 %v5854_v44, 1e-24 }
 0x4c7   : > { %v5871_v62 = vmax.f32 %v5863_v31, 1e-24 }
 0x4c8   : > { %7632 = vrsqrt.f32 %v5870_v47  ;;  %7213 = vmatmul.mubr.msk.f32.gmra.mrb[62].mxu0 %vm5359_vm12, %v10923_v40  ;;  %7208 = vmatmul.mubr.msk.f32.gmra.mrb[52].mxu1 %vm5359_vm12, %v10915_v10  ;;  %v11065_v47 = vpop.permute.xlu0 %5964 }
 0x4c9   : > { %7634 = vrsqrt.f32 %v5871_v62  ;;  %6634 = vmatprep.mubr.f32.mxu0 %v11522_v0  ;;  %6155 = vmatprep.mubr.f32.mxu1 %v11522_v0 }
 0x4cc   : > { %7209 = vmatmul.mubr.msk.f32.gmra.mrb[54].mxu1 %vm5359_vm12, %v10923_v40 }
 0x4cd   : > { %6315 = vmatprep.mubr.f32.mxu1 %v11522_v0 }
 0x4d2   : > { %v7633_v9 = vpop.eup %7632 }
 0x4d3   : > { %v7635_v38 = vpop.eup %7634  ;;  %v5902_v17 = vmul.f32 %v7633_v9, %v10978_v51  ;;  %v5910_v54 = vmul.f32 %v7633_v9, %v5758_v6  ;;  %v5886_v29 = vmul.f32 %v7633_v9, %v10941_v7  ;;  %v5894_v58 = vmul.f32 %v7633_v9, %v10958_v22  ;;  %v11597_v6 = vld [vmem:[#allocation27_spill] sm:$0xff]  ;;  %v11598_v7 = vld [vmem:[#allocation16_spill] sm:$0xff] }
 0x4d4   : > { %v5911_v28 = vmul.f32 %v7635_v38, %v5759_v20  ;;  %v5887_v26 = vmul.f32 %v7635_v38, %v10946_v37  ;;  %v5895_v32 = vmul.f32 %v7635_v38, %v10963_v5  ;;  %v5903_v52 = vmul.f32 %v7635_v38, %v10981_v4  ;;  %v11599_v22 = vld [vmem:[#allocation23_spill] sm:$0xff] }
 0x4d5   : > { %v5934_v19 = vmul.f32 %v5902_v17, %v11593_v61  ;;  %v5942_v8 = vmul.f32 %v5910_v54, %v11594_v30  ;;  %v5918_v2 = vmul.f32 %v5886_v29, %v11595_v12  ;;  %v5926_v51 = vmul.f32 %v5894_v58, %v11596_v57  ;;  %v11604_v12 = vld [vmem:[#allocation11_spill] sm:$0xff] }
 0x4d6   : > { %v5943_v24 = vmul.f32 %v5911_v28, %v11597_v6  ;;  %v5919_v53 = vmul.f32 %v5887_v26, %v11598_v7  ;;  %v5927_v20 = vmul.f32 %v5895_v32, %v11599_v22  ;;  %v5935_v37 = vmul.f32 %v5903_v52, %v11600_v60  ;;  %v11603_v6 = vld [vmem:[#allocation12_spill] sm:$0xff] }
 0x4d7   : > { %v7322_v1 = vpack.c.bf16 %v5942_v8, %v5934_v19  ;;  %v7318_v5 = vpack.c.bf16 %v5926_v51, %v5918_v2  ;;  %v11081_v19 = vpop.permute.xlu1 %5969 }
 0x4d8   : > { %v7316_v27 = vpack.c.bf16 %v5927_v20, %v5919_v53  ;;  %v7320_v4 = vpack.c.bf16 %v5943_v24, %v5935_v37 }
 0x4da   : > { %7317 = vmatprep.subr.bf16.mxu1 %v7316_v27 }
 0x4db   : > { %7319 = vmatpush1.bf16.msra.mxu1 %v7318_v5 }
 0x4dc   : > { %7321 = vmatprep.subr.bf16.mxu1 %v7320_v4 }
 0x4df   : > { %7323 = vmatpush1.bf16.msra.mxu1 %v7322_v1 }
 0x4e2   : > { %7214 = vmatmul.mubr.msk.f32.vlgmr.msra.gmra.mrb[56].mxu1 %vm5359_vm12, %v10899_v15 }
 0x4e3   : > { %6321 = vmatprep.mubr.f32.mxu1 %v11522_v0 }
 0x4e6   : > { %7215 = vmatmul.mubr.msk.f32.gmra.mrb[58].mxu1 %vm5359_vm12, %v10907_v45 }
 0x4e7   : > { %6327 = vmatprep.mubr.f32.mxu1 %v11522_v0 }
 0x4ea   : > { %7216 = vmatmul.mubr.msk.f32.gmra.mrb[60].mxu1 %vm5359_vm12, %v10915_v10 }
 0x4eb   : > { %6333 = vmatprep.mubr.f32.mxu1 %v11522_v0 }
 0x4ee   : > { %7217 = vmatmul.mubr.msk.f32.gmra.mrb[62].mxu1 %vm5359_vm12, %v10923_v40 }
 0x4ef   : > { %6705 = vmatprep.mubr.f32.mxu1 %v11522_v0 }
 0x56c   : > { %v6050_v15 = vpop.f32.mrb[48].mxu0 }
 0x56d   : > { %v6051_v46 = vadd.f32 %v6050_v15, %v11051_v63  ;;  %v6052_v35 = vpop.f32.mrb[49].mxu0 }
 0x56e   : > { %v6053_v45 = vadd.f32 %v6052_v35, %v11051_v63 }
 0x56f   : > { %v11057_v11 = vmax.f32 %v6051_v46, 0.0 }
 0x570   : > { %v6056_v3 = vpop.f32.mrb[50].mxu0  ;;  %v11060_v44 = vmax.f32 %v6053_v45, 0.0 }
 0x571   : > { %v6057_v10 = vadd.f32 %v6056_v3, %v11055_v39  ;;  %v6058_v21 = vpop.f32.mrb[51].mxu0  ;;  %v6372_v38 = vmul.f32 %v11057_v11, %v11057_v11 }
 0x572   : > { %v6059_v40 = vadd.f32 %v6058_v21, %v11055_v39  ;;  %v6373_v58 = vmul.f32 %v11060_v44, %v11060_v44 }
 0x573   : > { %v11063_v31 = vmax.f32 %v6057_v10, 0.0 }
 0x574   : > { %v11067_v62 = vmax.f32 %v6059_v40, 0.0  ;;  %v6062_v9 = vpop.f32.mrb[52].mxu0 }
 0x575   : > { %v6380_v17 = vmul.f32 %v11063_v31, %v11063_v31  ;;  %v6063_v54 = vadd.f32 %v6062_v9, %v11065_v47  ;;  %v6064_v29 = vpop.f32.mrb[53].mxu0 }
 0x576   : > { %v6381_v28 = vmul.f32 %v11067_v62, %v11067_v62  ;;  %v6065_v26 = vadd.f32 %v6064_v29, %v11065_v47 }
 0x577   : > { %v6404_v32 = vadd.f32 %v6380_v17, %v6372_v38  ;;  %v11079_v52 = vmax.f32 %v6063_v54, 0.0 }
 0x578   : > { %v6413_v8 = vadd.f32 %v6381_v28, %v6373_v58  ;;  %v11083_v2 = vmax.f32 %v6065_v26, 0.0  ;;  %v6068_v51 = vpop.f32.mrb[54].mxu0 }
 0x579   : > { %v6388_v24 = vmul.f32 %v11079_v52, %v11079_v52  ;;  %v6069_v53 = vadd.f32 %v6068_v51, %v11081_v19  ;;  %v6070_v20 = vpop.f32.mrb[55].mxu0 }
 0x57a   : > { %v6389_v37 = vmul.f32 %v11083_v2, %v11083_v2  ;;  %v6071_v1 = vadd.f32 %v6070_v20, %v11081_v19 }
 0x57b   : > { %v6405_v5 = vadd.f32 %v6404_v32, %v6388_v24  ;;  %v6364_v27 = vmax.f32 %v6069_v53, 0.0 }
 0x57c   : > { %v6414_v4 = vadd.f32 %v6413_v8, %v6389_v37  ;;  %v6365_v15 = vmax.f32 %v6071_v1, 0.0 }
 0x57d   : > { %v6396_v46 = vmul.f32 %v6364_v27, %v6364_v27 }
 0x57e   : > { %v6397_v35 = vmul.f32 %v6365_v15, %v6365_v15 }
 0x57f   : > { %v6406_v45 = vadd.f32 %v6405_v5, %v6396_v46 }
 0x580   : > { %v6415_v3 = vadd.f32 %v6414_v4, %v6397_v35 }
 0x581   : > { %v6407_v10 = vrot.slane %v6406_v45, 4 }
 0x582   : > { %v6416_v21 = vrot.slane %v6415_v3, 4 }
 0x583   : > { %v6408_v40 = vadd.f32 %v6407_v10, %v6406_v45 }
 0x584   : > { %v6417_v9 = vadd.f32 %v6416_v21, %v6415_v3 }
 0x585   : > { %v6409_v38 = vrot.slane %v6408_v40, 2 }
 0x586   : > { %v6418_v17 = vrot.slane %v6417_v9, 2 }
 0x587   : > { %v6410_v54 = vadd.f32 %v6409_v38, %v6408_v40 }
 0x588   : > { %v6419_v29 = vadd.f32 %v6418_v17, %v6417_v9 }
 0x589   : > { %v6411_v58 = vrot.slane %v6410_v54, 1 }
 0x58a   : > { %v6420_v28 = vrot.slane %v6419_v29, 1 }
 0x58b   : > { %v6412_v26 = vadd.f32 %v6411_v58, %v6410_v54 }
 0x58c   : > { %v6421_v51 = vadd.f32 %v6420_v28, %v6419_v29 }
 0x58d   : > { %v6476_v32 = vmax.f32 %v6412_v26, 1e-24 }
 0x58e   : > { %v6477_v24 = vmax.f32 %v6421_v51, 1e-24 }
 0x58f   : > { %7636 = vrsqrt.f32 %v6476_v32  ;;  %v6228_v8 = vpop.f32.mrb[56].mxu0 }
 0x590   : > { %7638 = vrsqrt.f32 %v6477_v24  ;;  %v6229_v53 = vadd.f32 %v6228_v8, %v11051_v63  ;;  %v6230_v20 = vpop.f32.mrb[57].mxu0 }
 0x591   : > { %v6231_v37 = vadd.f32 %v6230_v20, %v11051_v63 }
 0x592   : > { %v11093_v1 = vmax.f32 %v6229_v53, 0.0 }
 0x593   : > { %v6234_v5 = vpop.f32.mrb[58].mxu0  ;;  %v6139_v4 = vpop.f32.mrb[48].mxu1  ;;  %v11095_v46 = vmax.f32 %v6231_v37, 0.0 }
 0x594   : > { %11601 = vst [vmem:[#allocation13_spill] sm:$0xff] %v11093_v1  ;;  %v6235_v35 = vadd.f32 %v6234_v5, %v11055_v39  ;;  %v6236_v45 = vpop.f32.mrb[59].mxu0  ;;  %v6140_v3 = vadd.f32 %v6139_v4, %v11051_v63  ;;  %v6141_v10 = vpop.f32.mrb[49].mxu1  ;;  %v6376_v17 = vmul.f32 %v11093_v1, %v11093_v1 }
 0x595   : > { %v6237_v21 = vadd.f32 %v6236_v45, %v11055_v39  ;;  %v6142_v40 = vadd.f32 %v6141_v10, %v11051_v63  ;;  %v6377_v26 = vmul.f32 %v11095_v46, %v11095_v46 }
 0x596   : > { %v11101_v9 = vmax.f32 %v6235_v35, 0.0  ;;  %v11103_v38 = vmax.f32 %v6140_v3, 0.0 }
 0x597   : > { %v11107_v54 = vmax.f32 %v6237_v21, 0.0  ;;  %v6240_v29 = vpop.f32.mrb[60].mxu0  ;;  %v11109_v58 = vmax.f32 %v6142_v40, 0.0  ;;  %v6145_v28 = vpop.f32.mrb[50].mxu1 }
 0x598   : > { %11602 = vst [vmem:[#allocation20_spill] sm:$0xff] %v11101_v9  ;;  %v6384_v51 = vmul.f32 %v11101_v9, %v11101_v9  ;;  %v6241_v32 = vadd.f32 %v6240_v29, %v11065_v47  ;;  %v6242_v24 = vpop.f32.mrb[61].mxu0  ;;  %v6374_v53 = vmul.f32 %v11103_v38, %v11103_v38  ;;  %v6146_v20 = vadd.f32 %v6145_v28, %v11055_v39  ;;  %v6147_v37 = vpop.f32.mrb[51].mxu1 }
 0x599   : > { %v11116_v8 = vpop.eup %7636  ;;  %v6385_v5 = vmul.f32 %v11107_v54, %v11107_v54  ;;  %v6243_v4 = vadd.f32 %v6242_v24, %v11065_v47  ;;  %v6375_v45 = vmul.f32 %v11109_v58, %v11109_v58  ;;  %v6148_v3 = vadd.f32 %v6147_v37, %v11055_v39 }
 0x59a   : > { %v7639_v35 = vpop.eup %7638  ;;  %v6508_v10 = vmul.f32 %v11116_v8, %v11079_v52  ;;  %v6516_v21 = vmul.f32 %v11116_v8, %v6364_v27  ;;  %v11130_v40 = vmax.f32 %v6146_v20, 0.0  ;;  %v6440_v28 = vadd.f32 %v6384_v51, %v6376_v17 }
 0x59b   : > { %v6517_v29 = vmul.f32 %v7639_v35, %v6365_v15  ;;  %v6449_v60 = vadd.f32 %v6385_v5, %v6377_v26  ;;  %v6246_v22 = vpop.f32.mrb[62].mxu0  ;;  %v11132_v7 = vmax.f32 %v6148_v3, 0.0  ;;  %v6151_v24 = vpop.f32.mrb[52].mxu1  ;;  %v11140_v37 = vmax.f32 %v6241_v32, 0.0  ;;  %v11605_v26 = vld [vmem:[#allocation21_spill] sm:$0xff] }
 0x59c   : > { %v11135_v57 = vmul.f32 %v6508_v10, %v11603_v6  ;;  %v11138_v30 = vmul.f32 %v6516_v21, %v11604_v12  ;;  %v6248_v52 = vpop.f32.mrb[63].mxu0  ;;  %v6382_v27 = vmul.f32 %v11130_v40, %v11130_v40  ;;  %v6152_v15 = vadd.f32 %v6151_v24, %v11065_v47  ;;  %v6153_v17 = vpop.f32.mrb[53].mxu1 }
 0x59d   : > { %v6549_v51 = vmul.f32 %v6517_v29, %v11605_v26  ;;  %v11146_v20 = vmax.f32 %v6243_v4, 0.0  ;;  %v6383_v6 = vmul.f32 %v11132_v7, %v11132_v7  ;;  %v6154_v5 = vadd.f32 %v6153_v17, %v11065_v47 }
 0x59e   : > { %v6392_v32 = vmul.f32 %v11140_v37, %v11140_v37  ;;  %v6422_v3 = vadd.f32 %v6382_v27, %v6374_v53  ;;  %v11155_v10 = vmax.f32 %v6152_v15, 0.0  ;;  %v6247_v4 = vadd.f32 %v6246_v22, %v11081_v19 }
 0x59f   : > { %11606 = vst [vmem:[#allocation12_spill] sm:$0xff] %v11146_v20  ;;  %v6393_v21 = vmul.f32 %v11146_v20, %v11146_v20  ;;  %v6431_v29 = vadd.f32 %v6383_v6, %v6375_v45  ;;  %v11160_v24 = vmax.f32 %v6154_v5, 0.0  ;;  %v6157_v26 = vpop.f32.mrb[54].mxu1  ;;  %v6249_v17 = vadd.f32 %v6248_v52, %v11081_v19  ;;  %v11609_v20 = vld [vmem:[#allocation18_spill] sm:$0xff] }
 0x5a0   : > { %v6441_v61 = vadd.f32 %v6440_v28, %v6392_v32  ;;  %v6390_v12 = vmul.f32 %v11155_v10, %v11155_v10  ;;  %v6158_v23 = vadd.f32 %v6157_v26, %v11081_v19  ;;  %v6159_v53 = vpop.f32.mrb[55].mxu1  ;;  %v11166_v15 = vmax.f32 %v6247_v4, 0.0  ;;  %v11607_v26 = vld [vmem:[#allocation7_spill] sm:$0xff] }
 0x5a1   : > { %v6450_v27 = vadd.f32 %v6449_v60, %v6393_v21  ;;  %v6391_v34 = vmul.f32 %v11160_v24, %v11160_v24  ;;  %v6160_v22 = vadd.f32 %v6159_v53, %v11081_v19  ;;  %v11171_v45 = vmax.f32 %v6249_v17, 0.0 }
 0x5a2   : > { %v6493_v28 = vmul.f32 %v7639_v35, %v11060_v44  ;;  %v6423_v6 = vadd.f32 %v6422_v3, %v6390_v12  ;;  %v11174_v52 = vmax.f32 %v6158_v23, 0.0  ;;  %v6400_v5 = vmul.f32 %v11166_v15, %v11166_v15  ;;  %v11608_v12 = vld [vmem:[#allocation19_spill] sm:$0xff] }
 0x5a3   : > { %v6501_v32 = vmul.f32 %v7639_v35, %v11067_v62  ;;  %v6432_v60 = vadd.f32 %v6431_v29, %v6391_v34  ;;  %v11179_v21 = vmax.f32 %v6160_v22, 0.0  ;;  %v6401_v4 = vmul.f32 %v11171_v45, %v11171_v45 }
 0x5a4   : > { %v6525_v53 = vmul.f32 %v6493_v28, %v11607_v26  ;;  %v6398_v17 = vmul.f32 %v11174_v52, %v11174_v52  ;;  %v6442_v44 = vadd.f32 %v6441_v61, %v6400_v5  ;;  %v6492_v3 = vmul.f32 %v11116_v8, %v11057_v11 }
 0x5a5   : > { %v6533_v23 = vmul.f32 %v6501_v32, %v11608_v12  ;;  %v6399_v62 = vmul.f32 %v11179_v21, %v11179_v21  ;;  %v6451_v34 = vadd.f32 %v6450_v27, %v6401_v4  ;;  %v6500_v29 = vmul.f32 %v11116_v8, %v11063_v31 }
 0x5a6   : > { %v6509_v22 = vmul.f32 %v7639_v35, %v11083_v2  ;;  %v6424_v49 = vadd.f32 %v6423_v6, %v6398_v17  ;;  %v6443_v28 = vrot.slane %v6442_v44, 4  ;;  %v6524_v9 = vmul.f32 %v6492_v3, %v11609_v20 }
 0x5a7   : > { %v7324_v26 = vpack.c.bf16 %v6533_v23, %v6525_v53  ;;  %v6433_v61 = vadd.f32 %v6432_v60, %v6399_v62  ;;  %v6452_v5 = vrot.slane %v6451_v34, 4  ;;  %v6532_v32 = vmul.f32 %v6500_v29, %v11589_v36 }
 0x5a8   : > { %v6541_v11 = vmul.f32 %v6509_v22, %v11590_v59  ;;  %v6425_v12 = vrot.slane %v6424_v49, 4  ;;  %v6444_v1 = vadd.f32 %v6443_v28, %v6442_v44  ;;  %v11610_v44 = vpack.c.bf16 %v11138_v30, %v11135_v57 }
 0x5a9   : > { %7325 = vmatprep.subr.bf16.mxu0 %v7324_v26  ;;  %v6434_v27 = vrot.slane %v6433_v61, 4  ;;  %v6453_v4 = vadd.f32 %v6452_v5, %v6451_v34  ;;  %v7326_v55 = vpack.c.bf16 %v6532_v32, %v6524_v9 }
 0x5aa   : > { %v7328_v31 = vpack.c.bf16 %v6549_v51, %v6541_v11  ;;  %v6426_v8 = vadd.f32 %v6425_v12, %v6424_v49  ;;  %v6445_v2 = vrot.slane %v6444_v1, 2  ;;  %v11203_v49 = vld [vmem:[%s11354_s9] sm:$0x1] }
 0x5ab   : > { %v6435_v35 = vadd.f32 %v6434_v27, %v6433_v61  ;;  %v6454_v6 = vrot.slane %v6453_v4, 2  ;;  %7327 = vmatpush1.bf16.msra.mxu0 %v7326_v55 }
 0x5ac   : > { %v6427_v53 = vrot.slane %v6426_v8, 2  ;;  %v6446_v20 = vadd.f32 %v6445_v2, %v6444_v1  ;;  %7329 = vmatprep.subr.bf16.mxu0 %v7328_v31 }
 0x5ad   : > { %v6436_v60 = vrot.slane %v6435_v35, 2  ;;  %v6455_v17 = vadd.f32 %v6454_v6, %v6453_v4 }
 0x5ae   : > { %v6428_v36 = vadd.f32 %v6427_v53, %v6426_v8  ;;  %v6447_v23 = vrot.slane %v6446_v20, 1 }
 0x5af   : > { %v6437_v59 = vadd.f32 %v6436_v60, %v6435_v35  ;;  %v6456_v3 = vrot.slane %v6455_v17, 1  ;;  %7331 = vmatpush1.bf16.msra.mxu0 %v11610_v44 }
 0x5b0   : > { %v6429_v9 = vrot.slane %v6428_v36, 1  ;;  %v6448_v55 = vadd.f32 %v6447_v23, %v6446_v20 }
 0x5b1   : > { %v6438_v51 = vrot.slane %v6437_v59, 1  ;;  %v6457_v1 = vadd.f32 %v6456_v3, %v6455_v17 }
 0x5b2   : > { %v6430_v62 = vadd.f32 %v6429_v9, %v6428_v36  ;;  %v6480_v34 = vmax.f32 %v6448_v55, 1e-24  ;;  %7218 = vmatmul.mubr.msk.f32.vlgmr.msra.gmra.mrb[64].mxu0 %vm5359_vm12, %v11203_v49 }
 0x5b3   : > { %v6439_v29 = vadd.f32 %v6438_v51, %v6437_v59  ;;  %v6481_v22 = vmax.f32 %v6457_v1, 1e-24  ;;  %6776 = vmatprep.mubr.f32.mxu0 %v11522_v0 }
 0x5b4   : > { %v6478_v30 = vmax.f32 %v6430_v62, 1e-24  ;;  %7640 = vrsqrt.f32 %v6480_v34 }
 0x5b5   : > { %v6317_v57 = vpop.f32.mrb[56].mxu1  ;;  %v6479_v28 = vmax.f32 %v6439_v29, 1e-24  ;;  %7642 = vrsqrt.f32 %v6481_v22 }
 0x5b6   : > { %v6318_v26 = vadd.f32 %v6317_v57, %v11051_v63  ;;  %v6319_v61 = vpop.f32.mrb[57].mxu1  ;;  %7644 = vrsqrt.f32 %v6478_v30 }
 0x5b7   : > { %v6320_v5 = vadd.f32 %v6319_v61, %v11051_v63  ;;  %7646 = vrsqrt.f32 %v6479_v28 }
 0x5b8   : > { %v11210_v11 = vmax.f32 %v6318_v26, 0.0 }
 0x5b9   : > { %v6323_v32 = vpop.f32.mrb[58].mxu1  ;;  %v11213_v4 = vmax.f32 %v6320_v5, 0.0 }
 0x5ba   : > { %v6324_v12 = vadd.f32 %v6323_v32, %v11055_v39  ;;  %v6325_v27 = vpop.f32.mrb[59].mxu1  ;;  %v6378_v6 = vmul.f32 %v11210_v11, %v11210_v11 }
 0x5bb   : > { %v6326_v31 = vadd.f32 %v6325_v27, %v11055_v39  ;;  %v6379_v17 = vmul.f32 %v11213_v4, %v11213_v4 }
 0x5bc   : > { %v11216_v8 = vmax.f32 %v6324_v12, 0.0 }
 0x5bd   : > { %v11218_v2 = vmax.f32 %v6326_v31, 0.0  ;;  %v6329_v35 = vpop.f32.mrb[60].mxu1 }
 0x5be   : > { %v6386_v63 = vmul.f32 %v11216_v8, %v11216_v8  ;;  %v6330_v53 = vadd.f32 %v6329_v35, %v11065_v47  ;;  %v6331_v20 = vpop.f32.mrb[61].mxu1  ;;  %v7641_v60 = vpop.eup %7640 }
 0x5bf   : > { %v6387_v39 = vmul.f32 %v11218_v2, %v11218_v2  ;;  %v6332_v36 = vadd.f32 %v6331_v20, %v11065_v47  ;;  %v7643_v23 = vpop.eup %7642  ;;  %v6512_v44 = vmul.f32 %v7641_v60, %v11140_v37  ;;  %v6520_v9 = vmul.f32 %v7641_v60, %v11166_v15 }
 0x5c0   : > { %v6458_v59 = vadd.f32 %v6386_v63, %v6378_v6  ;;  %v11230_v3 = vmax.f32 %v6330_v53, 0.0  ;;  %v7645_v55 = vpop.eup %7644  ;;  %v6521_v34 = vmul.f32 %v7643_v23, %v11171_v45  ;;  %v6497_v29 = vmul.f32 %v7643_v23, %v11095_v46 }
 0x5c1   : > { %v6467_v51 = vadd.f32 %v6387_v39, %v6379_v17  ;;  %v11234_v1 = vmax.f32 %v6332_v36, 0.0  ;;  %v6335_v62 = vpop.f32.mrb[62].mxu1  ;;  %v7647_v22 = vpop.eup %7646  ;;  %v6510_v47 = vmul.f32 %v7645_v55, %v11155_v10  ;;  %v6518_v30 = vmul.f32 %v7645_v55, %v11174_v52  ;;  %v11611_v36 = vld [vmem:[#allocation15_spill] sm:$0xff] }
 0x5c2   : > { %v6394_v57 = vmul.f32 %v11230_v3, %v11230_v3  ;;  %v11243_v37 = vmul.f32 %v6512_v44, %v10565_v50  ;;  %v6337_v15 = vpop.f32.mrb[63].mxu1  ;;  %v6519_v28 = vmul.f32 %v7647_v22, %v11179_v21  ;;  %v6552_v45 = vmul.f32 %v6520_v9, %v10573_v43  ;;  %v11612_v9 = vld [vmem:[#allocation13_spill] sm:$0xff] }
 0x5c3   : > { %v6395_v26 = vmul.f32 %v11234_v1, %v11234_v1  ;;  %v6336_v46 = vadd.f32 %v6335_v62, %v11081_v19  ;;  %v6542_v10 = vmul.f32 %v6510_v47, %v10634_v41  ;;  %v6550_v52 = vmul.f32 %v6518_v30, %v10642_v18  ;;  %v11614_v62 = vld [vmem:[#allocation12_spill] sm:$0xff]  ;;  %v11617_v30 = vld [vmem:[#allocation14_spill] sm:$0xff] }
 0x5c4   : > { %v6459_v61 = vadd.f32 %v6458_v59, %v6394_v57  ;;  %v6553_v5 = vmul.f32 %v6521_v34, %v10577_v16  ;;  %v6551_v50 = vmul.f32 %v6519_v28, %v10646_v25  ;;  %v7346_v12 = vpack.c.bf16 %v6552_v45, %v11243_v37 }
 0x5c5   : > { %v6468_v32 = vadd.f32 %v6467_v51, %v6395_v26  ;;  %v6370_v21 = vmax.f32 %v6336_v46, 0.0  ;;  %v7338_v27 = vpack.c.bf16 %v6550_v52, %v6542_v10  ;;  %v6338_v31 = vadd.f32 %v6337_v15, %v11081_v19  ;;  %v11613_v51 = vld [vmem:[#allocation20_spill] sm:$0xff] }
 0x5c6   : > { %v6495_v43 = vmul.f32 %v7647_v22, %v11109_v58  ;;  %v6503_v35 = vmul.f32 %v7647_v22, %v11132_v7  ;;  %v6494_v41 = vmul.f32 %v7645_v55, %v11103_v38  ;;  %v6502_v18 = vmul.f32 %v7645_v55, %v11130_v40 }
 0x5c7   : > { %v6402_v6 = vmul.f32 %v6370_v21, %v6370_v21  ;;  %v6511_v16 = vmul.f32 %v7647_v22, %v11160_v24  ;;  %v6371_v63 = vmax.f32 %v6338_v31, 0.0  ;;  %v6505_v20 = vmul.f32 %v7643_v23, %v11107_v54 }
 0x5c8   : > { %v6527_v25 = vmul.f32 %v6495_v43, %v10583_v42  ;;  %v6535_v53 = vmul.f32 %v6503_v35, %v10628_v48  ;;  %v6526_v19 = vmul.f32 %v6494_v41, %v10580_v14  ;;  %v6534_v58 = vmul.f32 %v6502_v18, %v10594_v56 }
 0x5c9   : > { %v6460_v17 = vadd.f32 %v6459_v61, %v6402_v6  ;;  %v6543_v7 = vmul.f32 %v6511_v16, %v10638_v33  ;;  %v6403_v39 = vmul.f32 %v6371_v63, %v6371_v63  ;;  %v6529_v40 = vmul.f32 %v6497_v29, %v10552_v13  ;;  %v11615_v33 = vld [vmem:[#allocation9_spill] sm:$0xff]  ;;  %v11620_v16 = vld [vmem:[#allocation10_spill] sm:$0xff] }
 0x5ca   : > { %v7332_v38 = vpack.c.bf16 %v6535_v53, %v6527_v25  ;;  %v6537_v24 = vmul.f32 %v6505_v20, %v11611_v36  ;;  %v7334_v44 = vpack.c.bf16 %v6534_v58, %v6526_v19  ;;  %v6496_v48 = vmul.f32 %v7641_v60, %v11612_v9  ;;  %v11616_v13 = vld [vmem:[#allocation17_spill] sm:$0xff]  ;;  %v11621_v53 = vld [vmem:[#allocation22_spill] sm:$0xff] }
 0x5cb   : > { %v6461_v59 = vrot.slane %v6460_v17, 4  ;;  %v7336_v42 = vpack.c.bf16 %v6551_v50, %v6543_v7  ;;  %v6469_v55 = vadd.f32 %v6468_v32, %v6403_v39  ;;  %v6504_v14 = vmul.f32 %v7641_v60, %v11613_v51  ;;  %v11622_v7 = vld [vmem:[#allocation27_spill] sm:$0xff]  ;;  %v11623_v39 = vld [vmem:[#allocation16_spill] sm:$0xff] }
 0x5cc   : > { %7333 = vmatprep.subr.bf16.mxu1 %v7332_v38  ;;  %v7340_v54 = vpack.c.bf16 %v6537_v24, %v6529_v40  ;;  %v6513_v56 = vmul.f32 %v7643_v23, %v11614_v62  ;;  %v6528_v22 = vmul.f32 %v6496_v48, %v11615_v33  ;;  %v11624_v40 = vld [vmem:[#allocation23_spill] sm:$0xff]  ;;  %v11625_v24 = vld [vmem:[#allocation25_spill] sm:$0xff]  ;;  %v7730_v51 = vmov 1966171168  }
 0x5cd   : > { %v6462_v34 = vadd.f32 %v6461_v59, %v6460_v17  ;;  %7335 = vmatpush1.bf16.msra.mxu1 %v7334_v44  ;;  %v6470_v47 = vrot.slane %v6469_v55, 4  ;;  %v6536_v29 = vmul.f32 %v6504_v14, %v11616_v13  ;;  %v6867_v14 = vunpack.c.l.s4 %v7730_v51 }
 0x5ce   : > { %7337 = vmatprep.subr.bf16.mxu1 %v7336_v42  ;;  %7341 = vmatprep.subr.bf16.mxu0 %v7340_v54  ;;  %v6545_v57 = vmul.f32 %v6513_v56, %v11617_v30 }
 0x5cf   : > { %v6463_v37 = vrot.slane %v6462_v34, 2  ;;  %v6471_v15 = vadd.f32 %v6470_v47, %v6469_v55  ;;  %v7342_v28 = vpack.c.bf16 %v6536_v29, %v6528_v22  ;;  %v6868_v62 = vunpack.c.0.s8 %v6867_v14 }
 0x5d0   : > { %v7344_v26 = vpack.c.bf16 %v6553_v5, %v6545_v57 }
 0x5d1   : > { %v6464_v45 = vadd.f32 %v6463_v37, %v6462_v34  ;;  %7339 = vmatpush1.bf16.msra.mxu1 %v7338_v27  ;;  %v6472_v60 = vrot.slane %v6471_v15, 2  ;;  %7343 = vmatpush1.bf16.msra.mxu0 %v7342_v28  ;;  %v11627_v34 = vld [vmem:[#allocation6_spill] sm:$0xff] }
 0x5d2   : > { %7345 = vmatprep.subr.bf16.mxu0 %v7344_v26  ;;  %v6871_v33 = vsub.s32 %v6868_v62, %v11627_v34 }
 0x5d3   : > { %v6465_v23 = vrot.slane %v6464_v45, 1  ;;  %v6473_v46 = vadd.f32 %v6472_v60, %v6471_v15 }
 0x5d4   : > { %7219 = vmatmul.mubr.msk.f32.vlgmr.msra.gmra.mrb[64].mxu1 %vm5359_vm12, %v11203_v49 }
 0x5d5   : > { %v6466_v10 = vadd.f32 %v6465_v23, %v6464_v45  ;;  %6847 = vmatprep.mubr.f32.mxu1 %v11522_v0  ;;  %v6474_v52 = vrot.slane %v6473_v46, 1  ;;  %7347 = vmatpush1.bf16.msra.mxu0 %v7346_v12  ;;  %v11618_v0 = vld [vmem:[#allocation24_spill] sm:$0xff]  ;;  %v11619_v12 = vld [vmem:[#allocation26_spill] sm:$0xff] }
 0x5d7   : > { %v6482_v61 = vmax.f32 %v6466_v10, 1e-24  ;;  %v6475_v50 = vadd.f32 %v6474_v52, %v6473_v46 }
 0x5d8   : > { %7220 = vmatmul.mubr.msk.f32.vlgmr.msra.gmra.mrb[66].mxu0 %vm5359_vm12, %v11203_v49 }
 0x5d9   : > { %7648 = vrsqrt.f32 %v6482_v61  ;;  %v6483_v5 = vmax.f32 %v6475_v50, 1e-24 }
 0x5db   : > { %7650 = vrsqrt.f32 %v6483_v5 }
 0x5e3   : > { %v7649_v32 = vpop.eup %7648 }
 0x5e4   : > { %v6514_v27 = vmul.f32 %v7649_v32, %v11230_v3  ;;  %v6522_v31 = vmul.f32 %v7649_v32, %v6370_v21  ;;  %v6498_v43 = vmul.f32 %v7649_v32, %v11210_v11  ;;  %v6506_v35 = vmul.f32 %v7649_v32, %v11216_v8 }
 0x5e5   : > { %v7651_v6 = vpop.eup %7650 }
 0x5e6   : > { %v6546_v41 = vmul.f32 %v6514_v27, %v11618_v0  ;;  %v6554_v18 = vmul.f32 %v6522_v31, %v11619_v12  ;;  %v6530_v25 = vmul.f32 %v6498_v43, %v11620_v16  ;;  %v6538_v20 = vmul.f32 %v6506_v35, %v11621_v53 }
 0x5e7   : > { %v6523_v17 = vmul.f32 %v7651_v6, %v6371_v63  ;;  %v6499_v19 = vmul.f32 %v7651_v6, %v11213_v4  ;;  %v6507_v58 = vmul.f32 %v7651_v6, %v11218_v2  ;;  %v6515_v3 = vmul.f32 %v7651_v6, %v11234_v1  ;;  %v6561_v4 = vpop.permute.xlu0 %6560  ;;  %v11626_v2 = vld [vmem:[#allocation8_spill] sm:$0xff] }
 0x5e8   : > { %v7354_v21 = vpack.c.bf16 %v6554_v18, %v6546_v41  ;;  %v7350_v11 = vpack.c.bf16 %v6538_v20, %v6530_v25  ;;  %v6566_v1 = vrot.slane %v6561_v4, %v11626_v2 }
 0x5e9   : > { %v6555_v8 = vmul.f32 %v6523_v17, %v11622_v7  ;;  %v6531_v38 = vmul.f32 %v6499_v19, %v11623_v39  ;;  %v6539_v36 = vmul.f32 %v6507_v58, %v11624_v40  ;;  %v6547_v59 = vmul.f32 %v6515_v3, %v11625_v24 }
 0x5eb   : > { %v7348_v44 = vpack.c.bf16 %v6539_v36, %v6531_v38  ;;  %v7352_v42 = vpack.c.bf16 %v6555_v8, %v6547_v59 }
 0x5ed   : > { %7349 = vmatprep.subr.bf16.mxu1 %v7348_v44 }
 0x5ee   : > { %7351 = vmatpush1.bf16.msra.mxu1 %v7350_v11 }
 0x5ef   : > { %7353 = vmatprep.subr.bf16.mxu1 %v7352_v42 }
 0x5f2   : > { %7355 = vmatpush1.bf16.msra.mxu1 %v7354_v21 }
 0x5f5   : > { %7221 = vmatmul.mubr.msk.f32.vlgmr.msra.gmra.mrb[66].mxu1 %vm5359_vm12, %v11203_v49 }
 0x685   : > { %v6636_v63 = vpop.f32.mrb[64].mxu0 }
 0x686   : > { %v6637_v9 = vadd.f32 %v6636_v63, %v6566_v1  ;;  %v6638_v48 = vpop.f32.mrb[65].mxu0 }
 0x687   : > { %v6639_v55 = vadd.f32 %v6638_v48, %v6566_v1 }
 0x689   : > { %v6862_v54 = vcombine.low %v6637_v9, %v6639_v55 }
 0x68b   : > { %v6872_v29 = vrot.slane %v6862_v54, %v6871_v33 }
 0x6a7   : > { %v6707_v56 = vpop.f32.mrb[64].mxu1 }
 0x6a8   : > { %v6708_v22 = vadd.f32 %v6707_v56, %v6566_v1  ;;  %v6709_v47 = vpop.f32.mrb[65].mxu1 }
 0x6a9   : > { %v6710_v13 = vadd.f32 %v6709_v47, %v6566_v1 }
 0x6ab   : > { %v6863_v49 = vcombine.low %v6708_v22, %v6710_v13  ;;  %v6778_v30 = vpop.f32.mrb[66].mxu0 }
 0x6ac   : > { %v6779_v37 = vadd.f32 %v6778_v30, %v6566_v1  ;;  %v6780_v15 = vpop.f32.mrb[67].mxu0 }
 0x6ad   : > { %v6879_v57 = vrot.slane %v6863_v49, %v6871_v33  ;;  %v6781_v28 = vadd.f32 %v6780_v15, %v6566_v1 }
 0x6af   : > { %v6894_v26 = vcombine.low %v6872_v29, %v6879_v57  ;;  %v6864_v45 = vcombine.low %v6779_v37, %v6781_v28 }
 0x6b1   : > { %v6886_v52 = vrot.slane %v6864_v45, %v6871_v33  ;;  %v6902_v32 = vrot.slane %v6894_v26, %v6871_v33 }
 0x6c8   : > { %v6849_v60 = vpop.f32.mrb[66].mxu1 }
 0x6c9   : > { %v6850_v23 = vadd.f32 %v6849_v60, %v6566_v1  ;;  %v6851_v46 = vpop.f32.mrb[67].mxu1 }
 0x6ca   : > { %v6852_v10 = vadd.f32 %v6851_v46, %v6566_v1 }
 0x6cc   : > { %v6865_v61 = vcombine.low %v6850_v23, %v6852_v10 }
 0x6ce   : > { %v6893_v50 = vrot.slane %v6865_v61, %v6871_v33 }
 0x6d0   : > { %v6895_v5 = vcombine.low %v6886_v52, %v6893_v50 }
 0x6d2   : > { %v6909_v27 = vrot.slane %v6895_v5, %v6871_v33 }
 0x6d4   : > { %v6910_v31 = vcombine.low %v6902_v32, %v6909_v27 }
 0x6d6   : > { %6912 = vst [vmem:[%s382_s14] sm:$0xff] %v6910_v31 }
 0x6d7   : > { %7669 = shalt.err (!%p7666_p3)
}
 0x6d8   : > { %s7670_s30 = scalar_lea.hbm %s11303_s18, 128  ;;  %s7674_s16 = scalar_lea.hbm %s11356_s11, 256 }
 0x6d9   : > { %p7671_p4 = scmp.ne.s32.totalorder %s11303_s18, %s7670_s30  ;;  %p7675_p9 = scmp.lt.u32.totalorder %s11303_s18, %s11356_s11 }
 0x6da   : > { %p7676_p10 = scmp.lt.u32.totalorder %s7674_s16, %s7670_s30  ;;  %p7678_p12 = scmp.lt.u32.totalorder %s7670_s30, %s11303_s18 }
 0x6db   : > { %p7672_p7 = pnand %p7671_p4, %p7833_p5 }
 0x6dc   : > { %p7677_p11 = por %p7676_p10, %p7675_p9 }
 0x6dd   : > { %p7673_p8 = pneg %p7672_p7 }
 0x6de   : > { %p7679_p13 = por %p7678_p12, %p7677_p11 }
 0x6e0   : > { %p7680_p0 = pnand %p7679_p13, %p7673_p8 }
 0x6e2   : > { %7683 = shalt.err (!%p7680_p0)
}
 0x6e3   : > { %7484 = dma.vmem_to_hbm [thread:$0]  (%p7833_p5), %s11305_s15, 128, %s11303_s18, %s6914_s23  }
 0x6e4 PF: > { %p7490_p1 = scmp.ge.s32.totalorder %s7718_s22, 2  ;;  %s6940_s25 = sand.u32 1, %s7706_s19  }
 0x6e5   : > { %s6941_s26 = scalar_lea.sflag [#allocation4], %s6940_s25 }
 0x6e6   : > { %p7487_p2 = pnand %p7490_p1, %p7837_p6 }
 0x6e8   : > { %7701 = dma.done.wait (!%p7487_p2), %s6941_s26, 128  }
 0x6e9   : > { %7703 = vsyncadd (!%p7487_p2), %s6941_s26, 4294967168  ;;  %p23_p3 = scmp.ge.s32.totalorder %s7820_s24, 4   ;;  %s11628_s19 = smov %s7710_s20 }
 0x6ea   : > { %s11629_s20 = smov %s7714_s21  ;;  %s11630_s21 = smov %s7831_s27 }
 0x6eb   : > { %s11631_s22 = smov %s7820_s24  ;;  %25 = sbr.rel (!%p23_p3) target bundleno = 6 (0x6), region = 99 }
 0x6f2   :  { %6946 = vsyncpa [#allocation4], 1 }
 0x6f3   :  { %6948 = vsyncpa [#allocation4 + $0x1], 1 }

</bundles_post_ra>
